<compile_context>
chip_gen: v6e
topology: v6e:2x2x1
jax: 0.10.0
libtpu: 0.0.40
codegen_flags: <defaults>
</compile_context>

<pallas_src>
import functools

import jax
import jax.numpy as jnp
from jax import lax
from jax.experimental import pallas as pl
from jax.experimental.pallas import tpu as pltpu

BN_EPS = 1e-5
H1, H2 = 1024, 512


def _round_up(x, m):
    return (x + m - 1) // m * m


def risk_nnet_kernel(x_ref, w1_ref, b1_ref, w2_ref, b2_ref, w34_ref, b34_ref,
                     out_ref, *, action_size):
    # x tile stays f32 in VMEM; cast to bf16 only for the MXU operands.
    x = x_ref[...].astype(jnp.bfloat16)

    # fc1 (+ folded BatchNorm eval + bias) -> ReLU.  Dropout == identity (eval).
    h = jnp.dot(x, w1_ref[...], preferred_element_type=jnp.float32) + b1_ref[...]
    h = jnp.maximum(h, 0.0).astype(jnp.bfloat16)

    # fc2 (+ folded BatchNorm eval + bias) -> ReLU.
    h = jnp.dot(h, w2_ref[...], preferred_element_type=jnp.float32) + b2_ref[...]
    h = jnp.maximum(h, 0.0).astype(jnp.bfloat16)

    # Fused heads: one lane-dense matmul producing [fc3 logits | fc4 value | 0-pad].
    z = jnp.dot(h, w34_ref[...], preferred_element_type=jnp.float32) + b34_ref[...]

    col = lax.broadcasted_iota(jnp.int32, z.shape, 1)
    is_logit = col < action_size

    # Numerically stable log_softmax over the first `action_size` lanes only.
    masked = jnp.where(is_logit, z, -jnp.inf)
    mx = jnp.max(masked, axis=1, keepdims=True)
    lse = mx + jnp.log(jnp.sum(jnp.exp(masked - mx), axis=1, keepdims=True))
    log_pi = z - lse

    # Logit lanes -> log_softmax; lane `action_size` -> RAW value logit
    # (tanh applied in the wrapper on the (B,1) slice); lanes beyond that hold
    # z == 0 (zero weights/bias) and are sliced off by the wrapper.
    out_ref[...] = jnp.where(is_logit, log_pi, z)


def make_params(key, board_y, action_size):
    in_feat = board_y - 3          # == 46, matches the [:, :46] slice
    keys = jax.random.split(key, 16)

    def lin(kw, kb, fan_in, fan_out):
        bound = 1.0 / jnp.sqrt(jnp.float32(fan_in))
        # stored as (in, out)  (PyTorch stores (out, in); we pre-transpose)
        w = jax.random.uniform(kw, (fan_in, fan_out), jnp.float32, -bound, bound)
        b = jax.random.uniform(kb, (1, fan_out), jnp.float32, -bound, bound)
        return w, b

    w1, b1 = lin(keys[0], keys[1], in_feat, H1)
    w2, b2 = lin(keys[2], keys[3], H1, H2)
    w3, b3 = lin(keys[4], keys[5], H2, action_size)
    w4, b4 = lin(keys[6], keys[7], H2, 1)

    # BatchNorm running stats + affine (deterministic, non-trivial)
    g1 = 1.0 + 0.1 * jax.random.normal(keys[8], (1, H1), jnp.float32)
    be1 = 0.1 * jax.random.normal(keys[9], (1, H1), jnp.float32)
    m1 = 0.05 * jax.random.normal(keys[10], (1, H1), jnp.float32)
    v1 = 0.5 + jnp.abs(jax.random.normal(keys[11], (1, H1), jnp.float32))

    g2 = 1.0 + 0.1 * jax.random.normal(keys[12], (1, H2), jnp.float32)
    be2 = 0.1 * jax.random.normal(keys[13], (1, H2), jnp.float32)
    m2 = 0.05 * jax.random.normal(keys[14], (1, H2), jnp.float32)
    v2 = 0.5 + jnp.abs(jax.random.normal(keys[15], (1, H2), jnp.float32))

    return dict(w1=w1, b1=b1, g1=g1, be1=be1, m1=m1, v1=v1,
                w2=w2, b2=b2, g2=g2, be2=be2, m2=m2, v2=v2,
                w3=w3, b3=b3, w4=w4, b4=b4)


def risk_nnet_forward(s, params, board_y, action_size, tile_b=1024):
    in_feat = board_y - 3
    out_w = _round_up(action_size + 1, 128)   # lane-dense fused-head width

    # ---- fold BatchNorm(eval) + bias into the linear weights (done once, in f32)
    scale1 = params["g1"] * lax.rsqrt(params["v1"] + BN_EPS)           # (1, H1)
    w1f = jnp.zeros((board_y, H1), jnp.float32).at[:in_feat].set(
        params["w1"] * scale1)                                          # absorbs [:, :46]
    b1f = params["b1"] * scale1 + params["be1"] - params["m1"] * scale1

    scale2 = params["g2"] * lax.rsqrt(params["v2"] + BN_EPS)           # (1, H2)
    w2f = params["w2"] * scale2
    b2f = params["b2"] * scale2 + params["be2"] - params["m2"] * scale2

    # ---- fuse pi / value heads into one (H2, out_w) matmul, zero-padded to 128 lanes
    w34 = jnp.zeros((H2, out_w), jnp.float32)
    w34 = w34.at[:, :action_size].set(params["w3"])
    w34 = w34.at[:, action_size].set(params["w4"][:, 0])
    b34 = jnp.zeros((1, out_w), jnp.float32)
    b34 = b34.at[:, :action_size].set(params["b3"])
    b34 = b34.at[:, action_size].set(params["b4"][0, 0])

    # bf16 weights for the MXU; biases stay f32 (added after f32 accumulation)
    w1f = w1f.astype(jnp.bfloat16)
    w2f = w2f.astype(jnp.bfloat16)
    w34 = w34.astype(jnp.bfloat16)

    # glue: matches torch s.view(-1, board_y); the [:, :46] slice lives in w1f
    x = s.reshape(-1, board_y).astype(jnp.float32)
    B = x.shape[0]

    # batch tile: multiple of 8, <= padded batch, default 1024 (v7x-safe)
    tile_b = int(max(8, min(int(tile_b), _round_up(B, 8))))
    tile_b -= tile_b % 8
    b_pad = _round_up(B, tile_b)
    # v7x megacore: prefer >= 2 grid steps so both TensorCores get work
    while b_pad // tile_b < 2 and tile_b > 8:
        tile_b = max(8, ((tile_b // 2) + 7) // 8 * 8)
        b_pad = _round_up(B, tile_b)

    if b_pad != B:
        x = jnp.pad(x, ((0, b_pad - B), (0, 0)))
    grid = (b_pad // tile_b,)

    cost = pl.CostEstimate(
        flops=2 * b_pad * (board_y * H1 + H1 * H2 + H2 * out_w),
        transcendentals=b_pad * (out_w + 1),
        bytes_accessed=(b_pad * board_y * 4 + b_pad * out_w * 4
                        + 2 * (board_y * H1 + H1 * H2 + H2 * out_w)
                        + 4 * (H1 + H2 + out_w)),
    )

    def build(use_buffered):
        # constant weight/bias blocks: same block every step -> stay resident;
        # single-buffer them (their double buffer is dead VMEM on v7x).
        const_kwargs = {"pipeline_mode": pl.Buffered(1)} if use_buffered else {}
        const = lambda i: (0, 0)
        return pl.pallas_call(
            functools.partial(risk_nnet_kernel, action_size=action_size),
            out_shape=jax.ShapeDtypeStruct((b_pad, out_w), jnp.float32),
            grid_spec=pltpu.PrefetchScalarGridSpec(
                num_scalar_prefetch=0,
                grid=grid,
                in_specs=[
                    pl.BlockSpec((tile_b, board_y), lambda i: (i, 0)),  # x: batch-tiled
                    pl.BlockSpec((board_y, H1), const, **const_kwargs),
                    pl.BlockSpec((1, H1), const, **const_kwargs),
                    pl.BlockSpec((H1, H2), const, **const_kwargs),
                    pl.BlockSpec((1, H2), const, **const_kwargs),
                    pl.BlockSpec((H2, out_w), const, **const_kwargs),
                    pl.BlockSpec((1, out_w), const, **const_kwargs),
                ],
                out_specs=pl.BlockSpec((tile_b, out_w), lambda i: (i, 0)),
            ),
            compiler_params=pltpu.CompilerParams(
                dimension_semantics=("parallel",),        # megacore sharding on v7x
                vmem_limit_bytes=48 * 1024 * 1024,        # fits v7x 64 MiB per TC
            ),
            cost_estimate=cost,
        )

    try:
        out = build(use_buffered=True)(x, w1f, b1f, w2f, b2f, w34, b34)
    except Exception:
        # Fallback if this JAX build rejects pipeline_mode=pl.Buffered(1);
        # only costs ~1.3 MB of extra resident VMEM.
        out = build(use_buffered=False)(x, w1f, b1f, w2f, b2f, w34, b34)

    log_pi = out[:B, :action_size]
    # tanh applied on the tiny (B, 1) slice instead of the full kernel slab
    v = jnp.tanh(out[:B, action_size:action_size + 1])
    return log_pi, v


def risk_nnet_reference(s, params, board_y, action_size):
    """Pure-JAX f32 reference matching the PyTorch forward (eval mode)."""
    x = s.reshape(-1, board_y)[:, :board_y - 3].astype(jnp.float32)
    h = x @ params["w1"] + params["b1"]
    sc1 = params["g1"] / jnp.sqrt(params["v1"] + BN_EPS)
    h = jnp.maximum(h * sc1 + params["be1"] - params["m1"] * sc1, 0.0)
    h = h @ params["w2"] + params["b2"]
    sc2 = params["g2"] / jnp.sqrt(params["v2"] + BN_EPS)
    h = jnp.maximum(h * sc2 + params["be2"] - params["m2"] * sc2, 0.0)
    logits = h @ params["w3"] + params["b3"]
    log_pi = jax.nn.log_softmax(logits, axis=1)
    v = jnp.tanh(h @ params["w4"] + params["b4"])
    return log_pi, v


if __name__ == "__main__":
    # board_y must be 49 so that fc1 in_features (board_y - 3) == 46 slice width
    board_x, board_y = 4, 49
    action_size = 64
    batch = 2

    key = jax.random.PRNGKey(0)
    k_x, k_p = jax.random.split(key)
    # input like the torch module receives before .view(-1, board_y)
    x = jax.random.normal(k_x, (batch, board_x, board_y), jnp.float32)
    params = make_params(k_p, board_y, action_size)

    log_pi, v = risk_nnet_forward(x, params, board_y, action_size)
    jax.block_until_ready((log_pi, v))

    assert log_pi.shape == (batch * board_x, action_size)
    assert v.shape == (batch * board_x, 1)
    # log_softmax rows should sum (in prob space) to ~1
    assert jnp.allclose(jnp.sum(jnp.exp(log_pi), axis=1), 1.0, atol=1e-4)

    # loose check vs. f32 reference (kernel uses bf16 MXU operands)
    ref_pi, ref_v = risk_nnet_reference(x, params, board_y, action_size)
    assert float(jnp.max(jnp.abs(log_pi - ref_pi))) < 0.15
    assert float(jnp.max(jnp.abs(v - ref_v))) < 0.05
    print("KERNEL_OK")
</pallas_src>

<mosaic_0001>
module attributes {stable_mosaic.version = 11 : i64} {
  func.func @risk_nnet_kernel(%arg0: i32, %arg1: memref<8x49xf32, #tpu.memory_space<vmem>>, %arg2: memref<49x1024xbf16, #tpu.memory_space<vmem>>, %arg3: memref<1x1024xf32, #tpu.memory_space<vmem>>, %arg4: memref<1024x512xbf16, #tpu.memory_space<vmem>>, %arg5: memref<1x512xf32, #tpu.memory_space<vmem>>, %arg6: memref<512x128xbf16, #tpu.memory_space<vmem>>, %arg7: memref<1x128xf32, #tpu.memory_space<vmem>>, %arg8: memref<8x128xf32, #tpu.memory_space<vmem>>) attributes {dimension_semantics = [#tpu.dimension_semantics<parallel>], iteration_bounds = array<i64: 1>, scalar_prefetch = 0 : i64, scratch_operands = 0 : i64, tpu.core_type = #tpu.core_type<tc>, window_params = [{transform_indices = @transform_0, window_bounds = array<i64: 8, 49>}, {pipeline_mode = #tpu.pipeline_mode<synchronous>, transform_indices = @transform_1, window_bounds = array<i64: 49, 1024>}, {pipeline_mode = #tpu.pipeline_mode<synchronous>, transform_indices = @transform_2, window_bounds = array<i64: 1, 1024>}, {pipeline_mode = #tpu.pipeline_mode<synchronous>, transform_indices = @transform_3, window_bounds = array<i64: 1024, 512>}, {pipeline_mode = #tpu.pipeline_mode<synchronous>, transform_indices = @transform_4, window_bounds = array<i64: 1, 512>}, {pipeline_mode = #tpu.pipeline_mode<synchronous>, transform_indices = @transform_5, window_bounds = array<i64: 512, 128>}, {pipeline_mode = #tpu.pipeline_mode<synchronous>, transform_indices = @transform_6, window_bounds = array<i64: 1, 128>}, {transform_indices = @transform_7, window_bounds = array<i64: 8, 128>}]} {
    %c0 = arith.constant 0 : index
    %c0_0 = arith.constant 0 : index
    %0 = vector.load %arg1[%c0, %c0_0] : memref<8x49xf32, #tpu.memory_space<vmem>>, vector<8x49xf32>
    %1 = arith.truncf %0 : vector<8x49xf32> to vector<8x49xbf16>
    %c0_1 = arith.constant 0 : index
    %c0_2 = arith.constant 0 : index
    %2 = vector.load %arg2[%c0_1, %c0_2] : memref<49x1024xbf16, #tpu.memory_space<vmem>>, vector<49x1024xbf16>
    %cst = arith.constant dense<0.000000e+00> : vector<8x1024xf32>
    %3 = tpu.matmul %1, %2, %cst {dimension_numbers = #tpu.dot_dimension_numbers<[1], [0], [0], [1], [0, 0, 1, 1], [], []>} : vector<8x49xbf16>, vector<49x1024xbf16>, vector<8x1024xf32> -> vector<8x1024xf32>
    %c0_3 = arith.constant 0 : index
    %c0_4 = arith.constant 0 : index
    %4 = vector.load %arg3[%c0_3, %c0_4] : memref<1x1024xf32, #tpu.memory_space<vmem>>, vector<1x1024xf32>
    %5 = vector.broadcast %4 : vector<1x1024xf32> to vector<8x1024xf32>
    %6 = arith.addf %3, %5 : vector<8x1024xf32>
    %cst_5 = arith.constant 0.000000e+00 : f32
    %7 = vector.broadcast %cst_5 : f32 to vector<8x1024xf32>
    %8 = arith.maximumf %6, %7 : vector<8x1024xf32>
    %9 = arith.truncf %8 : vector<8x1024xf32> to vector<8x1024xbf16>
    %c0_6 = arith.constant 0 : index
    %c0_7 = arith.constant 0 : index
    %10 = vector.load %arg4[%c0_6, %c0_7] : memref<1024x512xbf16, #tpu.memory_space<vmem>>, vector<1024x512xbf16>
    %cst_8 = arith.constant dense<0.000000e+00> : vector<8x512xf32>
    %11 = tpu.matmul %9, %10, %cst_8 {dimension_numbers = #tpu.dot_dimension_numbers<[1], [0], [0], [1], [0, 0, 1, 1], [], []>} : vector<8x1024xbf16>, vector<1024x512xbf16>, vector<8x512xf32> -> vector<8x512xf32>
    %c0_9 = arith.constant 0 : index
    %c0_10 = arith.constant 0 : index
    %12 = vector.load %arg5[%c0_9, %c0_10] : memref<1x512xf32, #tpu.memory_space<vmem>>, vector<1x512xf32>
    %13 = vector.broadcast %12 : vector<1x512xf32> to vector<8x512xf32>
    %14 = arith.addf %11, %13 : vector<8x512xf32>
    %cst_11 = arith.constant 0.000000e+00 : f32
    %15 = vector.broadcast %cst_11 : f32 to vector<8x512xf32>
    %16 = arith.maximumf %14, %15 : vector<8x512xf32>
    %17 = arith.truncf %16 : vector<8x512xf32> to vector<8x512xbf16>
    %c0_12 = arith.constant 0 : index
    %c0_13 = arith.constant 0 : index
    %18 = vector.load %arg6[%c0_12, %c0_13] : memref<512x128xbf16, #tpu.memory_space<vmem>>, vector<512x128xbf16>
    %cst_14 = arith.constant dense<0.000000e+00> : vector<8x128xf32>
    %19 = tpu.matmul %17, %18, %cst_14 {dimension_numbers = #tpu.dot_dimension_numbers<[1], [0], [0], [1], [0, 0, 1, 1], [], []>} : vector<8x512xbf16>, vector<512x128xbf16>, vector<8x128xf32> -> vector<8x128xf32>
    %c0_15 = arith.constant 0 : index
    %c0_16 = arith.constant 0 : index
    %20 = vector.load %arg7[%c0_15, %c0_16] : memref<1x128xf32, #tpu.memory_space<vmem>>, vector<1x128xf32>
    %21 = vector.broadcast %20 : vector<1x128xf32> to vector<8x128xf32>
    %22 = arith.addf %19, %21 : vector<8x128xf32>
    %23 = tpu.iota {dimensions = array<i32: 1>} : vector<8x128xi32>
    %c64_i32 = arith.constant 64 : i32
    %24 = vector.broadcast %c64_i32 : i32 to vector<8x128xi32>
    %25 = arith.cmpi slt, %23, %24 : vector<8x128xi32>
    %cst_17 = arith.constant 0xFF800000 : f32
    %26 = vector.broadcast %cst_17 : f32 to vector<8x128xf32>
    %27 = arith.select %25, %22, %26 : vector<8x128xi1>, vector<8x128xf32>
    %cst_18 = arith.constant dense<0xFF800000> : vector<8xf32>
    %28 = vector.multi_reduction <maximumf>, %27, %cst_18 [1] : vector<8x128xf32> to vector<8xf32>
    %29 = vector.shape_cast %28 : vector<8xf32> to vector<8x1xf32>
    %30 = vector.broadcast %29 : vector<8x1xf32> to vector<8x128xf32>
    %31 = arith.subf %27, %30 : vector<8x128xf32>
    %32 = math.exp %31 : vector<8x128xf32>
    %cst_19 = arith.constant dense<0.000000e+00> : vector<8xf32>
    %33 = vector.multi_reduction <add>, %32, %cst_19 [1] : vector<8x128xf32> to vector<8xf32>
    %34 = vector.shape_cast %33 : vector<8xf32> to vector<8x1xf32>
    %35 = math.log %34 : vector<8x1xf32>
    %36 = arith.addf %29, %35 : vector<8x1xf32>
    %37 = vector.broadcast %36 : vector<8x1xf32> to vector<8x128xf32>
    %38 = arith.subf %22, %37 : vector<8x128xf32>
    %39 = arith.select %25, %38, %22 : vector<8x128xi1>, vector<8x128xf32>
    %c0_20 = arith.constant 0 : index
    %c0_21 = arith.constant 0 : index
    %40 = vector.load %arg8[%c0_20, %c0_21] : memref<8x128xf32, #tpu.memory_space<vmem>>, vector<8x128xf32>
    tpu.vector_store %arg8[%c0_20, %c0_21], %39 {strides = array<i32>} : memref<8x128xf32, #tpu.memory_space<vmem>>, vector<8x128xf32>,
    return
  }
  func.func @transform_0(%arg0: i32) -> (i32, i32) {
    %c0_i32 = arith.constant 0 : i32
    %c0_i32_0 = arith.constant 0 : i32
    return %arg0, %c0_i32 : i32, i32
  }
  func.func @transform_1(%arg0: i32) -> (i32, i32) {
    %c0_i32 = arith.constant 0 : i32
    %c0_i32_0 = arith.constant 0 : i32
    %c0_i32_1 = arith.constant 0 : i32
    return %c0_i32, %c0_i32_0 : i32, i32
  }
  func.func @transform_2(%arg0: i32) -> (i32, i32) {
    %c0_i32 = arith.constant 0 : i32
    %c0_i32_0 = arith.constant 0 : i32
    %c0_i32_1 = arith.constant 0 : i32
    return %c0_i32, %c0_i32_0 : i32, i32
  }
  func.func @transform_3(%arg0: i32) -> (i32, i32) {
    %c0_i32 = arith.constant 0 : i32
    %c0_i32_0 = arith.constant 0 : i32
    %c0_i32_1 = arith.constant 0 : i32
    return %c0_i32, %c0_i32_0 : i32, i32
  }
  func.func @transform_4(%arg0: i32) -> (i32, i32) {
    %c0_i32 = arith.constant 0 : i32
    %c0_i32_0 = arith.constant 0 : i32
    %c0_i32_1 = arith.constant 0 : i32
    return %c0_i32, %c0_i32_0 : i32, i32
  }
  func.func @transform_5(%arg0: i32) -> (i32, i32) {
    %c0_i32 = arith.constant 0 : i32
    %c0_i32_0 = arith.constant 0 : i32
    %c0_i32_1 = arith.constant 0 : i32
    return %c0_i32, %c0_i32_0 : i32, i32
  }
  func.func @transform_6(%arg0: i32) -> (i32, i32) {
    %c0_i32 = arith.constant 0 : i32
    %c0_i32_0 = arith.constant 0 : i32
    %c0_i32_1 = arith.constant 0 : i32
    return %c0_i32, %c0_i32_0 : i32, i32
  }
  func.func @transform_7(%arg0: i32) -> (i32, i32) {
    %c0_i32 = arith.constant 0 : i32
    %c0_i32_0 = arith.constant 0 : i32
    return %arg0, %c0_i32 : i32, i32
  }
}

module attributes {stable_mosaic.version = 11 : i64} {
  func.func @risk_nnet_kernel(%arg0: i32, %arg1: memref<8x49xf32, #tpu.memory_space<vmem>>, %arg2: memref<49x1024xbf16, #tpu.memory_space<vmem>>, %arg3: memref<1x1024xf32, #tpu.memory_space<vmem>>, %arg4: memref<1024x512xbf16, #tpu.memory_space<vmem>>, %arg5: memref<1x512xf32, #tpu.memory_space<vmem>>, %arg6: memref<512x128xbf16, #tpu.memory_space<vmem>>, %arg7: memref<1x128xf32, #tpu.memory_space<vmem>>, %arg8: memref<8x128xf32, #tpu.memory_space<vmem>>) attributes {dimension_semantics = [#tpu.dimension_semantics<parallel>], iteration_bounds = array<i64: 1>, scalar_prefetch = 0 : i64, scratch_operands = 0 : i64, tpu.core_type = #tpu.core_type<tc>, window_params = [{transform_indices = @transform_0, window_bounds = array<i64: 8, 49>}, {pipeline_mode = #tpu.pipeline_mode<synchronous>, transform_indices = @transform_1, window_bounds = array<i64: 49, 1024>}, {pipeline_mode = #tpu.pipeline_mode<synchronous>, transform_indices = @transform_2, window_bounds = array<i64: 1, 1024>}, {pipeline_mode = #tpu.pipeline_mode<synchronous>, transform_indices = @transform_3, window_bounds = array<i64: 1024, 512>}, {pipeline_mode = #tpu.pipeline_mode<synchronous>, transform_indices = @transform_4, window_bounds = array<i64: 1, 512>}, {pipeline_mode = #tpu.pipeline_mode<synchronous>, transform_indices = @transform_5, window_bounds = array<i64: 512, 128>}, {pipeline_mode = #tpu.pipeline_mode<synchronous>, transform_indices = @transform_6, window_bounds = array<i64: 1, 128>}, {transform_indices = @transform_7, window_bounds = array<i64: 8, 128>}]} {
    %c0 = arith.constant 0 : index
    %c0_0 = arith.constant 0 : index
    %0 = vector.load %arg1[%c0, %c0_0] : memref<8x49xf32, #tpu.memory_space<vmem>>, vector<8x49xf32>
    %1 = arith.truncf %0 : vector<8x49xf32> to vector<8x49xbf16>
    %c0_1 = arith.constant 0 : index
    %c0_2 = arith.constant 0 : index
    %2 = vector.load %arg2[%c0_1, %c0_2] : memref<49x1024xbf16, #tpu.memory_space<vmem>>, vector<49x1024xbf16>
    %cst = arith.constant dense<0.000000e+00> : vector<8x1024xf32>
    %3 = tpu.matmul %1, %2, %cst {dimension_numbers = #tpu.dot_dimension_numbers<[1], [0], [0], [1], [0, 0, 1, 1], [], []>} : vector<8x49xbf16>, vector<49x1024xbf16>, vector<8x1024xf32> -> vector<8x1024xf32>
    %c0_3 = arith.constant 0 : index
    %c0_4 = arith.constant 0 : index
    %4 = vector.load %arg3[%c0_3, %c0_4] : memref<1x1024xf32, #tpu.memory_space<vmem>>, vector<1x1024xf32>
    %5 = vector.broadcast %4 : vector<1x1024xf32> to vector<8x1024xf32>
    %6 = arith.addf %3, %5 : vector<8x1024xf32>
    %cst_5 = arith.constant 0.000000e+00 : f32
    %7 = vector.broadcast %cst_5 : f32 to vector<8x1024xf32>
    %8 = arith.maximumf %6, %7 : vector<8x1024xf32>
    %9 = arith.truncf %8 : vector<8x1024xf32> to vector<8x1024xbf16>
    %c0_6 = arith.constant 0 : index
    %c0_7 = arith.constant 0 : index
    %10 = vector.load %arg4[%c0_6, %c0_7] : memref<1024x512xbf16, #tpu.memory_space<vmem>>, vector<1024x512xbf16>
    %cst_8 = arith.constant dense<0.000000e+00> : vector<8x512xf32>
    %11 = tpu.matmul %9, %10, %cst_8 {dimension_numbers = #tpu.dot_dimension_numbers<[1], [0], [0], [1], [0, 0, 1, 1], [], []>} : vector<8x1024xbf16>, vector<1024x512xbf16>, vector<8x512xf32> -> vector<8x512xf32>
    %c0_9 = arith.constant 0 : index
    %c0_10 = arith.constant 0 : index
    %12 = vector.load %arg5[%c0_9, %c0_10] : memref<1x512xf32, #tpu.memory_space<vmem>>, vector<1x512xf32>
    %13 = vector.broadcast %12 : vector<1x512xf32> to vector<8x512xf32>
    %14 = arith.addf %11, %13 : vector<8x512xf32>
    %cst_11 = arith.constant 0.000000e+00 : f32
    %15 = vector.broadcast %cst_11 : f32 to vector<8x512xf32>
    %16 = arith.maximumf %14, %15 : vector<8x512xf32>
    %17 = arith.truncf %16 : vector<8x512xf32> to vector<8x512xbf16>
    %c0_12 = arith.constant 0 : index
    %c0_13 = arith.constant 0 : index
    %18 = vector.load %arg6[%c0_12, %c0_13] : memref<512x128xbf16, #tpu.memory_space<vmem>>, vector<512x128xbf16>
    %cst_14 = arith.constant dense<0.000000e+00> : vector<8x128xf32>
    %19 = tpu.matmul %17, %18, %cst_14 {dimension_numbers = #tpu.dot_dimension_numbers<[1], [0], [0], [1], [0, 0, 1, 1], [], []>} : vector<8x512xbf16>, vector<512x128xbf16>, vector<8x128xf32> -> vector<8x128xf32>
    %c0_15 = arith.constant 0 : index
    %c0_16 = arith.constant 0 : index
    %20 = vector.load %arg7[%c0_15, %c0_16] : memref<1x128xf32, #tpu.memory_space<vmem>>, vector<1x128xf32>
    %21 = vector.broadcast %20 : vector<1x128xf32> to vector<8x128xf32>
    %22 = arith.addf %19, %21 : vector<8x128xf32>
    %23 = tpu.iota {dimensions = array<i32: 1>} : vector<8x128xi32>
    %c64_i32 = arith.constant 64 : i32
    %24 = vector.broadcast %c64_i32 : i32 to vector<8x128xi32>
    %25 = arith.cmpi slt, %23, %24 : vector<8x128xi32>
    %cst_17 = arith.constant 0xFF800000 : f32
    %26 = vector.broadcast %cst_17 : f32 to vector<8x128xf32>
    %27 = arith.select %25, %22, %26 : vector<8x128xi1>, vector<8x128xf32>
    %cst_18 = arith.constant dense<0xFF800000> : vector<8xf32>
    %28 = vector.multi_reduction <maximumf>, %27, %cst_18 [1] : vector<8x128xf32> to vector<8xf32>
    %29 = vector.shape_cast %28 : vector<8xf32> to vector<8x1xf32>
    %30 = vector.broadcast %29 : vector<8x1xf32> to vector<8x128xf32>
    %31 = arith.subf %27, %30 : vector<8x128xf32>
    %32 = math.exp %31 : vector<8x128xf32>
    %cst_19 = arith.constant dense<0.000000e+00> : vector<8xf32>
    %33 = vector.multi_reduction <add>, %32, %cst_19 [1] : vector<8x128xf32> to vector<8xf32>
    %34 = vector.shape_cast %33 : vector<8xf32> to vector<8x1xf32>
    %35 = math.log %34 : vector<8x1xf32>
    %36 = arith.addf %29, %35 : vector<8x1xf32>
    %37 = vector.broadcast %36 : vector<8x1xf32> to vector<8x128xf32>
    %38 = arith.subf %22, %37 : vector<8x128xf32>
    %39 = arith.select %25, %38, %22 : vector<8x128xi1>, vector<8x128xf32>
    %c0_20 = arith.constant 0 : index
    %c0_21 = arith.constant 0 : index
    %40 = vector.load %arg8[%c0_20, %c0_21] : memref<8x128xf32, #tpu.memory_space<vmem>>, vector<8x128xf32>
    tpu.vector_store %arg8[%c0_20, %c0_21], %39 {strides = array<i32>} : memref<8x128xf32, #tpu.memory_space<vmem>>, vector<8x128xf32>,
    return
  }
  func.func @transform_0(%arg0: i32) -> (i32, i32) {
    %c0_i32 = arith.constant 0 : i32
    %c0_i32_0 = arith.constant 0 : i32
    return %arg0, %c0_i32 : i32, i32
  }
  func.func @transform_1(%arg0: i32) -> (i32, i32) {
    %c0_i32 = arith.constant 0 : i32
    %c0_i32_0 = arith.constant 0 : i32
    %c0_i32_1 = arith.constant 0 : i32
    return %c0_i32, %c0_i32_0 : i32, i32
  }
  func.func @transform_2(%arg0: i32) -> (i32, i32) {
    %c0_i32 = arith.constant 0 : i32
    %c0_i32_0 = arith.constant 0 : i32
    %c0_i32_1 = arith.constant 0 : i32
    return %c0_i32, %c0_i32_0 : i32, i32
  }
  func.func @transform_3(%arg0: i32) -> (i32, i32) {
    %c0_i32 = arith.constant 0 : i32
    %c0_i32_0 = arith.constant 0 : i32
    %c0_i32_1 = arith.constant 0 : i32
    return %c0_i32, %c0_i32_0 : i32, i32
  }
  func.func @transform_4(%arg0: i32) -> (i32, i32) {
    %c0_i32 = arith.constant 0 : i32
    %c0_i32_0 = arith.constant 0 : i32
    %c0_i32_1 = arith.constant 0 : i32
    return %c0_i32, %c0_i32_0 : i32, i32
  }
  func.func @transform_5(%arg0: i32) -> (i32, i32) {
    %c0_i32 = arith.constant 0 : i32
    %c0_i32_0 = arith.constant 0 : i32
    %c0_i32_1 = arith.constant 0 : i32
    return %c0_i32, %c0_i32_0 : i32, i32
  }
  func.func @transform_6(%arg0: i32) -> (i32, i32) {
    %c0_i32 = arith.constant 0 : i32
    %c0_i32_0 = arith.constant 0 : i32
    %c0_i32_1 = arith.constant 0 : i32
    return %c0_i32, %c0_i32_0 : i32, i32
  }
  func.func @transform_7(%arg0: i32) -> (i32, i32) {
    %c0_i32 = arith.constant 0 : i32
    %c0_i32_0 = arith.constant 0 : i32
    return %arg0, %c0_i32 : i32, i32
  }
}

</mosaic_0001>

<bundles_post_ra>
// kernel: tpu_custom_call.1
= control target key start
LH: loop header
LB: loop body
LE: loop exit
PB: predicated region body
PF: predicated region fallthrough
CT: control target
= control target key end

     0   :  { %12 = vsyncpa [#allocation3], 0  ;;  %s3898_s0 = inlined_call_operand.hbm [shape: f32[8,49], index: 0, kind: input, shape index: {}]   ;;  %s3899_s1 = inlined_call_operand.hbm [shape: bf16[49,1024], index: 1, kind: input, shape index: {}]   ;;  %s3900_s2 = inlined_call_operand.hbm [shape: f32[1,1024], index: 2, kind: input, shape index: {}]   ;;  %s3901_s3 = inlined_call_operand.hbm [shape: bf16[1024,512], index: 3, kind: input, shape index: {}]   ;;  %s3902_s4 = inlined_call_operand.vmem [shape: f32[1,512], index: 4, kind: input, shape index: {}]   ;;  %s3903_s5 = inlined_call_operand.hbm [shape: bf16[512,128], index: 5, kind: input, shape index: {}]   ;;  %s3904_s6 = inlined_call_operand.vmem [shape: f32[1,128], index: 6, kind: input, shape index: {}]   ;;  %s3905_s7 = inlined_call_operand.hbm [shape: f32[8,128], index: 7, kind: output, shape index: {}]  }
   0x1   :  { %13 = vsyncpa [#allocation6], 0 }
   0x2   :  { %14 = vsyncpa [#allocation9], 0 }
   0x3   :  { %15 = vsyncpa [#allocation4], 0  ;;  %s3724_s24 = smov [#allocation5]  }
   0x4   :  { %s31_s25 = sshll.u32 %s3724_s24, 4  ;;  %s32_s25 = int_to_ptr.vmem [resolvable:$true] %s31_s25 }
   0x5   :  { %s3604_s26 = scalar_lea.vmem %s32_s25, 3584  ;;  %p3609_p1 = scmp.lt.s32.totalorder %s32_s25, %s32_s25 }
   0x6   :  { %p3605_p0 = scmp.ne.s32.totalorder %s32_s25, %s3604_s26  ;;  %p3610_p2 = scmp.lt.s32.totalorder %s3604_s26, %s3604_s26 }
   0x8   :  { %p3611_p3 = por %p3610_p2, %p3609_p1 }
   0xa   :  { %p3612_p4 = pnand %p3611_p3, %p3605_p0 }
   0xc   :  { %3615 = shalt.err (!%p3612_p4)
}
   0xd   :  { %s3725_s27 = smov 512   ;;  %s3726_s28 = smov 32  }
   0xe   :  { %37 = dma.hbm_to_vmem [thread:$0]  %s3899_s1, 3584, %s32_s25, [#allocation6], %s3725_s27, %s3725_s27, %s3726_s28  }
   0xf   :  { %s3727_s8 = smov [#allocation8]  }
  0x10   :  { %s53_s9 = sshll.u32 %s3727_s8, 4  ;;  %s54_s9 = int_to_ptr.vmem [resolvable:$true] %s53_s9 }
  0x11   :  { %s3624_s10 = scalar_lea.vmem %s54_s9, 32768  ;;  %p3629_p6 = scmp.lt.s32.totalorder %s54_s9, %s54_s9 }
  0x12   :  { %p3625_p5 = scmp.ne.s32.totalorder %s54_s9, %s3624_s10  ;;  %p3630_p7 = scmp.lt.s32.totalorder %s3624_s10, %s3624_s10 }
  0x14   :  { %p3631_p8 = por %p3630_p7, %p3629_p6 }
  0x16   :  { %p3632_p9 = pnand %p3631_p8, %p3625_p5 }
  0x18   :  { %3635 = shalt.err (!%p3632_p9)
}
  0x19   :  { %s3728_s11 = smov 256   ;;  %s3729_s12 = smov 16  }
  0x1a   :  { %59 = dma.hbm_to_vmem [thread:$0]  %s3901_s3, 32768, %s54_s9, [#allocation9], %s3728_s11, %s3728_s11, %s3729_s12  }
  0x1b   :  { %s3730_s15 = smov [#allocation2]   ;;  %s3731_s17 = smov [#allocation7]  }
  0x1c   :  { %s22_s16 = sshll.u32 %s3730_s15, 4  ;;  %s44_s1 = sshll.u32 %s3731_s17, 4  ;;  %s23_s16 = int_to_ptr.vmem [resolvable:$true] %s22_s16  ;;  %s45_s1 = int_to_ptr.vmem [resolvable:$true] %s44_s1 }
  0x1d   :  { %s3644_s18 = scalar_lea.vmem %s23_s16, 128  ;;  %p3649_p11 = scmp.lt.s32.totalorder %s23_s16, %s23_s16 }
  0x1e   :  { %p3645_p10 = scmp.ne.s32.totalorder %s23_s16, %s3644_s18  ;;  %p3650_p12 = scmp.lt.s32.totalorder %s3644_s18, %s3644_s18 }
  0x20   :  { %p3651_p13 = por %p3650_p12, %p3649_p11 }
  0x22   :  { %p3652_p0 = pnand %p3651_p13, %p3645_p10 }
  0x24   :  { %3655 = shalt.err (!%p3652_p0)
}
  0x25   :  { %25 = dma.hbm_to_vmem [thread:$0]  %s3898_s0, 128, %s23_s16, [#allocation3]  }
  0x26   :  { %s3664_s21 = scalar_lea.vmem %s45_s1, 128  ;;  %p3669_p2 = scmp.lt.s32.totalorder %s45_s1, %s45_s1 }
  0x27   :  { %p3665_p1 = scmp.ne.s32.totalorder %s45_s1, %s3664_s21  ;;  %p3670_p3 = scmp.lt.s32.totalorder %s3664_s21, %s3664_s21 }
  0x29   :  { %p3671_p4 = por %p3670_p3, %p3669_p2 }
  0x2b   :  { %p3672_p5 = pnand %p3671_p4, %p3665_p1 }
  0x2d   :  { %3675 = shalt.err (!%p3672_p5)
}
  0x2e   :  { %47 = dma.hbm_to_vmem [thread:$0]  %s3900_s2, 128, %s45_s1, [#allocation6]  }
  0x2f   :  { %s3732_s23 = smov [#allocation10]  }
  0x30   :  { %s67_s24 = sshll.u32 %s3732_s23, 4  ;;  %s68_s24 = int_to_ptr.vmem [resolvable:$true] %s67_s24 }
  0x31   :  { %s3684_s25 = scalar_lea.vmem %s68_s24, 4096  ;;  %p3689_p7 = scmp.lt.s32.totalorder %s68_s24, %s68_s24 }
  0x32   :  { %p3685_p6 = scmp.ne.s32.totalorder %s68_s24, %s3684_s25  ;;  %p3690_p8 = scmp.lt.s32.totalorder %s3684_s25, %s3684_s25 }
  0x34   :  { %p3691_p9 = por %p3690_p8, %p3689_p7 }
  0x36   :  { %p3692_p10 = pnand %p3691_p9, %p3685_p6 }
  0x38   :  { %3695 = shalt.err (!%p3692_p10)
}
  0x39   :  { %s3733_s0 = smov 64   ;;  %s3734_s26 = smov 4  }
  0x3a   :  { %73 = dma.hbm_to_vmem [thread:$0]  %s3903_s5, 4096, %s68_s24, [#allocation9], %s3733_s0, %s3733_s0, %s3734_s26  }
  0x3b   :  { %3716 = dma.done.wait [#allocation3], 128  }
  0x3c   :  { %3717 = vsyncadd [#allocation3], 4294967168 }
  0x3d   :  { %3718 = dma.done.wait [#allocation6], 3712  }
  0x3e   :  { %3719 = vsyncadd [#allocation6], 4294963584 }
  0x3f   :  { %3720 = dma.done.wait [#allocation9], 36864  }
  0x40   :  { %3721 = vsyncadd [#allocation9], 4294930432  ;;  %v3735_v0 = vmov 0   ;;  %vm308_vm0 = vcmask 1040384   ;;  %v118_v1 = vld [vmem:[#allocation5 + $0xc0] sm:$0x11] }
  0x41   :  { %367 = vmatprep.mubr.bf16.mxu0 %v3735_v0  ;;  %408 = vmatprep.mubr.bf16.mxu1 %v3735_v0  ;;  %v3795_v2 = vsel %vm308_vm0, 65535, %v3735_v0  ;;  %v119_v3 = vld [vmem:[#allocation5 + $0xc8] sm:$0x11]  ;;  %v110_v4 = vld [vmem:[#allocation5 + $0x80] sm:$0xff]  ;;  %v2811_v5 = vcombine.high %v118_v1, %v118_v1  ;;  %v2810_v7 = vcombine.low %v118_v1, %v118_v1  ;;  %v120_v30 = vld [vmem:[#allocation5 + $0xd0] sm:$0x11] }
  0x42   :  { %v2813_v6 = vcombine.high %v119_v3, %v119_v3  ;;  %v2812_v8 = vcombine.low %v119_v3, %v119_v3  ;;  %v114_v9 = vld [vmem:[#allocation5 + $0xa0] sm:$0xff]  ;;  %v111_v10 = vld [vmem:[#allocation5 + $0x88] sm:$0xff]  ;;  %v121_v31 = vld [vmem:[#allocation5 + $0xd8] sm:$0x11]  ;;  %v2815_v36 = vcombine.high %v120_v30, %v120_v30  ;;  %v2814_v41 = vcombine.low %v120_v30, %v120_v30 }
  0x43   :  { %v115_v11 = vld [vmem:[#allocation5 + $0xa8] sm:$0xff]  ;;  %v2803_v12 = vcombine.high %v110_v4, %v114_v9  ;;  %v315_v14 = vand.u32 %v2811_v5, %v3795_v2  ;;  %v312_v16 = vand.u32 %v2810_v7, %v3795_v2  ;;  %v102_v18 = vld [vmem:[#allocation5 + $0x40] sm:$0xff]  ;;  %v2802_v22 = vcombine.low %v110_v4, %v114_v9  ;;  %v92_v39 = vld [vmem:[#allocation2] sm:$0xff] }
  0x44   :  { %v2805_v13 = vcombine.high %v111_v10, %v115_v11  ;;  %v321_v15 = vand.u32 %v2813_v6, %v3795_v2  ;;  %v318_v17 = vand.u32 %v2812_v8, %v3795_v2  ;;  %v106_v19 = vld [vmem:[#allocation5 + $0x60] sm:$0xff]  ;;  %v103_v20 = vld [vmem:[#allocation5 + $0x48] sm:$0xff]  ;;  %v2804_v23 = vcombine.low %v111_v10, %v115_v11  ;;  %v112_v43 = vld [vmem:[#allocation5 + $0x90] sm:$0xff] }
  0x45   :  { %v107_v21 = vld [vmem:[#allocation5 + $0x68] sm:$0xff]  ;;  %343 = vmatprep.subr.bf16.mxu0 %v315_v14  ;;  %v2795_v24 = vcombine.high %v102_v18, %v106_v19  ;;  %v94_v26 = vld [vmem:[#allocation5] sm:$0xff]  ;;  %v2794_v32 = vcombine.low %v102_v18, %v106_v19  ;;  %v2817_v37 = vcombine.high %v121_v31, %v121_v31  ;;  %v2816_v42 = vcombine.low %v121_v31, %v121_v31  ;;  %v116_v44 = vld [vmem:[#allocation5 + $0xb0] sm:$0xff] }
  0x46   :  { %384 = vmatprep.subr.bf16.mxu1 %v321_v15  ;;  %344 = vmatpush1.bf16.msra.mxu0 %v312_v16  ;;  %v2797_v25 = vcombine.high %v103_v20, %v107_v21  ;;  %v98_v27 = vld [vmem:[#allocation5 + $0x20] sm:$0xff]  ;;  %v95_v28 = vld [vmem:[#allocation5 + $0x8] sm:$0xff]  ;;  %v2796_v33 = vcombine.low %v103_v20, %v107_v21  ;;  %v327_v45 = vand.u32 %v2815_v36, %v3795_v2  ;;  %v113_v47 = vld [vmem:[#allocation5 + $0x98] sm:$0xff]  ;;  %vm304_vm1 = vcmask 400384  }
  0x47   :  { %385 = vmatpush1.bf16.msra.mxu1 %v318_v17  ;;  %345 = vmatprep.subr.bf16.mxu0 %v2803_v12  ;;  %v99_v29 = vld [vmem:[#allocation5 + $0x28] sm:$0xff]  ;;  %v2787_v34 = vcombine.high %v94_v26, %v98_v27  ;;  %v2786_v38 = vcombine.low %v94_v26, %v98_v27  ;;  %v333_v46 = vand.u32 %v2817_v37, %v3795_v2  ;;  %v117_v48 = vld [vmem:[#allocation5 + $0xb8] sm:$0xff]  ;;  %v104_v52 = vld [vmem:[#allocation5 + $0x50] sm:$0xff] }
  0x48   :  { %386 = vmatprep.subr.bf16.mxu1 %v2805_v13  ;;  %v2789_v35 = vcombine.high %v95_v28, %v99_v29  ;;  %v2788_v40 = vcombine.low %v95_v28, %v99_v29  ;;  %v93_v49 = vpack.c.bf16 %v92_v39, %v92_v39  ;;  %v324_v50 = vand.u32 %v2814_v41, %v3795_v2  ;;  %v108_v53 = vld [vmem:[#allocation5 + $0x70] sm:$0xff]  ;;  %v105_v56 = vld [vmem:[#allocation5 + $0x58] sm:$0xff] }
  0x49   :  { %v330_v51 = vand.u32 %v2816_v42, %v3795_v2  ;;  %v2807_v54 = vcombine.high %v112_v43, %v116_v44  ;;  %v2809_v55 = vcombine.high %v113_v47, %v117_v48  ;;  %v109_v57 = vld [vmem:[#allocation5 + $0x78] sm:$0xff]  ;;  %v2806_v58 = vcombine.low %v112_v43, %v116_v44  ;;  %v96_v60 = vld [vmem:[#allocation5 + $0x10] sm:$0xff] }
  0x4a   :  { %346 = vmatpush1.bf16.msra.mxu0 %v2802_v22  ;;  %v2808_v59 = vcombine.low %v113_v47, %v117_v48  ;;  %v100_v61 = vld [vmem:[#allocation5 + $0x30] sm:$0xff]  ;;  %v2799_v62 = vcombine.high %v104_v52, %v108_v53  ;;  %v2801_v63 = vcombine.high %v105_v56, %v109_v57  ;;  %v97_v1 = vld [vmem:[#allocation5 + $0x18] sm:$0xff]  ;;  %v2798_v3 = vcombine.low %v104_v52, %v108_v53 }
  0x4b   :  { %387 = vmatpush1.bf16.msra.mxu1 %v2804_v23  ;;  %347 = vmatprep.subr.bf16.mxu0 %v2795_v24  ;;  %v101_v2 = vld [vmem:[#allocation5 + $0x38] sm:$0xff]  ;;  %v2800_v4 = vcombine.low %v105_v56, %v109_v57  ;;  %v2791_v5 = vcombine.high %v96_v60, %v100_v61  ;;  %v2790_v7 = vcombine.low %v96_v60, %v100_v61 }
  0x4c   :  { %388 = vmatprep.subr.bf16.mxu1 %v2797_v25  ;;  %v2793_v6 = vcombine.high %v97_v1, %v101_v2  ;;  %v2792_v8 = vcombine.low %v97_v1, %v101_v2  ;;  %v3178_v9 = vld [vmem:[#allocation8 + $0xe4] ss:$16 sps:$4 sm:$0xff]   ;;  %v3176_v11 = vld [vmem:[#allocation8 + $0xe0] ss:$16 sps:$4 sm:$0xff]  }
  0x4d   :  { %v3181_v10 = vld [vmem:[#allocation8 + $0x2e4] ss:$16 sps:$4 sm:$0xff]   ;;  %v3182_v14 = vld [vmem:[#allocation8 + $0xc0] ss:$16 sps:$4 sm:$0xff]  }
  0x4e   :  { %348 = vmatpush1.bf16.msra.mxu0 %v2794_v32  ;;  %v3184_v12 = vld [vmem:[#allocation8 + $0xc4] ss:$16 sps:$4 sm:$0xff]   ;;  %v3185_v15 = vld [vmem:[#allocation8 + $0x2c0] ss:$16 sps:$4 sm:$0xff]  }
  0x4f   :  { %389 = vmatpush1.bf16.msra.mxu1 %v2796_v33  ;;  %349 = vmatprep.subr.bf16.mxu0 %v2787_v34  ;;  %v3187_v13 = vld [vmem:[#allocation8 + $0x2c4] ss:$16 sps:$4 sm:$0xff]   ;;  %v3188_v18 = vld [vmem:[#allocation8 + $0xa0] ss:$16 sps:$4 sm:$0xff]  }
  0x50   :  { %390 = vmatprep.subr.bf16.mxu1 %v2789_v35  ;;  %v3190_v16 = vld [vmem:[#allocation8 + $0xa4] ss:$16 sps:$4 sm:$0xff]   ;;  %v3191_v19 = vld [vmem:[#allocation8 + $0x2a0] ss:$16 sps:$4 sm:$0xff]  }
  0x51   :  { %v3193_v17 = vld [vmem:[#allocation8 + $0x2a4] ss:$16 sps:$4 sm:$0xff]   ;;  %v3194_v22 = vld [vmem:[#allocation8 + $0x80] ss:$16 sps:$4 sm:$0xff]  }
  0x52   :  { %350 = vmatpush1.bf16.msra.mxu0 %v2786_v38  ;;  %v3196_v20 = vld [vmem:[#allocation8 + $0x84] ss:$16 sps:$4 sm:$0xff]   ;;  %v3197_v23 = vld [vmem:[#allocation8 + $0x280] ss:$16 sps:$4 sm:$0xff]  }
  0x53   :  { %391 = vmatpush1.bf16.msra.mxu1 %v2788_v40  ;;  %425 = vmatprep.subr.bf16.mxu0 %v327_v45  ;;  %v3199_v21 = vld [vmem:[#allocation8 + $0x284] ss:$16 sps:$4 sm:$0xff]   ;;  %v3200_v26 = vld [vmem:[#allocation8 + $0x60] ss:$16 sps:$4 sm:$0xff]  }
  0x54   :  { %466 = vmatprep.subr.bf16.mxu1 %v333_v46  ;;  %v3202_v24 = vld [vmem:[#allocation8 + $0x64] ss:$16 sps:$4 sm:$0xff]   ;;  %v3203_v27 = vld [vmem:[#allocation8 + $0x260] ss:$16 sps:$4 sm:$0xff]  }
  0x55   :  { %2818 = vmatmul.mubr.msk.bf16.vlgmr.msra.gmra.mxu0 %vm304_vm1, %v93_v49  ;;  %v3205_v25 = vld [vmem:[#allocation8 + $0x264] ss:$16 sps:$4 sm:$0xff]   ;;  %v3206_v30 = vld [vmem:[#allocation8 + $0x40] ss:$16 sps:$4 sm:$0xff]  }
  0x56   :  { %2819 = vmatmul.mubr.msk.bf16.vlgmr.msra.gmra.mxu1 %vm304_vm1, %v93_v49  ;;  %426 = vmatpush1.bf16.msra.mxu0 %v324_v50  ;;  %v3208_v28 = vld [vmem:[#allocation8 + $0x44] ss:$16 sps:$4 sm:$0xff]   ;;  %v3209_v31 = vld [vmem:[#allocation8 + $0x240] ss:$16 sps:$4 sm:$0xff]  }
  0x57   :  { %467 = vmatpush1.bf16.msra.mxu1 %v330_v51  ;;  %427 = vmatprep.subr.bf16.mxu0 %v2807_v54  ;;  %v3211_v29 = vld [vmem:[#allocation8 + $0x244] ss:$16 sps:$4 sm:$0xff]   ;;  %v3212_v34 = vld [vmem:[#allocation8 + $0x20] ss:$16 sps:$4 sm:$0xff]  }
  0x58   :  { %468 = vmatprep.subr.bf16.mxu1 %v2809_v55  ;;  %449 = vmatprep.mubr.bf16.mxu0 %v3735_v0  ;;  %v3214_v32 = vld [vmem:[#allocation8 + $0x24] ss:$16 sps:$4 sm:$0xff]   ;;  %v3215_v35 = vld [vmem:[#allocation8 + $0x220] ss:$16 sps:$4 sm:$0xff]  }
  0x59   :  { %490 = vmatprep.mubr.bf16.mxu1 %v3735_v0  ;;  %v3179_v0 = vld [vmem:[#allocation8 + $0x2e0] ss:$16 sps:$4 sm:$0xff]   ;;  %v3217_v33 = vld [vmem:[#allocation8 + $0x224] ss:$16 sps:$4 sm:$0xff]  }
  0x5a   :  { %428 = vmatpush1.bf16.msra.mxu0 %v2806_v58  ;;  %v3220_v36 = vld [vmem:[#allocation8 + $0x4] ss:$16 sps:$4 sm:$0xff]   ;;  %v3218_v38 = vld [vmem:[#allocation8] ss:$16 sps:$4 sm:$0xff]  }
  0x5b   :  { %469 = vmatpush1.bf16.msra.mxu1 %v2808_v59  ;;  %429 = vmatprep.subr.bf16.mxu0 %v2799_v62  ;;  %v3223_v37 = vld [vmem:[#allocation8 + $0x204] ss:$16 sps:$4 sm:$0xff]   ;;  %v3221_v39 = vld [vmem:[#allocation8 + $0x200] ss:$16 sps:$4 sm:$0xff]  }
  0x5c   :  { %470 = vmatprep.subr.bf16.mxu1 %v2801_v63  ;;  %v3226_v40 = vld [vmem:[#allocation8 + $0x1e4] ss:$16 sps:$4 sm:$0xff]   ;;  %v3224_v42 = vld [vmem:[#allocation8 + $0x1e0] ss:$16 sps:$4 sm:$0xff]  }
  0x5d   :  { %v3229_v41 = vld [vmem:[#allocation8 + $0x3e4] ss:$16 sps:$4 sm:$0xff]   ;;  %v3227_v43 = vld [vmem:[#allocation8 + $0x3e0] ss:$16 sps:$4 sm:$0xff]  }
  0x5e   :  { %430 = vmatpush1.bf16.msra.mxu0 %v2798_v3  ;;  %v3232_v44 = vld [vmem:[#allocation8 + $0x1c4] ss:$16 sps:$4 sm:$0xff]   ;;  %v3230_v46 = vld [vmem:[#allocation8 + $0x1c0] ss:$16 sps:$4 sm:$0xff]  }
  0x5f   :  { %471 = vmatpush1.bf16.msra.mxu1 %v2800_v4  ;;  %431 = vmatprep.subr.bf16.mxu0 %v2791_v5  ;;  %v3235_v45 = vld [vmem:[#allocation8 + $0x3c4] ss:$16 sps:$4 sm:$0xff]   ;;  %v3233_v47 = vld [vmem:[#allocation8 + $0x3c0] ss:$16 sps:$4 sm:$0xff]  }
  0x60   :  { %472 = vmatprep.subr.bf16.mxu1 %v2793_v6  ;;  %v3238_v48 = vld [vmem:[#allocation8 + $0x1a4] ss:$16 sps:$4 sm:$0xff]   ;;  %v3236_v50 = vld [vmem:[#allocation8 + $0x1a0] ss:$16 sps:$4 sm:$0xff]  }
  0x61   :  { %v3239_v51 = vld [vmem:[#allocation8 + $0x3a0] ss:$16 sps:$4 sm:$0xff]   ;;  %v3244_v52 = vld [vmem:[#allocation8 + $0x184] ss:$16 sps:$4 sm:$0xff]  }
  0x62   :  { %432 = vmatpush1.bf16.msra.mxu0 %v2790_v7  ;;  %v3247_v53 = vld [vmem:[#allocation8 + $0x384] ss:$16 sps:$4 sm:$0xff]   ;;  %v3242_v54 = vld [vmem:[#allocation8 + $0x180] ss:$16 sps:$4 sm:$0xff]  }
  0x63   :  { %473 = vmatpush1.bf16.msra.mxu1 %v2792_v8  ;;  %2073 = vmatprep.subr.bf16.mxu0 %v3178_v9  ;;  %v3245_v55 = vld [vmem:[#allocation8 + $0x380] ss:$16 sps:$4 sm:$0xff]   ;;  %v3250_v56 = vld [vmem:[#allocation8 + $0x164] ss:$16 sps:$4 sm:$0xff]  }
  0x64   :  { %2114 = vmatprep.subr.bf16.mxu1 %v3181_v10  ;;  %v3253_v57 = vld [vmem:[#allocation8 + $0x364] ss:$16 sps:$4 sm:$0xff]   ;;  %v3248_v58 = vld [vmem:[#allocation8 + $0x160] ss:$16 sps:$4 sm:$0xff]  }
  0x65   :  { %2820 = vmatmul.mubr.msk.bf16.vlgmr.msra.gmra.mxu0 %vm304_vm1, %v93_v49  ;;  %v3251_v59 = vld [vmem:[#allocation8 + $0x360] ss:$16 sps:$4 sm:$0xff]   ;;  %v3256_v60 = vld [vmem:[#allocation8 + $0x144] ss:$16 sps:$4 sm:$0xff]  }
  0x66   :  { %2821 = vmatmul.mubr.msk.bf16.vlgmr.msra.gmra.mxu1 %vm304_vm1, %v93_v49  ;;  %2074 = vmatpush1.bf16.msra.mxu0 %v3176_v11  ;;  %v3241_v49 = vld [vmem:[#allocation8 + $0x3a4] ss:$16 sps:$4 sm:$0xff]   ;;  %v3254_v62 = vld [vmem:[#allocation8 + $0x140] ss:$16 sps:$4 sm:$0xff]   ;;  %v124_v11 = vlaneseq }
  0x67   :  { %2115 = vmatpush1.bf16.msra.mxu1 %v3179_v0  ;;  %2075 = vmatprep.subr.bf16.mxu0 %v3184_v12  ;;  %v3259_v61 = vld [vmem:[#allocation8 + $0x344] ss:$16 sps:$4 sm:$0xff]   ;;  %v3257_v63 = vld [vmem:[#allocation8 + $0x340] ss:$16 sps:$4 sm:$0xff]  }
  0x68   :  { %2116 = vmatprep.subr.bf16.mxu1 %v3187_v13  ;;  %v3262_v1 = vld [vmem:[#allocation8 + $0x124] ss:$16 sps:$4 sm:$0xff]   ;;  %v3260_v3 = vld [vmem:[#allocation8 + $0x120] ss:$16 sps:$4 sm:$0xff]   ;;  %v3812_v0 = vshrl.u32 %v124_v11, 7 }
  0x69   :  { %v3265_v2 = vld [vmem:[#allocation8 + $0x324] ss:$16 sps:$4 sm:$0xff]   ;;  %v3263_v4 = vld [vmem:[#allocation8 + $0x320] ss:$16 sps:$4 sm:$0xff]  }
  0x6a   :  { %2076 = vmatpush1.bf16.msra.mxu0 %v3182_v14  ;;  %v3268_v5 = vld [vmem:[#allocation8 + $0x104] ss:$16 sps:$4 sm:$0xff]   ;;  %v3266_v7 = vld [vmem:[#allocation8 + $0x100] ss:$16 sps:$4 sm:$0xff]   ;;  %v126_v12 = vsub.s32 0, %v3812_v0  ;;  %v134_v13 = vsub.s32 2, %v3812_v0 }
  0x6b   :  { %2117 = vmatpush1.bf16.msra.mxu1 %v3185_v15  ;;  %2077 = vmatprep.subr.bf16.mxu0 %v3190_v16  ;;  %v3271_v6 = vld [vmem:[#allocation8 + $0x304] ss:$16 sps:$4 sm:$0xff]   ;;  %v3269_v8 = vld [vmem:[#allocation8 + $0x300] ss:$16 sps:$4 sm:$0xff]   ;;  %v3816_v14 = vld [vmem:[#allocation7] sm:$0xff]  ;;  %v130_v15 = vsub.s32 1, %v3812_v0 }
  0x6c   :  { %2118 = vmatprep.subr.bf16.mxu1 %v3193_v17  ;;  %v3274_v9 = vld [vmem:[#allocation8 + $0x4e4] ss:$16 sps:$4 sm:$0xff]   ;;  %v138_v16 = vsub.s32 3, %v3812_v0  ;;  %v127_v17 = vrot.slane %v3816_v14, %v126_v12 }
  0x6d   :  { %v3277_v10 = vld [vmem:[#allocation8 + $0x6e4] ss:$16 sps:$4 sm:$0xff]  }
  0x6e   :  { %2078 = vmatpush1.bf16.msra.mxu0 %v3188_v18  ;;  %v135_v18 = vrot.slane %v3816_v14, %v134_v13 }
  0x6f   :  { %2119 = vmatpush1.bf16.msra.mxu1 %v3191_v19  ;;  %2079 = vmatprep.subr.bf16.mxu0 %v3196_v20  ;;  %v131_v19 = vrot.slane %v3816_v14, %v130_v15  ;;  %v139_v20 = vrot.slane %v3816_v14, %v138_v16 }
  0x70   :  { %2120 = vmatprep.subr.bf16.mxu1 %v3199_v21 }
  0x72   :  { %2080 = vmatpush1.bf16.msra.mxu0 %v3194_v22 }
  0x73   :  { %2121 = vmatpush1.bf16.msra.mxu1 %v3197_v23  ;;  %2081 = vmatprep.subr.bf16.mxu0 %v3202_v24 }
  0x74   :  { %2122 = vmatprep.subr.bf16.mxu1 %v3205_v25 }
  0x76   :  { %2082 = vmatpush1.bf16.msra.mxu0 %v3200_v26 }
  0x77   :  { %2123 = vmatpush1.bf16.msra.mxu1 %v3203_v27  ;;  %2083 = vmatprep.subr.bf16.mxu0 %v3208_v28 }
  0x78   :  { %2124 = vmatprep.subr.bf16.mxu1 %v3211_v29 }
  0x7a   :  { %2084 = vmatpush1.bf16.msra.mxu0 %v3206_v30 }
  0x7b   :  { %2125 = vmatpush1.bf16.msra.mxu1 %v3209_v31  ;;  %2085 = vmatprep.subr.bf16.mxu0 %v3214_v32 }
  0x7c   :  { %2126 = vmatprep.subr.bf16.mxu1 %v3217_v33 }
  0x7e   :  { %2086 = vmatpush1.bf16.msra.mxu0 %v3212_v34 }
  0x7f   :  { %2127 = vmatpush1.bf16.msra.mxu1 %v3215_v35  ;;  %2087 = vmatprep.subr.bf16.mxu0 %v3220_v36 }
  0x80   :  { %2128 = vmatprep.subr.bf16.mxu1 %v3223_v37 }
  0x82   :  { %2088 = vmatpush1.bf16.msra.mxu0 %v3218_v38 }
  0x83   :  { %2129 = vmatpush1.bf16.msra.mxu1 %v3221_v39  ;;  %2089 = vmatprep.subr.bf16.mxu0 %v3226_v40  ;;  %v3272_v40 = vld [vmem:[#allocation8 + $0x4e0] ss:$16 sps:$4 sm:$0xff]  }
  0x84   :  { %2130 = vmatprep.subr.bf16.mxu1 %v3229_v41  ;;  %v3275_v41 = vld [vmem:[#allocation8 + $0x6e0] ss:$16 sps:$4 sm:$0xff]  }
  0x86   :  { %2090 = vmatpush2.bf16.msra.mxu0 %v3224_v42 }
  0x87   :  { %2131 = vmatpush2.bf16.msra.mxu1 %v3227_v43  ;;  %2091 = vmatprep.subr.bf16.mxu0 %v3232_v44  ;;  %v3280_v43 = vld [vmem:[#allocation8 + $0x4c4] ss:$16 sps:$4 sm:$0xff]  }
  0x88   :  { %2132 = vmatprep.subr.bf16.mxu1 %v3235_v45  ;;  %v3283_v44 = vld [vmem:[#allocation8 + $0x6c4] ss:$16 sps:$4 sm:$0xff]   ;;  %v3278_v45 = vld [vmem:[#allocation8 + $0x4c0] ss:$16 sps:$4 sm:$0xff]  }
  0x8a   :  { %2092 = vmatpush2.bf16.msra.mxu0 %v3230_v46  ;;  %v3281_v46 = vld [vmem:[#allocation8 + $0x6c0] ss:$16 sps:$4 sm:$0xff]  }
  0x8b   :  { %2133 = vmatpush2.bf16.msra.mxu1 %v3233_v47  ;;  %2093 = vmatprep.subr.bf16.mxu0 %v3238_v48  ;;  %v146_v47 = vsub.s32 5, %v3812_v0  ;;  %v154_v48 = vsub.s32 7, %v3812_v0 }
  0x8c   :  { %2134 = vmatprep.subr.bf16.mxu1 %v3241_v49  ;;  %v3286_v49 = vld [vmem:[#allocation8 + $0x4a4] ss:$16 sps:$4 sm:$0xff]  }
  0x8e   :  { %2094 = vmatpush2.bf16.msra.mxu0 %v3236_v50  ;;  %v3289_v50 = vld [vmem:[#allocation8 + $0x6a4] ss:$16 sps:$4 sm:$0xff]  }
  0x8f   :  { %2135 = vmatpush2.bf16.msra.mxu1 %v3239_v51  ;;  %2095 = vmatprep.subr.bf16.mxu0 %v3244_v52  ;;  %v3284_v51 = vld [vmem:[#allocation8 + $0x4a0] ss:$16 sps:$4 sm:$0xff]  }
  0x90   :  { %2136 = vmatprep.subr.bf16.mxu1 %v3247_v53  ;;  %v3287_v52 = vld [vmem:[#allocation8 + $0x6a0] ss:$16 sps:$4 sm:$0xff]   ;;  %v147_v53 = vrot.slane %v3816_v14, %v146_v47 }
  0x91   :  { %v3335_v47 = vld [vmem:[#allocation8 + $0x7a0] ss:$16 sps:$4 sm:$0xff]  }
  0x92   :  { %2096 = vmatpush2.bf16.msra.mxu0 %v3242_v54  ;;  %v155_v54 = vrot.slane %v3816_v14, %v154_v48  ;;  %v3340_v48 = vld [vmem:[#allocation8 + $0x584] ss:$16 sps:$4 sm:$0xff]  }
  0x93   :  { %2137 = vmatpush2.bf16.msra.mxu1 %v3245_v55  ;;  %2097 = vmatprep.subr.bf16.mxu0 %v3250_v56  ;;  %v3292_v55 = vld [vmem:[#allocation8 + $0x484] ss:$16 sps:$4 sm:$0xff]  }
  0x94   :  { %2138 = vmatprep.subr.bf16.mxu1 %v3253_v57  ;;  %v3295_v56 = vld [vmem:[#allocation8 + $0x684] ss:$16 sps:$4 sm:$0xff]  }
  0x96   :  { %2098 = vmatpush2.bf16.msra.mxu0 %v3248_v58 }
  0x97   :  { %2139 = vmatpush2.bf16.msra.mxu1 %v3251_v59  ;;  %2099 = vmatprep.subr.bf16.mxu0 %v3256_v60 }
  0x98   :  { %2140 = vmatprep.subr.bf16.mxu1 %v3259_v61  ;;  %v3290_v61 = vld [vmem:[#allocation8 + $0x480] ss:$16 sps:$4 sm:$0xff]  }
  0x9a   :  { %2100 = vmatpush2.bf16.msra.mxu0 %v3254_v62  ;;  %v3293_v62 = vld [vmem:[#allocation8 + $0x680] ss:$16 sps:$4 sm:$0xff]  }
  0x9b   :  { %2141 = vmatpush2.bf16.msra.mxu1 %v3257_v63  ;;  %2101 = vmatprep.subr.bf16.mxu0 %v3262_v1 }
  0x9c   :  { %2142 = vmatprep.subr.bf16.mxu1 %v3265_v2  ;;  %v3298_v2 = vld [vmem:[#allocation8 + $0x464] ss:$16 sps:$4 sm:$0xff]  }
  0x9e   :  { %2102 = vmatpush2.bf16.msra.mxu0 %v3260_v3  ;;  %v3301_v3 = vld [vmem:[#allocation8 + $0x664] ss:$16 sps:$4 sm:$0xff]  }
  0x9f   :  { %2143 = vmatpush2.bf16.msra.mxu1 %v3263_v4  ;;  %2103 = vmatprep.subr.bf16.mxu0 %v3268_v5 }
  0xa0   :  { %2144 = vmatprep.subr.bf16.mxu1 %v3271_v6 }
  0xa2   :  { %2104 = vmatpush2.bf16.msra.mxu0 %v3266_v7 }
  0xa3   :  { %2145 = vmatpush2.bf16.msra.mxu1 %v3269_v8  ;;  %2155 = vmatprep.subr.bf16.mxu0 %v3274_v9 }
  0xa4   :  { %2196 = vmatprep.subr.bf16.mxu1 %v3277_v10  ;;  %v3296_v10 = vld [vmem:[#allocation8 + $0x460] ss:$16 sps:$4 sm:$0xff]  }
 0x115   :  { %v369_v21 = vpop.f32.mrf.mxu0 }
 0x116   :  { %v410_v22 = vpop.f32.mrf.mxu1  ;;  %v370_v23 = vadd.f32 %v369_v21, %v127_v17  ;;  %v3299_v17 = vld [vmem:[#allocation8 + $0x660] ss:$16 sps:$4 sm:$0xff]   ;;  %v3307_v21 = vld [vmem:[#allocation8 + $0x644] ss:$16 sps:$4 sm:$0xff]  }
 0x117   :  { %v411_v24 = vadd.f32 %v410_v22, %v135_v18  ;;  %v371_v25 = vpop.f32.mrf.mxu0  ;;  %v3302_v22 = vld [vmem:[#allocation8 + $0x440] ss:$16 sps:$4 sm:$0xff]  }
 0x118   :  { %v412_v26 = vpop.f32.mrf.mxu1  ;;  %v372_v28 = vadd.f32 %v371_v25, %v131_v19  ;;  %v499_v30 = vmax.f32 %v370_v23, 0.0  ;;  %v3305_v23 = vld [vmem:[#allocation8 + $0x640] ss:$16 sps:$4 sm:$0xff]   ;;  %v3313_v25 = vld [vmem:[#allocation8 + $0x624] ss:$16 sps:$4 sm:$0xff]  }
 0x119   :  { %v501_v27 = vmax.f32 %v411_v24, 0.0  ;;  %v413_v29 = vadd.f32 %v412_v26, %v139_v20  ;;  %v373_v31 = vpop.f32.mrf.mxu0  ;;  %v3304_v20 = vld [vmem:[#allocation8 + $0x444] ss:$16 sps:$4 sm:$0xff]   ;;  %v3308_v26 = vld [vmem:[#allocation8 + $0x420] ss:$16 sps:$4 sm:$0xff]  }
 0x11a   :  { %v414_v32 = vpop.f32.mrf.mxu1  ;;  %v500_v33 = vmax.f32 %v372_v28, 0.0  ;;  %v3838_v42 = vpack.c.bf16 %v499_v30, %v499_v30  ;;  %v3310_v24 = vld [vmem:[#allocation8 + $0x424] ss:$16 sps:$4 sm:$0xff]   ;;  %v3314_v30 = vld [vmem:[#allocation8 + $0x400] ss:$16 sps:$4 sm:$0xff]  }
 0x11b   :  { %v502_v34 = vmax.f32 %v413_v29, 0.0  ;;  %v3832_v35 = vpack.c.bf16 %v501_v27, %v501_v27  ;;  %v374_v36 = vpop.f32.mrf.mxu0  ;;  %v3311_v27 = vld [vmem:[#allocation8 + $0x620] ss:$16 sps:$4 sm:$0xff]   ;;  %v3316_v28 = vld [vmem:[#allocation8 + $0x404] ss:$16 sps:$4 sm:$0xff]  }
 0x11c   :  { %v415_v37 = vpop.f32.mrf.mxu1  ;;  %v3834_v38 = vpack.c.bf16 %v500_v33, %v500_v33  ;;  %v3319_v29 = vld [vmem:[#allocation8 + $0x604] ss:$16 sps:$4 sm:$0xff]   ;;  %v3317_v31 = vld [vmem:[#allocation8 + $0x600] ss:$16 sps:$4 sm:$0xff]  }
 0x11d   :  { %v3836_v39 = vpack.c.bf16 %v502_v34, %v502_v34  ;;  %v3322_v32 = vld [vmem:[#allocation8 + $0x5e4] ss:$16 sps:$4 sm:$0xff]   ;;  %v3320_v34 = vld [vmem:[#allocation8 + $0x5e0] ss:$16 sps:$4 sm:$0xff]  }
 0x11e   :  { %2105 = vmatprep.mubr.bf16.mxu0 %v3834_v38  ;;  %v3325_v33 = vld [vmem:[#allocation8 + $0x7e4] ss:$16 sps:$4 sm:$0xff]   ;;  %v3323_v36 = vld [vmem:[#allocation8 + $0x7e0] ss:$16 sps:$4 sm:$0xff]  }
 0x11f   :  { %2146 = vmatprep.mubr.bf16.mxu1 %v3836_v39  ;;  %2106 = vmatmul.mubr.bf16.vlgmr.msra.gmra.mxu0 %v3838_v42  ;;  %v3328_v37 = vld [vmem:[#allocation8 + $0x5c4] ss:$16 sps:$4 sm:$0xff]  }
 0x120   :  { %2147 = vmatmul.mubr.bf16.vlgmr.msra.gmra.mxu1 %v3832_v35  ;;  %2156 = vmatpush1.bf16.msra.mxu0 %v3272_v40  ;;  %v3331_v40 = vld [vmem:[#allocation8 + $0x7c4] ss:$16 sps:$4 sm:$0xff]  }
 0x121   :  { %2197 = vmatpush1.bf16.msra.mxu1 %v3275_v41  ;;  %2157 = vmatprep.subr.bf16.mxu0 %v3280_v43  ;;  %v3326_v41 = vld [vmem:[#allocation8 + $0x5c0] ss:$16 sps:$4 sm:$0xff]  }
 0x122   :  { %2198 = vmatprep.subr.bf16.mxu1 %v3283_v44  ;;  %v3329_v43 = vld [vmem:[#allocation8 + $0x7c0] ss:$16 sps:$4 sm:$0xff]   ;;  %v3334_v44 = vld [vmem:[#allocation8 + $0x5a4] ss:$16 sps:$4 sm:$0xff]  }
 0x124   :  { %2158 = vmatpush1.bf16.msra.mxu0 %v3278_v45  ;;  %v3337_v45 = vld [vmem:[#allocation8 + $0x7a4] ss:$16 sps:$4 sm:$0xff]  }
 0x125   :  { %2199 = vmatpush1.bf16.msra.mxu1 %v3281_v46  ;;  %2159 = vmatprep.subr.bf16.mxu0 %v3286_v49  ;;  %v3848_v57 = vpop.f32.mrf.mxu0  ;;  %v3332_v46 = vld [vmem:[#allocation8 + $0x5a0] ss:$16 sps:$4 sm:$0xff]   ;;  %v3343_v49 = vld [vmem:[#allocation8 + $0x784] ss:$16 sps:$4 sm:$0xff]  }
 0x126   :  { %2200 = vmatprep.subr.bf16.mxu1 %v3289_v50  ;;  %v3850_v58 = vpop.f32.mrf.mxu1  ;;  %v3338_v50 = vld [vmem:[#allocation8 + $0x580] ss:$16 sps:$4 sm:$0xff]  }
 0x127   :  { %v453_v59 = vpop.f32.mrf.mxu0 }
 0x128   :  { %v494_v60 = vpop.f32.mrf.mxu1  ;;  %2160 = vmatpush1.bf16.msra.mxu0 %v3284_v51  ;;  %v454_v63 = vadd.f32 %v453_v59, %v147_v53  ;;  %v3341_v51 = vld [vmem:[#allocation8 + $0x780] ss:$16 sps:$4 sm:$0xff]   ;;  %v3349_v53 = vld [vmem:[#allocation8 + $0x764] ss:$16 sps:$4 sm:$0xff]   ;;  %v142_v59 = vsub.s32 4, %v3812_v0 }
 0x129   :  { %2201 = vmatpush1.bf16.msra.mxu1 %v3287_v52  ;;  %v495_v1 = vadd.f32 %v494_v60, %v155_v54  ;;  %2161 = vmatprep.subr.bf16.mxu0 %v3292_v55  ;;  %v455_v4 = vpop.f32.mrf.mxu0  ;;  %v3346_v52 = vld [vmem:[#allocation8 + $0x564] ss:$16 sps:$4 sm:$0xff]   ;;  %v150_v54 = vsub.s32 6, %v3812_v0  ;;  %v3344_v55 = vld [vmem:[#allocation8 + $0x560] ss:$16 sps:$4 sm:$0xff]  }
 0x12a   :  { %2202 = vmatprep.subr.bf16.mxu1 %v3295_v56  ;;  %v496_v5 = vpop.f32.mrf.mxu1  ;;  %v504_v6 = vmax.f32 %v454_v63, 0.0  ;;  %v3347_v56 = vld [vmem:[#allocation8 + $0x760] ss:$16 sps:$4 sm:$0xff]   ;;  %v3352_v60 = vld [vmem:[#allocation8 + $0x544] ss:$16 sps:$4 sm:$0xff]  }
 0x12b   :  { %v506_v7 = vmax.f32 %v495_v1, 0.0  ;;  %v456_v8 = vpop.f32.mrf.mxu0  ;;  %v3350_v63 = vld [vmem:[#allocation8 + $0x540] ss:$16 sps:$4 sm:$0xff]   ;;  %v3361_v4 = vld [vmem:[#allocation8 + $0x724] ss:$16 sps:$4 sm:$0xff]  }
 0x12c   :  { %v497_v9 = vpop.f32.mrf.mxu1  ;;  %2162 = vmatpush1.bf16.msra.mxu0 %v3290_v61  ;;  %v3852_v18 = vpack.c.bf16 %v504_v6, %v504_v6  ;;  %v3355_v61 = vld [vmem:[#allocation8 + $0x744] ss:$16 sps:$4 sm:$0xff]   ;;  %v3353_v1 = vld [vmem:[#allocation8 + $0x740] ss:$16 sps:$4 sm:$0xff]  }
 0x12d   :  { %2203 = vmatpush1.bf16.msra.mxu1 %v3293_v62  ;;  %v3854_v19 = vpack.c.bf16 %v506_v7, %v506_v7  ;;  %2163 = vmatprep.subr.bf16.mxu0 %v3298_v2  ;;  %v151_v62 = vrot.slane %v3816_v14, %v150_v54  ;;  %v143_v2 = vrot.slane %v3816_v14, %v142_v59  ;;  %v3356_v6 = vld [vmem:[#allocation8 + $0x520] ss:$16 sps:$4 sm:$0xff]   ;;  %v3364_v9 = vld [vmem:[#allocation8 + $0x504] ss:$16 sps:$4 sm:$0xff]   ;;  %v3410_v54 = vld [vmem:[#allocation8 + $0x8] ss:$16 sps:$4 sm:$0xff]  }
 0x12e   :  { %2204 = vmatprep.subr.bf16.mxu1 %v3301_v3  ;;  %2187 = vmatprep.mubr.bf16.mxu0 %v3852_v18  ;;  %v3358_v3 = vld [vmem:[#allocation8 + $0x524] ss:$16 sps:$4 sm:$0xff]   ;;  %v3359_v7 = vld [vmem:[#allocation8 + $0x720] ss:$16 sps:$4 sm:$0xff]   ;;  %v3421_v59 = vld [vmem:[#allocation8 + $0x3ec] ss:$16 sps:$4 sm:$0xff]  }
 0x12f   :  { %2228 = vmatprep.mubr.bf16.mxu1 %v3854_v19  ;;  %v493_v5 = vadd.f32 %v3850_v58, %v151_v62  ;;  %v452_v8 = vadd.f32 %v3848_v57, %v143_v2  ;;  %v3362_v14 = vld [vmem:[#allocation8 + $0x500] ss:$16 sps:$4 sm:$0xff]   ;;  %v3373_v58 = vld [vmem:[#allocation8 + $0x2ec] ss:$16 sps:$4 sm:$0xff]   ;;  %v3425_v2 = vld [vmem:[#allocation8 + $0x3c8] ss:$16 sps:$4 sm:$0xff]  }
 0x130   :  { %2164 = vmatpush1.bf16.msra.mxu0 %v3296_v10  ;;  %v3367_v10 = vld [vmem:[#allocation8 + $0x704] ss:$16 sps:$4 sm:$0xff]   ;;  %v3424_v62 = vld [vmem:[#allocation8 + $0x1cc] ss:$16 sps:$4 sm:$0xff]  }
 0x131   :  { %2205 = vmatpush1.bf16.msra.mxu1 %v3299_v17  ;;  %2165 = vmatprep.subr.bf16.mxu0 %v3304_v20  ;;  %v505_v17 = vmax.f32 %v493_v5, 0.0  ;;  %v3365_v20 = vld [vmem:[#allocation8 + $0x700] ss:$16 sps:$4 sm:$0xff]   ;;  %v3428_v5 = vld [vmem:[#allocation8 + $0x1a8] ss:$16 sps:$4 sm:$0xff]  }
 0x132   :  { %2206 = vmatprep.subr.bf16.mxu1 %v3307_v21  ;;  %v503_v21 = vmax.f32 %v452_v8, 0.0  ;;  %v3439_v8 = vld [vmem:[#allocation8 + $0x38c] ss:$16 sps:$4 sm:$0xff]  }
 0x134   :  { %2166 = vmatpush1.bf16.msra.mxu0 %v3302_v22  ;;  %v3370_v22 = vld [vmem:[#allocation8 + $0xec] ss:$16 sps:$4 sm:$0xff]   ;;  %v3866_v57 = vpack.c.bf16 %v503_v21, %v503_v21  ;;  %v3443_v21 = vld [vmem:[#allocation8 + $0x368] ss:$16 sps:$4 sm:$0xff]  }
 0x135   :  { %2207 = vmatpush1.bf16.msra.mxu1 %v3305_v23  ;;  %2167 = vmatprep.subr.bf16.mxu0 %v3310_v24  ;;  %v3864_v23 = vpack.c.bf16 %v505_v17, %v505_v17  ;;  %v3368_v24 = vld [vmem:[#allocation8 + $0xe8] ss:$16 sps:$4 sm:$0xff]   ;;  %v3442_v17 = vld [vmem:[#allocation8 + $0x16c] ss:$16 sps:$4 sm:$0xff]  }
 0x136   :  { %2208 = vmatprep.subr.bf16.mxu1 %v3313_v25  ;;  %v3371_v25 = vld [vmem:[#allocation8 + $0x2e8] ss:$16 sps:$4 sm:$0xff]  }
 0x138   :  { %2168 = vmatpush1.bf16.msra.mxu0 %v3308_v26  ;;  %v3376_v26 = vld [vmem:[#allocation8 + $0xcc] ss:$16 sps:$4 sm:$0xff]  }
 0x139   :  { %2209 = vmatpush1.bf16.msra.mxu1 %v3311_v27  ;;  %2169 = vmatprep.subr.bf16.mxu0 %v3316_v28  ;;  %v3379_v27 = vld [vmem:[#allocation8 + $0x2cc] ss:$16 sps:$4 sm:$0xff]   ;;  %v3374_v28 = vld [vmem:[#allocation8 + $0xc8] ss:$16 sps:$4 sm:$0xff]  }
 0x13a   :  { %2210 = vmatprep.subr.bf16.mxu1 %v3319_v29  ;;  %v3377_v29 = vld [vmem:[#allocation8 + $0x2c8] ss:$16 sps:$4 sm:$0xff]  }
 0x13c   :  { %2170 = vmatpush1.bf16.msra.mxu0 %v3314_v30  ;;  %v3382_v30 = vld [vmem:[#allocation8 + $0xac] ss:$16 sps:$4 sm:$0xff]  }
 0x13d   :  { %2211 = vmatpush1.bf16.msra.mxu1 %v3317_v31  ;;  %2171 = vmatprep.subr.bf16.mxu0 %v3322_v32  ;;  %v3385_v31 = vld [vmem:[#allocation8 + $0x2ac] ss:$16 sps:$4 sm:$0xff]   ;;  %v3380_v32 = vld [vmem:[#allocation8 + $0xa8] ss:$16 sps:$4 sm:$0xff]  }
 0x13e   :  { %2212 = vmatprep.subr.bf16.mxu1 %v3325_v33  ;;  %v3383_v33 = vld [vmem:[#allocation8 + $0x2a8] ss:$16 sps:$4 sm:$0xff]  }
 0x140   :  { %2172 = vmatpush2.bf16.msra.mxu0 %v3320_v34  ;;  %v3388_v34 = vld [vmem:[#allocation8 + $0x8c] ss:$16 sps:$4 sm:$0xff]  }
 0x141   :  { %2213 = vmatpush2.bf16.msra.mxu1 %v3323_v36  ;;  %2173 = vmatprep.subr.bf16.mxu0 %v3328_v37  ;;  %v3391_v36 = vld [vmem:[#allocation8 + $0x28c] ss:$16 sps:$4 sm:$0xff]   ;;  %v3386_v37 = vld [vmem:[#allocation8 + $0x88] ss:$16 sps:$4 sm:$0xff]  }
 0x142   :  { %2214 = vmatprep.subr.bf16.mxu1 %v3331_v40  ;;  %v3394_v40 = vld [vmem:[#allocation8 + $0x6c] ss:$16 sps:$4 sm:$0xff]  }
 0x144   :  { %2174 = vmatpush2.bf16.msra.mxu0 %v3326_v41  ;;  %v3392_v41 = vld [vmem:[#allocation8 + $0x68] ss:$16 sps:$4 sm:$0xff]  }
 0x145   :  { %2215 = vmatpush2.bf16.msra.mxu1 %v3329_v43  ;;  %2175 = vmatprep.subr.bf16.mxu0 %v3334_v44  ;;  %v3395_v43 = vld [vmem:[#allocation8 + $0x268] ss:$16 sps:$4 sm:$0xff]   ;;  %v3400_v44 = vld [vmem:[#allocation8 + $0x4c] ss:$16 sps:$4 sm:$0xff]  }
 0x146   :  { %2216 = vmatprep.subr.bf16.mxu1 %v3337_v45  ;;  %v3403_v45 = vld [vmem:[#allocation8 + $0x24c] ss:$16 sps:$4 sm:$0xff]  }
 0x148   :  { %2176 = vmatpush2.bf16.msra.mxu0 %v3332_v46  ;;  %v3398_v46 = vld [vmem:[#allocation8 + $0x48] ss:$16 sps:$4 sm:$0xff]  }
 0x149   :  { %2217 = vmatpush2.bf16.msra.mxu1 %v3335_v47  ;;  %2177 = vmatprep.subr.bf16.mxu0 %v3340_v48  ;;  %v3401_v47 = vld [vmem:[#allocation8 + $0x248] ss:$16 sps:$4 sm:$0xff]   ;;  %v3406_v48 = vld [vmem:[#allocation8 + $0x2c] ss:$16 sps:$4 sm:$0xff]  }
 0x14a   :  { %2218 = vmatprep.subr.bf16.mxu1 %v3343_v49  ;;  %v3409_v49 = vld [vmem:[#allocation8 + $0x22c] ss:$16 sps:$4 sm:$0xff]  }
 0x14c   :  { %2178 = vmatpush2.bf16.msra.mxu0 %v3338_v50  ;;  %v3404_v50 = vld [vmem:[#allocation8 + $0x28] ss:$16 sps:$4 sm:$0xff]  }
 0x14d   :  { %2219 = vmatpush2.bf16.msra.mxu1 %v3341_v51  ;;  %2179 = vmatprep.subr.bf16.mxu0 %v3346_v52  ;;  %v3407_v51 = vld [vmem:[#allocation8 + $0x228] ss:$16 sps:$4 sm:$0xff]   ;;  %v3412_v52 = vld [vmem:[#allocation8 + $0xc] ss:$16 sps:$4 sm:$0xff]  }
 0x14e   :  { %2220 = vmatprep.subr.bf16.mxu1 %v3349_v53  ;;  %v3415_v53 = vld [vmem:[#allocation8 + $0x20c] ss:$16 sps:$4 sm:$0xff]  }
 0x150   :  { %2180 = vmatpush2.bf16.msra.mxu0 %v3344_v55  ;;  %v3413_v55 = vld [vmem:[#allocation8 + $0x208] ss:$16 sps:$4 sm:$0xff]  }
 0x151   :  { %2221 = vmatpush2.bf16.msra.mxu1 %v3347_v56  ;;  %2181 = vmatprep.subr.bf16.mxu0 %v3352_v60  ;;  %v3418_v56 = vld [vmem:[#allocation8 + $0x1ec] ss:$16 sps:$4 sm:$0xff]   ;;  %v3416_v60 = vld [vmem:[#allocation8 + $0x1e8] ss:$16 sps:$4 sm:$0xff]  }
 0x152   :  { %2222 = vmatprep.subr.bf16.mxu1 %v3355_v61  ;;  %v3419_v61 = vld [vmem:[#allocation8 + $0x3e8] ss:$16 sps:$4 sm:$0xff]  }
 0x154   :  { %2182 = vmatpush2.bf16.msra.mxu0 %v3350_v63  ;;  %v3427_v63 = vld [vmem:[#allocation8 + $0x3cc] ss:$16 sps:$4 sm:$0xff]  }
 0x155   :  { %2223 = vmatpush2.bf16.msra.mxu1 %v3353_v1  ;;  %2183 = vmatprep.subr.bf16.mxu0 %v3358_v3  ;;  %v3422_v1 = vld [vmem:[#allocation8 + $0x1c8] ss:$16 sps:$4 sm:$0xff]   ;;  %v3430_v3 = vld [vmem:[#allocation8 + $0x1ac] ss:$16 sps:$4 sm:$0xff]  }
 0x156   :  { %2224 = vmatprep.subr.bf16.mxu1 %v3361_v4  ;;  %v3433_v4 = vld [vmem:[#allocation8 + $0x3ac] ss:$16 sps:$4 sm:$0xff]  }
 0x158   :  { %2184 = vmatpush2.bf16.msra.mxu0 %v3356_v6  ;;  %v3431_v6 = vld [vmem:[#allocation8 + $0x3a8] ss:$16 sps:$4 sm:$0xff]  }
 0x159   :  { %2225 = vmatpush2.bf16.msra.mxu1 %v3359_v7  ;;  %2185 = vmatprep.subr.bf16.mxu0 %v3364_v9  ;;  %v3436_v7 = vld [vmem:[#allocation8 + $0x18c] ss:$16 sps:$4 sm:$0xff]   ;;  %v3434_v9 = vld [vmem:[#allocation8 + $0x188] ss:$16 sps:$4 sm:$0xff]  }
 0x15a   :  { %2226 = vmatprep.subr.bf16.mxu1 %v3367_v10  ;;  %v3437_v10 = vld [vmem:[#allocation8 + $0x388] ss:$16 sps:$4 sm:$0xff]  }
 0x15c   :  { %2186 = vmatpush2.bf16.msra.mxu0 %v3362_v14  ;;  %v3445_v14 = vld [vmem:[#allocation8 + $0x36c] ss:$16 sps:$4 sm:$0xff]  }
 0x15d   :  { %2227 = vmatpush2.bf16.msra.mxu1 %v3365_v20  ;;  %2237 = vmatprep.subr.bf16.mxu0 %v3370_v22  ;;  %v3440_v20 = vld [vmem:[#allocation8 + $0x168] ss:$16 sps:$4 sm:$0xff]   ;;  %v3448_v22 = vld [vmem:[#allocation8 + $0x14c] ss:$16 sps:$4 sm:$0xff]  }
 0x15e   :  { %2278 = vmatprep.subr.bf16.mxu1 %v3373_v58  ;;  %v3451_v58 = vld [vmem:[#allocation8 + $0x34c] ss:$16 sps:$4 sm:$0xff]  }
 0x15f   :  { %2188 = vmatmul.mubr.bf16.vlgmr.msra.gmra.mxu0 %v3866_v57 }
 0x160   :  { %2229 = vmatmul.mubr.bf16.vlgmr.msra.gmra.mxu1 %v3864_v23  ;;  %2238 = vmatpush1.bf16.msra.mxu0 %v3368_v24  ;;  %v3446_v24 = vld [vmem:[#allocation8 + $0x148] ss:$16 sps:$4 sm:$0xff]  }
 0x161   :  { %2269 = vmatprep.mubr.bf16.mxu0 %v3834_v38  ;;  %2279 = vmatpush1.bf16.msra.mxu1 %v3371_v25  ;;  %v3389_v38 = vld [vmem:[#allocation8 + $0x288] ss:$16 sps:$4 sm:$0xff]  }
 0x162   :  { %2310 = vmatprep.mubr.bf16.mxu1 %v3836_v39  ;;  %2239 = vmatprep.subr.bf16.mxu0 %v3376_v26  ;;  %v3397_v39 = vld [vmem:[#allocation8 + $0x26c] ss:$16 sps:$4 sm:$0xff]   ;;  %v3449_v25 = vld [vmem:[#allocation8 + $0x348] ss:$16 sps:$4 sm:$0xff]  }
 0x163   :  { %2280 = vmatprep.subr.bf16.mxu1 %v3379_v27  ;;  %v3454_v26 = vld [vmem:[#allocation8 + $0x12c] ss:$16 sps:$4 sm:$0xff]  }
 0x164   :  { %2240 = vmatpush1.bf16.msra.mxu0 %v3374_v28  ;;  %v3457_v27 = vld [vmem:[#allocation8 + $0x32c] ss:$16 sps:$4 sm:$0xff]   ;;  %v3452_v28 = vld [vmem:[#allocation8 + $0x128] ss:$16 sps:$4 sm:$0xff]  }
 0x165   :  { %2281 = vmatpush1.bf16.msra.mxu1 %v3377_v29  ;;  %2241 = vmatprep.subr.bf16.mxu0 %v3382_v30  ;;  %v3455_v29 = vld [vmem:[#allocation8 + $0x328] ss:$16 sps:$4 sm:$0xff]   ;;  %v3460_v30 = vld [vmem:[#allocation8 + $0x10c] ss:$16 sps:$4 sm:$0xff]  }
 0x166   :  { %2282 = vmatprep.subr.bf16.mxu1 %v3385_v31  ;;  %v3463_v31 = vld [vmem:[#allocation8 + $0x30c] ss:$16 sps:$4 sm:$0xff]  }
 0x168   :  { %2242 = vmatpush1.bf16.msra.mxu0 %v3380_v32  ;;  %v3458_v32 = vld [vmem:[#allocation8 + $0x108] ss:$16 sps:$4 sm:$0xff]  }
 0x169   :  { %2283 = vmatpush1.bf16.msra.mxu1 %v3383_v33  ;;  %2243 = vmatprep.subr.bf16.mxu0 %v3388_v34  ;;  %v3461_v33 = vld [vmem:[#allocation8 + $0x308] ss:$16 sps:$4 sm:$0xff]   ;;  %v3466_v34 = vld [vmem:[#allocation8 + $0x4ec] ss:$16 sps:$4 sm:$0xff]  }
 0x16a   :  { %2284 = vmatprep.subr.bf16.mxu1 %v3391_v36  ;;  %v3469_v36 = vld [vmem:[#allocation8 + $0x6ec] ss:$16 sps:$4 sm:$0xff]  }
 0x16c   :  { %2244 = vmatpush1.bf16.msra.mxu0 %v3386_v37  ;;  %v3464_v37 = vld [vmem:[#allocation8 + $0x4e8] ss:$16 sps:$4 sm:$0xff]  }
 0x16d   :  { %2285 = vmatpush1.bf16.msra.mxu1 %v3389_v38  ;;  %2245 = vmatprep.subr.bf16.mxu0 %v3394_v40  ;;  %v3467_v38 = vld [vmem:[#allocation8 + $0x6e8] ss:$16 sps:$4 sm:$0xff]   ;;  %v3472_v40 = vld [vmem:[#allocation8 + $0x4cc] ss:$16 sps:$4 sm:$0xff]  }
 0x16e   :  { %2286 = vmatprep.subr.bf16.mxu1 %v3397_v39  ;;  %v3475_v39 = vld [vmem:[#allocation8 + $0x6cc] ss:$16 sps:$4 sm:$0xff]  }
 0x170   :  { %2246 = vmatpush1.bf16.msra.mxu0 %v3392_v41  ;;  %v3470_v41 = vld [vmem:[#allocation8 + $0x4c8] ss:$16 sps:$4 sm:$0xff]  }
 0x171   :  { %2287 = vmatpush1.bf16.msra.mxu1 %v3395_v43  ;;  %2247 = vmatprep.subr.bf16.mxu0 %v3400_v44  ;;  %v3473_v43 = vld [vmem:[#allocation8 + $0x6c8] ss:$16 sps:$4 sm:$0xff]   ;;  %v3478_v44 = vld [vmem:[#allocation8 + $0x4ac] ss:$16 sps:$4 sm:$0xff]  }
 0x172   :  { %2288 = vmatprep.subr.bf16.mxu1 %v3403_v45  ;;  %v3481_v45 = vld [vmem:[#allocation8 + $0x6ac] ss:$16 sps:$4 sm:$0xff]  }
 0x174   :  { %2248 = vmatpush1.bf16.msra.mxu0 %v3398_v46  ;;  %v3476_v46 = vld [vmem:[#allocation8 + $0x4a8] ss:$16 sps:$4 sm:$0xff]  }
 0x175   :  { %2289 = vmatpush1.bf16.msra.mxu1 %v3401_v47  ;;  %2249 = vmatprep.subr.bf16.mxu0 %v3406_v48  ;;  %v3484_v47 = vld [vmem:[#allocation8 + $0x48c] ss:$16 sps:$4 sm:$0xff]   ;;  %v3482_v48 = vld [vmem:[#allocation8 + $0x488] ss:$16 sps:$4 sm:$0xff]  }
 0x176   :  { %2290 = vmatprep.subr.bf16.mxu1 %v3409_v49  ;;  %v3490_v49 = vld [vmem:[#allocation8 + $0x46c] ss:$16 sps:$4 sm:$0xff]  }
 0x178   :  { %2250 = vmatpush1.bf16.msra.mxu0 %v3404_v50  ;;  %v3493_v50 = vld [vmem:[#allocation8 + $0x66c] ss:$16 sps:$4 sm:$0xff]  }
 0x179   :  { %2291 = vmatpush1.bf16.msra.mxu1 %v3407_v51  ;;  %2251 = vmatprep.subr.bf16.mxu0 %v3412_v52  ;;  %v3491_v51 = vld [vmem:[#allocation8 + $0x668] ss:$16 sps:$4 sm:$0xff]   ;;  %v3496_v52 = vld [vmem:[#allocation8 + $0x44c] ss:$16 sps:$4 sm:$0xff]  }
 0x17a   :  { %2292 = vmatprep.subr.bf16.mxu1 %v3415_v53  ;;  %v3499_v53 = vld [vmem:[#allocation8 + $0x64c] ss:$16 sps:$4 sm:$0xff]  }
 0x17c   :  { %2252 = vmatpush1.bf16.msra.mxu0 %v3410_v54  ;;  %v3494_v54 = vld [vmem:[#allocation8 + $0x448] ss:$16 sps:$4 sm:$0xff]  }
 0x17d   :  { %2293 = vmatpush1.bf16.msra.mxu1 %v3413_v55  ;;  %2253 = vmatprep.subr.bf16.mxu0 %v3418_v56  ;;  %v3497_v55 = vld [vmem:[#allocation8 + $0x648] ss:$16 sps:$4 sm:$0xff]   ;;  %v3502_v56 = vld [vmem:[#allocation8 + $0x42c] ss:$16 sps:$4 sm:$0xff]  }
 0x17e   :  { %2294 = vmatprep.subr.bf16.mxu1 %v3421_v59  ;;  %v3505_v59 = vld [vmem:[#allocation8 + $0x62c] ss:$16 sps:$4 sm:$0xff]  }
 0x180   :  { %2254 = vmatpush2.bf16.msra.mxu0 %v3416_v60  ;;  %v3500_v60 = vld [vmem:[#allocation8 + $0x428] ss:$16 sps:$4 sm:$0xff]  }
 0x181   :  { %2295 = vmatpush2.bf16.msra.mxu1 %v3419_v61  ;;  %2255 = vmatprep.subr.bf16.mxu0 %v3424_v62  ;;  %v3503_v61 = vld [vmem:[#allocation8 + $0x628] ss:$16 sps:$4 sm:$0xff]   ;;  %v3508_v62 = vld [vmem:[#allocation8 + $0x40c] ss:$16 sps:$4 sm:$0xff]  }
 0x182   :  { %2296 = vmatprep.subr.bf16.mxu1 %v3427_v63  ;;  %v3511_v63 = vld [vmem:[#allocation8 + $0x60c] ss:$16 sps:$4 sm:$0xff]  }
 0x184   :  { %2256 = vmatpush2.bf16.msra.mxu0 %v3422_v1  ;;  %v3506_v1 = vld [vmem:[#allocation8 + $0x408] ss:$16 sps:$4 sm:$0xff]  }
 0x185   :  { %2297 = vmatpush2.bf16.msra.mxu1 %v3425_v2  ;;  %2257 = vmatprep.subr.bf16.mxu0 %v3430_v3  ;;  %v3509_v2 = vld [vmem:[#allocation8 + $0x608] ss:$16 sps:$4 sm:$0xff]   ;;  %v3514_v3 = vld [vmem:[#allocation8 + $0x5ec] ss:$16 sps:$4 sm:$0xff]  }
 0x186   :  { %2298 = vmatprep.subr.bf16.mxu1 %v3433_v4  ;;  %v3517_v4 = vld [vmem:[#allocation8 + $0x7ec] ss:$16 sps:$4 sm:$0xff]  }
 0x188   :  { %2258 = vmatpush2.bf16.msra.mxu0 %v3428_v5  ;;  %v3512_v5 = vld [vmem:[#allocation8 + $0x5e8] ss:$16 sps:$4 sm:$0xff]  }
 0x189   :  { %2299 = vmatpush2.bf16.msra.mxu1 %v3431_v6  ;;  %2259 = vmatprep.subr.bf16.mxu0 %v3436_v7  ;;  %v3515_v6 = vld [vmem:[#allocation8 + $0x7e8] ss:$16 sps:$4 sm:$0xff]   ;;  %v3520_v7 = vld [vmem:[#allocation8 + $0x5cc] ss:$16 sps:$4 sm:$0xff]  }
 0x18a   :  { %2300 = vmatprep.subr.bf16.mxu1 %v3439_v8  ;;  %v3523_v8 = vld [vmem:[#allocation8 + $0x7cc] ss:$16 sps:$4 sm:$0xff]  }
 0x18c   :  { %2260 = vmatpush2.bf16.msra.mxu0 %v3434_v9  ;;  %v3518_v9 = vld [vmem:[#allocation8 + $0x5c8] ss:$16 sps:$4 sm:$0xff]  }
 0x18d   :  { %2301 = vmatpush2.bf16.msra.mxu1 %v3437_v10  ;;  %2261 = vmatprep.subr.bf16.mxu0 %v3442_v17  ;;  %v3521_v10 = vld [vmem:[#allocation8 + $0x7c8] ss:$16 sps:$4 sm:$0xff]   ;;  %v3526_v17 = vld [vmem:[#allocation8 + $0x5ac] ss:$16 sps:$4 sm:$0xff]  }
 0x18e   :  { %2302 = vmatprep.subr.bf16.mxu1 %v3445_v14  ;;  %v3529_v14 = vld [vmem:[#allocation8 + $0x7ac] ss:$16 sps:$4 sm:$0xff]  }
 0x190   :  { %2262 = vmatpush2.bf16.msra.mxu0 %v3440_v20  ;;  %v3524_v20 = vld [vmem:[#allocation8 + $0x5a8] ss:$16 sps:$4 sm:$0xff]  }
 0x191   :  { %2303 = vmatpush2.bf16.msra.mxu1 %v3443_v21  ;;  %2263 = vmatprep.subr.bf16.mxu0 %v3448_v22  ;;  %v3527_v21 = vld [vmem:[#allocation8 + $0x7a8] ss:$16 sps:$4 sm:$0xff]   ;;  %v3532_v22 = vld [vmem:[#allocation8 + $0x58c] ss:$16 sps:$4 sm:$0xff]  }
 0x192   :  { %2304 = vmatprep.subr.bf16.mxu1 %v3451_v58  ;;  %v3535_v58 = vld [vmem:[#allocation8 + $0x78c] ss:$16 sps:$4 sm:$0xff]  }
 0x194   :  { %2264 = vmatpush2.bf16.msra.mxu0 %v3446_v24  ;;  %v3530_v24 = vld [vmem:[#allocation8 + $0x588] ss:$16 sps:$4 sm:$0xff]  }
 0x195   :  { %2305 = vmatpush2.bf16.msra.mxu1 %v3449_v25  ;;  %2265 = vmatprep.subr.bf16.mxu0 %v3454_v26  ;;  %v3533_v25 = vld [vmem:[#allocation8 + $0x788] ss:$16 sps:$4 sm:$0xff]   ;;  %v3538_v26 = vld [vmem:[#allocation8 + $0x56c] ss:$16 sps:$4 sm:$0xff]  }
 0x196   :  { %2306 = vmatprep.subr.bf16.mxu1 %v3457_v27  ;;  %v3541_v27 = vld [vmem:[#allocation8 + $0x76c] ss:$16 sps:$4 sm:$0xff]  }
 0x198   :  { %2266 = vmatpush2.bf16.msra.mxu0 %v3452_v28  ;;  %v3536_v28 = vld [vmem:[#allocation8 + $0x568] ss:$16 sps:$4 sm:$0xff]  }
 0x199   :  { %2307 = vmatpush2.bf16.msra.mxu1 %v3455_v29  ;;  %2267 = vmatprep.subr.bf16.mxu0 %v3460_v30  ;;  %v3539_v29 = vld [vmem:[#allocation8 + $0x768] ss:$16 sps:$4 sm:$0xff]   ;;  %v3544_v30 = vld [vmem:[#allocation8 + $0x54c] ss:$16 sps:$4 sm:$0xff]  }
 0x19a   :  { %2308 = vmatprep.subr.bf16.mxu1 %v3463_v31  ;;  %v3547_v31 = vld [vmem:[#allocation8 + $0x74c] ss:$16 sps:$4 sm:$0xff]  }
 0x19c   :  { %2268 = vmatpush2.bf16.msra.mxu0 %v3458_v32  ;;  %v3542_v32 = vld [vmem:[#allocation8 + $0x548] ss:$16 sps:$4 sm:$0xff]  }
 0x19d   :  { %2309 = vmatpush2.bf16.msra.mxu1 %v3461_v33  ;;  %2319 = vmatprep.subr.bf16.mxu0 %v3466_v34  ;;  %v3545_v33 = vld [vmem:[#allocation8 + $0x748] ss:$16 sps:$4 sm:$0xff]   ;;  %v3550_v34 = vld [vmem:[#allocation8 + $0x52c] ss:$16 sps:$4 sm:$0xff]  }
 0x19e   :  { %2360 = vmatprep.subr.bf16.mxu1 %v3469_v36  ;;  %v3553_v36 = vld [vmem:[#allocation8 + $0x72c] ss:$16 sps:$4 sm:$0xff]  }
 0x19f   :  { %2270 = vmatmul.mubr.bf16.vlgmr.msra.gmra.mxu0 %v3838_v42  ;;  %v3479_v42 = vld [vmem:[#allocation8 + $0x6a8] ss:$16 sps:$4 sm:$0xff]  }
 0x1a0   :  { %2311 = vmatmul.mubr.bf16.vlgmr.msra.gmra.mxu1 %v3832_v35  ;;  %2320 = vmatpush1.bf16.msra.mxu0 %v3464_v37  ;;  %v3487_v35 = vld [vmem:[#allocation8 + $0x68c] ss:$16 sps:$4 sm:$0xff]   ;;  %v3548_v37 = vld [vmem:[#allocation8 + $0x528] ss:$16 sps:$4 sm:$0xff]  }
 0x1a1   :  { %2351 = vmatprep.mubr.bf16.mxu0 %v3852_v18  ;;  %2361 = vmatpush1.bf16.msra.mxu1 %v3467_v38  ;;  %v3485_v18 = vld [vmem:[#allocation8 + $0x688] ss:$16 sps:$4 sm:$0xff]  }
 0x1a2   :  { %2392 = vmatprep.mubr.bf16.mxu1 %v3854_v19  ;;  %2321 = vmatprep.subr.bf16.mxu0 %v3472_v40  ;;  %v3488_v19 = vld [vmem:[#allocation8 + $0x468] ss:$16 sps:$4 sm:$0xff]   ;;  %v3556_v40 = vld [vmem:[#allocation8 + $0x50c] ss:$16 sps:$4 sm:$0xff]  }
 0x1a3   :  { %2362 = vmatprep.subr.bf16.mxu1 %v3475_v39  ;;  %v3551_v38 = vld [vmem:[#allocation8 + $0x728] ss:$16 sps:$4 sm:$0xff]   ;;  %v3559_v39 = vld [vmem:[#allocation8 + $0x70c] ss:$16 sps:$4 sm:$0xff]  }
 0x1a4   :  { %2322 = vmatpush1.bf16.msra.mxu0 %v3470_v41  ;;  %v3554_v41 = vld [vmem:[#allocation8 + $0x508] ss:$16 sps:$4 sm:$0xff]  }
 0x1a5   :  { %2363 = vmatpush1.bf16.msra.mxu1 %v3473_v43  ;;  %2323 = vmatprep.subr.bf16.mxu0 %v3478_v44  ;;  %v3557_v43 = vld [vmem:[#allocation8 + $0x708] ss:$16 sps:$4 sm:$0xff]  }
 0x1a6   :  { %2364 = vmatprep.subr.bf16.mxu1 %v3481_v45  ;;  %v3560_v44 = vld [vmem:[#allocation10 + $0x78] sm:$0xff]  }
 0x1a7   :  { %v3561_v45 = vld [vmem:[#allocation10 + $0x38] sm:$0xff]  }
 0x1a8   :  { %2324 = vmatpush1.bf16.msra.mxu0 %v3476_v46  ;;  %v3562_v46 = vld [vmem:[#allocation10 + $0x70] sm:$0xff]  }
 0x1a9   :  { %2365 = vmatpush1.bf16.msra.mxu1 %v3479_v42  ;;  %2325 = vmatprep.subr.bf16.mxu0 %v3484_v47 }
 0x1aa   :  { %2366 = vmatprep.subr.bf16.mxu1 %v3487_v35  ;;  %v3563_v35 = vld [vmem:[#allocation10 + $0x30] sm:$0xff]  }
 0x1ac   :  { %2326 = vmatpush1.bf16.msra.mxu0 %v3482_v48 }
 0x1ad   :  { %2367 = vmatpush1.bf16.msra.mxu1 %v3485_v18  ;;  %2327 = vmatprep.subr.bf16.mxu0 %v3490_v49  ;;  %v3564_v49 = vld [vmem:[#allocation10 + $0x68] sm:$0xff]  }
 0x1ae   :  { %2368 = vmatprep.subr.bf16.mxu1 %v3493_v50 }
 0x1b0   :  { %2328 = vmatpush1.bf16.msra.mxu0 %v3488_v19 }
 0x1b1   :  { %2369 = vmatpush1.bf16.msra.mxu1 %v3491_v51  ;;  %2329 = vmatprep.subr.bf16.mxu0 %v3496_v52  ;;  %v3565_v51 = vld [vmem:[#allocation10 + $0x28] sm:$0xff]  }
 0x1b2   :  { %2370 = vmatprep.subr.bf16.mxu1 %v3499_v53 }
 0x1b4   :  { %2330 = vmatpush1.bf16.msra.mxu0 %v3494_v54  ;;  %v3566_v54 = vld [vmem:[#allocation10 + $0x60] sm:$0xff]  }
 0x1b5   :  { %2371 = vmatpush1.bf16.msra.mxu1 %v3497_v55  ;;  %2331 = vmatprep.subr.bf16.mxu0 %v3502_v56  ;;  %v3576_v55 = vld [vmem:[#allocation10 + $0xf8] sm:$0xff]   ;;  %v3578_v56 = vld [vmem:[#allocation10 + $0xf0] sm:$0xff]  }
 0x1b6   :  { %2372 = vmatprep.subr.bf16.mxu1 %v3505_v59  ;;  %v3567_v59 = vld [vmem:[#allocation10 + $0x20] sm:$0xff]  }
 0x1b8   :  { %2332 = vmatpush1.bf16.msra.mxu0 %v3500_v60  ;;  %v3579_v60 = vld [vmem:[#allocation10 + $0xb0] sm:$0xff]  }
 0x1b9   :  { %2373 = vmatpush1.bf16.msra.mxu1 %v3503_v61  ;;  %2333 = vmatprep.subr.bf16.mxu0 %v3508_v62  ;;  %v3580_v61 = vld [vmem:[#allocation10 + $0xe8] sm:$0xff]   ;;  %v3569_v62 = vld [vmem:[#allocation10 + $0x18] sm:$0xff]  }
 0x1ba   :  { %2374 = vmatprep.subr.bf16.mxu1 %v3511_v63  ;;  %v3570_v63 = vld [vmem:[#allocation10 + $0x50] sm:$0xff]  }
 0x1bc   :  { %2334 = vmatpush1.bf16.msra.mxu0 %v3506_v1  ;;  %v3581_v1 = vld [vmem:[#allocation10 + $0xa8] sm:$0xff]  }
 0x1bd   :  { %2375 = vmatpush1.bf16.msra.mxu1 %v3509_v2  ;;  %2335 = vmatprep.subr.bf16.mxu0 %v3514_v3  ;;  %v3582_v2 = vld [vmem:[#allocation10 + $0xe0] sm:$0xff]   ;;  %v3571_v3 = vld [vmem:[#allocation10 + $0x10] sm:$0xff]  }
 0x1be   :  { %2376 = vmatprep.subr.bf16.mxu1 %v3517_v4  ;;  %v3572_v4 = vld [vmem:[#allocation10 + $0x48] sm:$0xff]  }
 0x1c0   :  { %2336 = vmatpush2.bf16.msra.mxu0 %v3512_v5  ;;  %v3583_v5 = vld [vmem:[#allocation10 + $0xa0] sm:$0xff]  }
 0x1c1   :  { %2377 = vmatpush2.bf16.msra.mxu1 %v3515_v6  ;;  %2337 = vmatprep.subr.bf16.mxu0 %v3520_v7  ;;  %v3584_v6 = vld [vmem:[#allocation10 + $0xd8] sm:$0xff]   ;;  %v3573_v7 = vld [vmem:[#allocation10 + $0x8] sm:$0xff]  }
 0x1c2   :  { %2378 = vmatprep.subr.bf16.mxu1 %v3523_v8  ;;  %v3574_v8 = vld [vmem:[#allocation10 + $0x40] sm:$0xff]  }
 0x1c4   :  { %2338 = vmatpush2.bf16.msra.mxu0 %v3518_v9  ;;  %v3585_v9 = vld [vmem:[#allocation10 + $0x98] sm:$0xff]  }
 0x1c5   :  { %2379 = vmatpush2.bf16.msra.mxu1 %v3521_v10  ;;  %2339 = vmatprep.subr.bf16.mxu0 %v3526_v17  ;;  %v3575_v10 = vld [vmem:[#allocation10] sm:$0xff]   ;;  %v771_v17 = vld [vmem:[%s3902_s4] sm:$0xf] }
 0x1c6   :  { %2380 = vmatprep.subr.bf16.mxu1 %v3529_v14  ;;  %v776_v14 = vrot.slane %v771_v17, %v126_v12 }
 0x1c8   :  { %2340 = vmatpush2.bf16.msra.mxu0 %v3524_v20  ;;  %v780_v20 = vrot.slane %v771_v17, %v130_v15  ;;  %v3589_v15 = vld [vmem:[#allocation10 + $0x88] sm:$0xff]  }
 0x1c9   :  { %2381 = vmatpush2.bf16.msra.mxu1 %v3527_v21  ;;  %2341 = vmatprep.subr.bf16.mxu0 %v3532_v22 }
 0x1ca   :  { %2382 = vmatprep.subr.bf16.mxu1 %v3535_v58 }
 0x1cc   :  { %2342 = vmatpush2.bf16.msra.mxu0 %v3530_v24 }
 0x1cd   :  { %2383 = vmatpush2.bf16.msra.mxu1 %v3533_v25  ;;  %2343 = vmatprep.subr.bf16.mxu0 %v3538_v26  ;;  %v3586_v26 = vld [vmem:[#allocation10 + $0xd0] sm:$0xff]  }
 0x1ce   :  { %2384 = vmatprep.subr.bf16.mxu1 %v3541_v27 }
 0x1d0   :  { %2344 = vmatpush2.bf16.msra.mxu0 %v3536_v28 }
 0x1d1   :  { %2385 = vmatpush2.bf16.msra.mxu1 %v3539_v29  ;;  %2345 = vmatprep.subr.bf16.mxu0 %v3544_v30  ;;  %v3587_v29 = vld [vmem:[#allocation10 + $0x90] sm:$0xff]  }
 0x1d2   :  { %2386 = vmatprep.subr.bf16.mxu1 %v3547_v31 }
 0x1d4   :  { %2346 = vmatpush2.bf16.msra.mxu0 %v3542_v32 }
 0x1d5   :  { %2387 = vmatpush2.bf16.msra.mxu1 %v3545_v33  ;;  %2347 = vmatprep.subr.bf16.mxu0 %v3550_v34 }
 0x1d6   :  { %2388 = vmatprep.subr.bf16.mxu1 %v3553_v36  ;;  %v3588_v36 = vld [vmem:[#allocation10 + $0xc8] sm:$0xff]  }
 0x1d8   :  { %2348 = vmatpush2.bf16.msra.mxu0 %v3548_v37 }
 0x1d9   :  { %2389 = vmatpush2.bf16.msra.mxu1 %v3551_v38  ;;  %2349 = vmatprep.subr.bf16.mxu0 %v3556_v40 }
 0x1da   :  { %2390 = vmatprep.subr.bf16.mxu1 %v3559_v39 }
 0x1dc   :  { %2350 = vmatpush2.bf16.msra.mxu0 %v3554_v41 }
 0x1dd   :  { %2391 = vmatpush2.bf16.msra.mxu1 %v3557_v43  ;;  %3111 = vmatprep.subr.bf16.mxu0 %v3560_v44  ;;  %v3590_v43 = vld [vmem:[#allocation10 + $0xc0] sm:$0xff]  }
 0x1de   :  { %3133 = vmatprep.subr.bf16.mxu1 %v3576_v55 }
 0x1df   :  { %2352 = vmatmul.mubr.bf16.vlgmr.msra.gmra.mxu0 %v3866_v57  ;;  %v2107_v42 = vpop.f32.mrf.mxu0  ;;  %v3577_v57 = vld [vmem:[#allocation10 + $0xb8] sm:$0xff]  }
 0x1e0   :  { %v2148_v47 = vpop.f32.mrf.mxu1  ;;  %2393 = vmatmul.mubr.bf16.vlgmr.msra.gmra.mxu1 %v3864_v23  ;;  %3112 = vmatpush3.bf16.msra.mxu0 %v3561_v45  ;;  %v3568_v23 = vld [vmem:[#allocation10 + $0x58] sm:$0xff]   ;;  %v2108_v21 = vadd.f32 %v2107_v42, %v776_v14  ;;  %v3591_v45 = vld [vmem:[#allocation10 + $0x80] sm:$0xff]   ;;  %v3078_v14 = vld [vmem:[%s3904_s6] ss:$0 sm:$0xff]  ;;  %s3736_s6 = smov [#allocation11]  }
 0x1e1   :  { %v2109_v48 = vpop.f32.mrf.mxu0  ;;  %3113 = vmatprep.subr.bf16.mxu0 %v3562_v46  ;;  %3134 = vmatpush3.bf16.msra.mxu1 %v3577_v57  ;;  %s2775_s30 = sshll.u32 %s3736_s6, 4  ;;  %s2776_s30 = int_to_ptr.vmem [resolvable:$true] %s2775_s30 }
 0x1e2   :  { %v2150_v18 = vpop.f32.mrf.mxu1  ;;  %3135 = vmatprep.subr.bf16.mxu1 %v3578_v56  ;;  %v2110_v22 = vadd.f32 %v2109_v48, %v780_v20  ;;  %v2149_v58 = vadd.f32 %v2148_v47, %v2108_v21  ;;  %v2753_v21 = vand.u32 127, %v124_v11  ;;  %s3696_s8 = scalar_lea.vmem %s2776_s30, 128  ;;  %p3701_p12 = scmp.lt.s32.totalorder %s2776_s30, %s2776_s30 }
 0x1e3   :  { %v2111_v50 = vpop.f32.mrf.mxu0  ;;  %p3697_p11 = scmp.ne.s32.totalorder %s2776_s30, %s3696_s8  ;;  %p3702_p13 = scmp.lt.s32.totalorder %s3696_s8, %s3696_s8 }
 0x1e4   :  { %v2152_v19 = vpop.f32.mrf.mxu1  ;;  %3114 = vmatpush3.bf16.msra.mxu0 %v3563_v35  ;;  %v2151_v27 = vadd.f32 %v2150_v18, %v2110_v22  ;;  %vm2754_vm2 = vcmp.lt.s32.totalorder %v2753_v21, 64 }
 0x1e5   :  { %v2112_v52 = vpop.f32.mrf.mxu0  ;;  %3115 = vmatprep.subr.bf16.mxu0 %v3564_v49  ;;  %3136 = vmatpush3.bf16.msra.mxu1 %v3579_v60  ;;  %p3703_p0 = por %p3702_p13, %p3701_p12 }
 0x1e6   :  { %v2153_v53 = vpop.f32.mrf.mxu1  ;;  %3137 = vmatprep.subr.bf16.mxu1 %v3580_v61  ;;  %v788_v52 = vrot.slane %v771_v17, %v138_v16 }
 0x1e7   :  { %p3704_p1 = pnand %p3703_p0, %p3697_p11 }
 0x1e8   :  { %3116 = vmatpush3.bf16.msra.mxu0 %v3565_v51  ;;  %v784_v51 = vrot.slane %v771_v17, %v134_v13 }
 0x1e9   :  { %3117 = vmatprep.subr.bf16.mxu0 %v3566_v54  ;;  %3138 = vmatpush3.bf16.msra.mxu1 %v3581_v1 }
 0x1ea   :  { %3139 = vmatprep.subr.bf16.mxu1 %v3582_v2 }
 0x1ec   :  { %3118 = vmatpush3.bf16.msra.mxu0 %v3567_v59 }
 0x1ed   :  { %3119 = vmatprep.subr.bf16.mxu0 %v3568_v23  ;;  %3140 = vmatpush3.bf16.msra.mxu1 %v3583_v5 }
 0x1ee   :  { %3141 = vmatprep.subr.bf16.mxu1 %v3584_v6 }
 0x1f0   :  { %3120 = vmatpush3.bf16.msra.mxu0 %v3569_v62 }
 0x1f1   :  { %3121 = vmatprep.subr.bf16.mxu0 %v3570_v63  ;;  %3142 = vmatpush3.bf16.msra.mxu1 %v3585_v9 }
 0x1f2   :  { %3143 = vmatprep.subr.bf16.mxu1 %v3586_v26 }
 0x1f4   :  { %3122 = vmatpush3.bf16.msra.mxu0 %v3571_v3 }
 0x1f5   :  { %3123 = vmatprep.subr.bf16.mxu0 %v3572_v4  ;;  %3144 = vmatpush3.bf16.msra.mxu1 %v3587_v29 }
 0x1f6   :  { %3145 = vmatprep.subr.bf16.mxu1 %v3588_v36 }
 0x1f8   :  { %3124 = vmatpush3.bf16.msra.mxu0 %v3573_v7 }
 0x1f9   :  { %3125 = vmatprep.subr.bf16.mxu0 %v3574_v8  ;;  %3146 = vmatpush3.bf16.msra.mxu1 %v3589_v15 }
 0x1fa   :  { %3147 = vmatprep.subr.bf16.mxu1 %v3590_v43 }
 0x1fc   :  { %3126 = vmatpush3.bf16.msra.mxu0 %v3575_v10 }
 0x1fd   :  { %3148 = vmatpush3.bf16.msra.mxu1 %v3591_v45 }
 0x21f   :  { %v2189_v24 = vpop.f32.mrf.mxu0 }
 0x220   :  { %v2230_v25 = vpop.f32.mrf.mxu1  ;;  %v2190_v28 = vadd.f32 %v2189_v24, %v2149_v58 }
 0x221   :  { %v2191_v30 = vpop.f32.mrf.mxu0 }
 0x222   :  { %v2232_v31 = vpop.f32.mrf.mxu1  ;;  %v2231_v32 = vadd.f32 %v2230_v25, %v2190_v28  ;;  %v2192_v33 = vadd.f32 %v2191_v30, %v2151_v27 }
 0x223   :  { %v2193_v34 = vpop.f32.mrf.mxu0 }
 0x224   :  { %v2234_v12 = vpop.f32.mrf.mxu1  ;;  %v2233_v37 = vadd.f32 %v2232_v31, %v2192_v33  ;;  %v2401_v38 = vmax.f32 %v2231_v32, 0.0 }
 0x225   :  { %v2194_v40 = vpop.f32.mrf.mxu0 }
 0x226   :  { %v2235_v39 = vpop.f32.mrf.mxu1  ;;  %v2402_v41 = vmax.f32 %v2233_v37, 0.0  ;;  %v2405_v46 = vpack.c.bf16 %v2401_v38, %v2401_v38 }
 0x228   :  { %v2406_v44 = vpack.c.bf16 %v2402_v41, %v2402_v41 }
 0x22a   :  { %2704 = vmatprep.mubr.bf16.mxu0 %v2406_v44 }
 0x22b   :  { %2705 = vmatmul.mubr.bf16.vlgmr.msra.gmra.mxu0 %v2405_v46 }
 0x25f   :  { %v2271_v42 = vpop.f32.mrf.mxu0 }
 0x260   :  { %v2312_v47 = vpop.f32.mrf.mxu1  ;;  %v2272_v53 = vadd.f32 %v2271_v42, %v784_v51 }
 0x261   :  { %v2273_v35 = vpop.f32.mrf.mxu0 }
 0x262   :  { %v2314_v48 = vpop.f32.mrf.mxu1  ;;  %v2274_v54 = vadd.f32 %v2273_v35, %v788_v52  ;;  %v2313_v55 = vadd.f32 %v2312_v47, %v2272_v53 }
 0x263   :  { %v2275_v18 = vpop.f32.mrf.mxu0 }
 0x264   :  { %v2316_v49 = vpop.f32.mrf.mxu1  ;;  %v2315_v56 = vadd.f32 %v2314_v48, %v2274_v54 }
 0x265   :  { %v2276_v50 = vpop.f32.mrf.mxu0 }
 0x266   :  { %v2317_v19 = vpop.f32.mrf.mxu1 }
 0x29f   :  { %v2353_v57 = vpop.f32.mrf.mxu0 }
 0x2a0   :  { %v2354_v59 = vadd.f32 %v2353_v57, %v2313_v55  ;;  %v2394_v23 = vpop.f32.mrf.mxu1 }
 0x2a1   :  { %v2355_v60 = vpop.f32.mrf.mxu0 }
 0x2a2   :  { %v2395_v61 = vadd.f32 %v2394_v23, %v2354_v59  ;;  %v2356_v62 = vadd.f32 %v2355_v60, %v2315_v56  ;;  %v2396_v63 = vpop.f32.mrf.mxu1 }
 0x2a3   :  { %v2357_v1 = vpop.f32.mrf.mxu0 }
 0x2a4   :  { %v2397_v2 = vadd.f32 %v2396_v63, %v2356_v62  ;;  %v2398_v3 = vpop.f32.mrf.mxu1  ;;  %v2403_v4 = vmax.f32 %v2395_v61, 0.0 }
 0x2a5   :  { %v2358_v5 = vpop.f32.mrf.mxu0 }
 0x2a6   :  { %v2404_v13 = vmax.f32 %v2397_v2, 0.0  ;;  %v2399_v6 = vpop.f32.mrf.mxu1  ;;  %v2407_v16 = vpack.c.bf16 %v2403_v4, %v2403_v4 }
 0x2a8   :  { %v2408_v0 = vpack.c.bf16 %v2404_v13, %v2404_v13 }
 0x2aa   :  { %2744 = vmatprep.mubr.bf16.mxu1 %v2408_v0 }
 0x2ab   :  { %2745 = vmatmul.mubr.bf16.vlgmr.msra.gmra.mxu1 %v2407_v16 }
 0x2eb   :  { %v3127_v7 = vpop.f32.mrf.mxu0 }
 0x2ed   :  { %v3128_v8 = vpop.f32.mrf.mxu0 }
 0x2ee   :  { %v3129_v9 = vadd.f32 %v3128_v8, %v3127_v7 }
 0x2ef   :  { %v3130_v10 = vpop.f32.mrf.mxu0 }
 0x2f0   :  { %v2707_v58 = vadd.f32 %v3129_v9, %v3078_v14 }
 0x2f1   :  { %v3131_v17 = vpop.f32.mrf.mxu0 }
 0x36b   :  { %v3149_v20 = vpop.f32.mrf.mxu1 }
 0x36d   :  { %v3150_v22 = vpop.f32.mrf.mxu1 }
 0x36e   :  { %v3151_v24 = vadd.f32 %v3150_v22, %v3149_v20 }
 0x36f   :  { %v3152_v25 = vpop.f32.mrf.mxu1 }
 0x370   :  { %v2747_v26 = vadd.f32 %v3151_v24, %v2707_v58 }
 0x371   :  { %v3153_v27 = vpop.f32.mrf.mxu1 }
 0x372   :  { %v2755_v28 = vsel %vm2754_vm2, %v2747_v26, -inf }
 0x373   :  { %2756 = vmax.xlane.f32.xlu0 %v2755_v28 }
 0x3fc   :  { %v2757_v29 = vpop.xlane.xlu0 %2756 }
 0x3fd   :  { %v2758_v30 = vsub.f32 %v2755_v28, %v2757_v29 }
 0x3ff   :  { %v2759_v31 = vmul.f32 1.442695, %v2758_v30 }
 0x401   :  { %3592 = vpow2.f32 %v2759_v31 }
 0x40e   :  { %v3593_v32 = vpop.eup %3592 }
 0x40f   :  { %2761 = vadd.xlane.f32.xlu0 %v3593_v32 }
 0x498   :  { %v2762_v33 = vpop.xlane.xlu0 %2761 }
 0x499   :  { %3594 = vlog2.f32 %v2762_v33 }
 0x4a6   :  { %v3595_v34 = vpop.eup %3594 }
 0x4a7   :  { %v2764_v11 = vmul.f32 0.6931472, %v3595_v34 }
 0x4a9   :  { %v2765_v12 = vadd.f32 %v2764_v11, %v2757_v29 }
 0x4ab   :  { %v2766_v36 = vsub.f32 %v2747_v26, %v2765_v12 }
 0x4ad   :  { %v2767_v37 = vsel %vm2754_vm2, %v2766_v36, %v2747_v26 }
 0x4ae   :  { %2768 = vst [vmem:[#allocation11] sm:$0xff] %v2767_v37 }
 0x4af   :  { %3707 = shalt.err (!%p3704_p1)
}
 0x4b0   :  { %2778 = dma.vmem_to_hbm [thread:$0]  %s2776_s30, 128, %s3905_s7, [#allocation4]  }
 0x4b1   :  { %3722 = dma.done.wait [#allocation4], 128  }
 0x4b2   :  { %3723 = vsyncadd [#allocation4], 4294967168 }
 0x4b3   :  { %2782 = vsyncpa [#allocation3], 1 }
 0x4b4   :  { %2783 = vsyncpa [#allocation6], 1 }
 0x4b5   :  { %2784 = vsyncpa [#allocation9], 1 }
 0x4b6   :  { %2785 = vsyncpa [#allocation4], 1 }

// kernel: tpu_custom_call.1
= control target key start
LH: loop header
LB: loop body
LE: loop exit
PB: predicated region body
PF: predicated region fallthrough
CT: control target
= control target key end

     0   :  { %12 = vsyncpa [#allocation3], 0  ;;  %s3898_s0 = inlined_call_operand.hbm [shape: f32[8,49], index: 0, kind: input, shape index: {}]   ;;  %s3899_s1 = inlined_call_operand.hbm [shape: bf16[49,1024], index: 1, kind: input, shape index: {}]   ;;  %s3900_s2 = inlined_call_operand.hbm [shape: f32[1,1024], index: 2, kind: input, shape index: {}]   ;;  %s3901_s3 = inlined_call_operand.hbm [shape: bf16[1024,512], index: 3, kind: input, shape index: {}]   ;;  %s3902_s4 = inlined_call_operand.vmem [shape: f32[1,512], index: 4, kind: input, shape index: {}]   ;;  %s3903_s5 = inlined_call_operand.hbm [shape: bf16[512,128], index: 5, kind: input, shape index: {}]   ;;  %s3904_s6 = inlined_call_operand.vmem [shape: f32[1,128], index: 6, kind: input, shape index: {}]   ;;  %s3905_s7 = inlined_call_operand.hbm [shape: f32[8,128], index: 7, kind: output, shape index: {}]  }
   0x1   :  { %13 = vsyncpa [#allocation6], 0 }
   0x2   :  { %14 = vsyncpa [#allocation9], 0 }
   0x3   :  { %15 = vsyncpa [#allocation4], 0  ;;  %s3724_s24 = smov [#allocation5]  }
   0x4   :  { %s31_s25 = sshll.u32 %s3724_s24, 4  ;;  %s32_s25 = int_to_ptr.vmem [resolvable:$true] %s31_s25 }
   0x5   :  { %s3604_s26 = scalar_lea.vmem %s32_s25, 3584  ;;  %p3609_p1 = scmp.lt.s32.totalorder %s32_s25, %s32_s25 }
   0x6   :  { %p3605_p0 = scmp.ne.s32.totalorder %s32_s25, %s3604_s26  ;;  %p3610_p2 = scmp.lt.s32.totalorder %s3604_s26, %s3604_s26 }
   0x8   :  { %p3611_p3 = por %p3610_p2, %p3609_p1 }
   0xa   :  { %p3612_p4 = pnand %p3611_p3, %p3605_p0 }
   0xc   :  { %3615 = shalt.err (!%p3612_p4)
}
   0xd   :  { %s3725_s27 = smov 512   ;;  %s3726_s28 = smov 32  }
   0xe   :  { %37 = dma.hbm_to_vmem [thread:$0]  %s3899_s1, 3584, %s32_s25, [#allocation6], %s3725_s27, %s3725_s27, %s3726_s28  }
   0xf   :  { %s3727_s8 = smov [#allocation8]  }
  0x10   :  { %s53_s9 = sshll.u32 %s3727_s8, 4  ;;  %s54_s9 = int_to_ptr.vmem [resolvable:$true] %s53_s9 }
  0x11   :  { %s3624_s10 = scalar_lea.vmem %s54_s9, 32768  ;;  %p3629_p6 = scmp.lt.s32.totalorder %s54_s9, %s54_s9 }
  0x12   :  { %p3625_p5 = scmp.ne.s32.totalorder %s54_s9, %s3624_s10  ;;  %p3630_p7 = scmp.lt.s32.totalorder %s3624_s10, %s3624_s10 }
  0x14   :  { %p3631_p8 = por %p3630_p7, %p3629_p6 }
  0x16   :  { %p3632_p9 = pnand %p3631_p8, %p3625_p5 }
  0x18   :  { %3635 = shalt.err (!%p3632_p9)
}
  0x19   :  { %s3728_s11 = smov 256   ;;  %s3729_s12 = smov 16  }
  0x1a   :  { %59 = dma.hbm_to_vmem [thread:$0]  %s3901_s3, 32768, %s54_s9, [#allocation9], %s3728_s11, %s3728_s11, %s3729_s12  }
  0x1b   :  { %s3730_s15 = smov [#allocation2]   ;;  %s3731_s17 = smov [#allocation7]  }
  0x1c   :  { %s22_s16 = sshll.u32 %s3730_s15, 4  ;;  %s44_s1 = sshll.u32 %s3731_s17, 4  ;;  %s23_s16 = int_to_ptr.vmem [resolvable:$true] %s22_s16  ;;  %s45_s1 = int_to_ptr.vmem [resolvable:$true] %s44_s1 }
  0x1d   :  { %s3644_s18 = scalar_lea.vmem %s23_s16, 128  ;;  %p3649_p11 = scmp.lt.s32.totalorder %s23_s16, %s23_s16 }
  0x1e   :  { %p3645_p10 = scmp.ne.s32.totalorder %s23_s16, %s3644_s18  ;;  %p3650_p12 = scmp.lt.s32.totalorder %s3644_s18, %s3644_s18 }
  0x20   :  { %p3651_p13 = por %p3650_p12, %p3649_p11 }
  0x22   :  { %p3652_p0 = pnand %p3651_p13, %p3645_p10 }
  0x24   :  { %3655 = shalt.err (!%p3652_p0)
}
  0x25   :  { %25 = dma.hbm_to_vmem [thread:$0]  %s3898_s0, 128, %s23_s16, [#allocation3]  }
  0x26   :  { %s3664_s21 = scalar_lea.vmem %s45_s1, 128  ;;  %p3669_p2 = scmp.lt.s32.totalorder %s45_s1, %s45_s1 }
  0x27   :  { %p3665_p1 = scmp.ne.s32.totalorder %s45_s1, %s3664_s21  ;;  %p3670_p3 = scmp.lt.s32.totalorder %s3664_s21, %s3664_s21 }
  0x29   :  { %p3671_p4 = por %p3670_p3, %p3669_p2 }
  0x2b   :  { %p3672_p5 = pnand %p3671_p4, %p3665_p1 }
  0x2d   :  { %3675 = shalt.err (!%p3672_p5)
}
  0x2e   :  { %47 = dma.hbm_to_vmem [thread:$0]  %s3900_s2, 128, %s45_s1, [#allocation6]  }
  0x2f   :  { %s3732_s23 = smov [#allocation10]  }
  0x30   :  { %s67_s24 = sshll.u32 %s3732_s23, 4  ;;  %s68_s24 = int_to_ptr.vmem [resolvable:$true] %s67_s24 }
  0x31   :  { %s3684_s25 = scalar_lea.vmem %s68_s24, 4096  ;;  %p3689_p7 = scmp.lt.s32.totalorder %s68_s24, %s68_s24 }
  0x32   :  { %p3685_p6 = scmp.ne.s32.totalorder %s68_s24, %s3684_s25  ;;  %p3690_p8 = scmp.lt.s32.totalorder %s3684_s25, %s3684_s25 }
  0x34   :  { %p3691_p9 = por %p3690_p8, %p3689_p7 }
  0x36   :  { %p3692_p10 = pnand %p3691_p9, %p3685_p6 }
  0x38   :  { %3695 = shalt.err (!%p3692_p10)
}
  0x39   :  { %s3733_s0 = smov 64   ;;  %s3734_s26 = smov 4  }
  0x3a   :  { %73 = dma.hbm_to_vmem [thread:$0]  %s3903_s5, 4096, %s68_s24, [#allocation9], %s3733_s0, %s3733_s0, %s3734_s26  }
  0x3b   :  { %3716 = dma.done.wait [#allocation3], 128  }
  0x3c   :  { %3717 = vsyncadd [#allocation3], 4294967168 }
  0x3d   :  { %3718 = dma.done.wait [#allocation6], 3712  }
  0x3e   :  { %3719 = vsyncadd [#allocation6], 4294963584 }
  0x3f   :  { %3720 = dma.done.wait [#allocation9], 36864  }
  0x40   :  { %3721 = vsyncadd [#allocation9], 4294930432  ;;  %v3735_v0 = vmov 0   ;;  %vm308_vm0 = vcmask 1040384   ;;  %v118_v1 = vld [vmem:[#allocation5 + $0xc0] sm:$0x11] }
  0x41   :  { %367 = vmatprep.mubr.bf16.mxu0 %v3735_v0  ;;  %408 = vmatprep.mubr.bf16.mxu1 %v3735_v0  ;;  %v3795_v2 = vsel %vm308_vm0, 65535, %v3735_v0  ;;  %v119_v3 = vld [vmem:[#allocation5 + $0xc8] sm:$0x11]  ;;  %v110_v4 = vld [vmem:[#allocation5 + $0x80] sm:$0xff]  ;;  %v2811_v5 = vcombine.high %v118_v1, %v118_v1  ;;  %v2810_v7 = vcombine.low %v118_v1, %v118_v1  ;;  %v120_v30 = vld [vmem:[#allocation5 + $0xd0] sm:$0x11] }
  0x42   :  { %v2813_v6 = vcombine.high %v119_v3, %v119_v3  ;;  %v2812_v8 = vcombine.low %v119_v3, %v119_v3  ;;  %v114_v9 = vld [vmem:[#allocation5 + $0xa0] sm:$0xff]  ;;  %v111_v10 = vld [vmem:[#allocation5 + $0x88] sm:$0xff]  ;;  %v121_v31 = vld [vmem:[#allocation5 + $0xd8] sm:$0x11]  ;;  %v2815_v36 = vcombine.high %v120_v30, %v120_v30  ;;  %v2814_v41 = vcombine.low %v120_v30, %v120_v30 }
  0x43   :  { %v115_v11 = vld [vmem:[#allocation5 + $0xa8] sm:$0xff]  ;;  %v2803_v12 = vcombine.high %v110_v4, %v114_v9  ;;  %v315_v14 = vand.u32 %v2811_v5, %v3795_v2  ;;  %v312_v16 = vand.u32 %v2810_v7, %v3795_v2  ;;  %v102_v18 = vld [vmem:[#allocation5 + $0x40] sm:$0xff]  ;;  %v2802_v22 = vcombine.low %v110_v4, %v114_v9  ;;  %v92_v39 = vld [vmem:[#allocation2] sm:$0xff] }
  0x44   :  { %v2805_v13 = vcombine.high %v111_v10, %v115_v11  ;;  %v321_v15 = vand.u32 %v2813_v6, %v3795_v2  ;;  %v318_v17 = vand.u32 %v2812_v8, %v3795_v2  ;;  %v106_v19 = vld [vmem:[#allocation5 + $0x60] sm:$0xff]  ;;  %v103_v20 = vld [vmem:[#allocation5 + $0x48] sm:$0xff]  ;;  %v2804_v23 = vcombine.low %v111_v10, %v115_v11  ;;  %v112_v43 = vld [vmem:[#allocation5 + $0x90] sm:$0xff] }
  0x45   :  { %v107_v21 = vld [vmem:[#allocation5 + $0x68] sm:$0xff]  ;;  %343 = vmatprep.subr.bf16.mxu0 %v315_v14  ;;  %v2795_v24 = vcombine.high %v102_v18, %v106_v19  ;;  %v94_v26 = vld [vmem:[#allocation5] sm:$0xff]  ;;  %v2794_v32 = vcombine.low %v102_v18, %v106_v19  ;;  %v2817_v37 = vcombine.high %v121_v31, %v121_v31  ;;  %v2816_v42 = vcombine.low %v121_v31, %v121_v31  ;;  %v116_v44 = vld [vmem:[#allocation5 + $0xb0] sm:$0xff] }
  0x46   :  { %384 = vmatprep.subr.bf16.mxu1 %v321_v15  ;;  %344 = vmatpush1.bf16.msra.mxu0 %v312_v16  ;;  %v2797_v25 = vcombine.high %v103_v20, %v107_v21  ;;  %v98_v27 = vld [vmem:[#allocation5 + $0x20] sm:$0xff]  ;;  %v95_v28 = vld [vmem:[#allocation5 + $0x8] sm:$0xff]  ;;  %v2796_v33 = vcombine.low %v103_v20, %v107_v21  ;;  %v327_v45 = vand.u32 %v2815_v36, %v3795_v2  ;;  %v113_v47 = vld [vmem:[#allocation5 + $0x98] sm:$0xff]  ;;  %vm304_vm1 = vcmask 400384  }
  0x47   :  { %385 = vmatpush1.bf16.msra.mxu1 %v318_v17  ;;  %345 = vmatprep.subr.bf16.mxu0 %v2803_v12  ;;  %v99_v29 = vld [vmem:[#allocation5 + $0x28] sm:$0xff]  ;;  %v2787_v34 = vcombine.high %v94_v26, %v98_v27  ;;  %v2786_v38 = vcombine.low %v94_v26, %v98_v27  ;;  %v333_v46 = vand.u32 %v2817_v37, %v3795_v2  ;;  %v117_v48 = vld [vmem:[#allocation5 + $0xb8] sm:$0xff]  ;;  %v104_v52 = vld [vmem:[#allocation5 + $0x50] sm:$0xff] }
  0x48   :  { %386 = vmatprep.subr.bf16.mxu1 %v2805_v13  ;;  %v2789_v35 = vcombine.high %v95_v28, %v99_v29  ;;  %v2788_v40 = vcombine.low %v95_v28, %v99_v29  ;;  %v93_v49 = vpack.c.bf16 %v92_v39, %v92_v39  ;;  %v324_v50 = vand.u32 %v2814_v41, %v3795_v2  ;;  %v108_v53 = vld [vmem:[#allocation5 + $0x70] sm:$0xff]  ;;  %v105_v56 = vld [vmem:[#allocation5 + $0x58] sm:$0xff] }
  0x49   :  { %v330_v51 = vand.u32 %v2816_v42, %v3795_v2  ;;  %v2807_v54 = vcombine.high %v112_v43, %v116_v44  ;;  %v2809_v55 = vcombine.high %v113_v47, %v117_v48  ;;  %v109_v57 = vld [vmem:[#allocation5 + $0x78] sm:$0xff]  ;;  %v2806_v58 = vcombine.low %v112_v43, %v116_v44  ;;  %v96_v60 = vld [vmem:[#allocation5 + $0x10] sm:$0xff] }
  0x4a   :  { %346 = vmatpush1.bf16.msra.mxu0 %v2802_v22  ;;  %v2808_v59 = vcombine.low %v113_v47, %v117_v48  ;;  %v100_v61 = vld [vmem:[#allocation5 + $0x30] sm:$0xff]  ;;  %v2799_v62 = vcombine.high %v104_v52, %v108_v53  ;;  %v2801_v63 = vcombine.high %v105_v56, %v109_v57  ;;  %v97_v1 = vld [vmem:[#allocation5 + $0x18] sm:$0xff]  ;;  %v2798_v3 = vcombine.low %v104_v52, %v108_v53 }
  0x4b   :  { %387 = vmatpush1.bf16.msra.mxu1 %v2804_v23  ;;  %347 = vmatprep.subr.bf16.mxu0 %v2795_v24  ;;  %v101_v2 = vld [vmem:[#allocation5 + $0x38] sm:$0xff]  ;;  %v2800_v4 = vcombine.low %v105_v56, %v109_v57  ;;  %v2791_v5 = vcombine.high %v96_v60, %v100_v61  ;;  %v2790_v7 = vcombine.low %v96_v60, %v100_v61 }
  0x4c   :  { %388 = vmatprep.subr.bf16.mxu1 %v2797_v25  ;;  %v2793_v6 = vcombine.high %v97_v1, %v101_v2  ;;  %v2792_v8 = vcombine.low %v97_v1, %v101_v2  ;;  %v3178_v9 = vld [vmem:[#allocation8 + $0xe4] ss:$16 sps:$4 sm:$0xff]   ;;  %v3176_v11 = vld [vmem:[#allocation8 + $0xe0] ss:$16 sps:$4 sm:$0xff]  }
  0x4d   :  { %v3181_v10 = vld [vmem:[#allocation8 + $0x2e4] ss:$16 sps:$4 sm:$0xff]   ;;  %v3182_v14 = vld [vmem:[#allocation8 + $0xc0] ss:$16 sps:$4 sm:$0xff]  }
  0x4e   :  { %348 = vmatpush1.bf16.msra.mxu0 %v2794_v32  ;;  %v3184_v12 = vld [vmem:[#allocation8 + $0xc4] ss:$16 sps:$4 sm:$0xff]   ;;  %v3185_v15 = vld [vmem:[#allocation8 + $0x2c0] ss:$16 sps:$4 sm:$0xff]  }
  0x4f   :  { %389 = vmatpush1.bf16.msra.mxu1 %v2796_v33  ;;  %349 = vmatprep.subr.bf16.mxu0 %v2787_v34  ;;  %v3187_v13 = vld [vmem:[#allocation8 + $0x2c4] ss:$16 sps:$4 sm:$0xff]   ;;  %v3188_v18 = vld [vmem:[#allocation8 + $0xa0] ss:$16 sps:$4 sm:$0xff]  }
  0x50   :  { %390 = vmatprep.subr.bf16.mxu1 %v2789_v35  ;;  %v3190_v16 = vld [vmem:[#allocation8 + $0xa4] ss:$16 sps:$4 sm:$0xff]   ;;  %v3191_v19 = vld [vmem:[#allocation8 + $0x2a0] ss:$16 sps:$4 sm:$0xff]  }
  0x51   :  { %v3193_v17 = vld [vmem:[#allocation8 + $0x2a4] ss:$16 sps:$4 sm:$0xff]   ;;  %v3194_v22 = vld [vmem:[#allocation8 + $0x80] ss:$16 sps:$4 sm:$0xff]  }
  0x52   :  { %350 = vmatpush1.bf16.msra.mxu0 %v2786_v38  ;;  %v3196_v20 = vld [vmem:[#allocation8 + $0x84] ss:$16 sps:$4 sm:$0xff]   ;;  %v3197_v23 = vld [vmem:[#allocation8 + $0x280] ss:$16 sps:$4 sm:$0xff]  }
  0x53   :  { %391 = vmatpush1.bf16.msra.mxu1 %v2788_v40  ;;  %425 = vmatprep.subr.bf16.mxu0 %v327_v45  ;;  %v3199_v21 = vld [vmem:[#allocation8 + $0x284] ss:$16 sps:$4 sm:$0xff]   ;;  %v3200_v26 = vld [vmem:[#allocation8 + $0x60] ss:$16 sps:$4 sm:$0xff]  }
  0x54   :  { %466 = vmatprep.subr.bf16.mxu1 %v333_v46  ;;  %v3202_v24 = vld [vmem:[#allocation8 + $0x64] ss:$16 sps:$4 sm:$0xff]   ;;  %v3203_v27 = vld [vmem:[#allocation8 + $0x260] ss:$16 sps:$4 sm:$0xff]  }
  0x55   :  { %2818 = vmatmul.mubr.msk.bf16.vlgmr.msra.gmra.mxu0 %vm304_vm1, %v93_v49  ;;  %v3205_v25 = vld [vmem:[#allocation8 + $0x264] ss:$16 sps:$4 sm:$0xff]   ;;  %v3206_v30 = vld [vmem:[#allocation8 + $0x40] ss:$16 sps:$4 sm:$0xff]  }
  0x56   :  { %2819 = vmatmul.mubr.msk.bf16.vlgmr.msra.gmra.mxu1 %vm304_vm1, %v93_v49  ;;  %426 = vmatpush1.bf16.msra.mxu0 %v324_v50  ;;  %v3208_v28 = vld [vmem:[#allocation8 + $0x44] ss:$16 sps:$4 sm:$0xff]   ;;  %v3209_v31 = vld [vmem:[#allocation8 + $0x240] ss:$16 sps:$4 sm:$0xff]  }
  0x57   :  { %467 = vmatpush1.bf16.msra.mxu1 %v330_v51  ;;  %427 = vmatprep.subr.bf16.mxu0 %v2807_v54  ;;  %v3211_v29 = vld [vmem:[#allocation8 + $0x244] ss:$16 sps:$4 sm:$0xff]   ;;  %v3212_v34 = vld [vmem:[#allocation8 + $0x20] ss:$16 sps:$4 sm:$0xff]  }
  0x58   :  { %468 = vmatprep.subr.bf16.mxu1 %v2809_v55  ;;  %449 = vmatprep.mubr.bf16.mxu0 %v3735_v0  ;;  %v3214_v32 = vld [vmem:[#allocation8 + $0x24] ss:$16 sps:$4 sm:$0xff]   ;;  %v3215_v35 = vld [vmem:[#allocation8 + $0x220] ss:$16 sps:$4 sm:$0xff]  }
  0x59   :  { %490 = vmatprep.mubr.bf16.mxu1 %v3735_v0  ;;  %v3179_v0 = vld [vmem:[#allocation8 + $0x2e0] ss:$16 sps:$4 sm:$0xff]   ;;  %v3217_v33 = vld [vmem:[#allocation8 + $0x224] ss:$16 sps:$4 sm:$0xff]  }
  0x5a   :  { %428 = vmatpush1.bf16.msra.mxu0 %v2806_v58  ;;  %v3220_v36 = vld [vmem:[#allocation8 + $0x4] ss:$16 sps:$4 sm:$0xff]   ;;  %v3218_v38 = vld [vmem:[#allocation8] ss:$16 sps:$4 sm:$0xff]  }
  0x5b   :  { %469 = vmatpush1.bf16.msra.mxu1 %v2808_v59  ;;  %429 = vmatprep.subr.bf16.mxu0 %v2799_v62  ;;  %v3223_v37 = vld [vmem:[#allocation8 + $0x204] ss:$16 sps:$4 sm:$0xff]   ;;  %v3221_v39 = vld [vmem:[#allocation8 + $0x200] ss:$16 sps:$4 sm:$0xff]  }
  0x5c   :  { %470 = vmatprep.subr.bf16.mxu1 %v2801_v63  ;;  %v3226_v40 = vld [vmem:[#allocation8 + $0x1e4] ss:$16 sps:$4 sm:$0xff]   ;;  %v3224_v42 = vld [vmem:[#allocation8 + $0x1e0] ss:$16 sps:$4 sm:$0xff]  }
  0x5d   :  { %v3229_v41 = vld [vmem:[#allocation8 + $0x3e4] ss:$16 sps:$4 sm:$0xff]   ;;  %v3227_v43 = vld [vmem:[#allocation8 + $0x3e0] ss:$16 sps:$4 sm:$0xff]  }
  0x5e   :  { %430 = vmatpush1.bf16.msra.mxu0 %v2798_v3  ;;  %v3232_v44 = vld [vmem:[#allocation8 + $0x1c4] ss:$16 sps:$4 sm:$0xff]   ;;  %v3230_v46 = vld [vmem:[#allocation8 + $0x1c0] ss:$16 sps:$4 sm:$0xff]  }
  0x5f   :  { %471 = vmatpush1.bf16.msra.mxu1 %v2800_v4  ;;  %431 = vmatprep.subr.bf16.mxu0 %v2791_v5  ;;  %v3235_v45 = vld [vmem:[#allocation8 + $0x3c4] ss:$16 sps:$4 sm:$0xff]   ;;  %v3233_v47 = vld [vmem:[#allocation8 + $0x3c0] ss:$16 sps:$4 sm:$0xff]  }
  0x60   :  { %472 = vmatprep.subr.bf16.mxu1 %v2793_v6  ;;  %v3238_v48 = vld [vmem:[#allocation8 + $0x1a4] ss:$16 sps:$4 sm:$0xff]   ;;  %v3236_v50 = vld [vmem:[#allocation8 + $0x1a0] ss:$16 sps:$4 sm:$0xff]  }
  0x61   :  { %v3239_v51 = vld [vmem:[#allocation8 + $0x3a0] ss:$16 sps:$4 sm:$0xff]   ;;  %v3244_v52 = vld [vmem:[#allocation8 + $0x184] ss:$16 sps:$4 sm:$0xff]  }
  0x62   :  { %432 = vmatpush1.bf16.msra.mxu0 %v2790_v7  ;;  %v3247_v53 = vld [vmem:[#allocation8 + $0x384] ss:$16 sps:$4 sm:$0xff]   ;;  %v3242_v54 = vld [vmem:[#allocation8 + $0x180] ss:$16 sps:$4 sm:$0xff]  }
  0x63   :  { %473 = vmatpush1.bf16.msra.mxu1 %v2792_v8  ;;  %2073 = vmatprep.subr.bf16.mxu0 %v3178_v9  ;;  %v3245_v55 = vld [vmem:[#allocation8 + $0x380] ss:$16 sps:$4 sm:$0xff]   ;;  %v3250_v56 = vld [vmem:[#allocation8 + $0x164] ss:$16 sps:$4 sm:$0xff]  }
  0x64   :  { %2114 = vmatprep.subr.bf16.mxu1 %v3181_v10  ;;  %v3253_v57 = vld [vmem:[#allocation8 + $0x364] ss:$16 sps:$4 sm:$0xff]   ;;  %v3248_v58 = vld [vmem:[#allocation8 + $0x160] ss:$16 sps:$4 sm:$0xff]  }
  0x65   :  { %2820 = vmatmul.mubr.msk.bf16.vlgmr.msra.gmra.mxu0 %vm304_vm1, %v93_v49  ;;  %v3251_v59 = vld [vmem:[#allocation8 + $0x360] ss:$16 sps:$4 sm:$0xff]   ;;  %v3256_v60 = vld [vmem:[#allocation8 + $0x144] ss:$16 sps:$4 sm:$0xff]  }
  0x66   :  { %2821 = vmatmul.mubr.msk.bf16.vlgmr.msra.gmra.mxu1 %vm304_vm1, %v93_v49  ;;  %2074 = vmatpush1.bf16.msra.mxu0 %v3176_v11  ;;  %v3241_v49 = vld [vmem:[#allocation8 + $0x3a4] ss:$16 sps:$4 sm:$0xff]   ;;  %v3254_v62 = vld [vmem:[#allocation8 + $0x140] ss:$16 sps:$4 sm:$0xff]   ;;  %v124_v11 = vlaneseq }
  0x67   :  { %2115 = vmatpush1.bf16.msra.mxu1 %v3179_v0  ;;  %2075 = vmatprep.subr.bf16.mxu0 %v3184_v12  ;;  %v3259_v61 = vld [vmem:[#allocation8 + $0x344] ss:$16 sps:$4 sm:$0xff]   ;;  %v3257_v63 = vld [vmem:[#allocation8 + $0x340] ss:$16 sps:$4 sm:$0xff]  }
  0x68   :  { %2116 = vmatprep.subr.bf16.mxu1 %v3187_v13  ;;  %v3262_v1 = vld [vmem:[#allocation8 + $0x124] ss:$16 sps:$4 sm:$0xff]   ;;  %v3260_v3 = vld [vmem:[#allocation8 + $0x120] ss:$16 sps:$4 sm:$0xff]   ;;  %v3812_v0 = vshrl.u32 %v124_v11, 7 }
  0x69   :  { %v3265_v2 = vld [vmem:[#allocation8 + $0x324] ss:$16 sps:$4 sm:$0xff]   ;;  %v3263_v4 = vld [vmem:[#allocation8 + $0x320] ss:$16 sps:$4 sm:$0xff]  }
  0x6a   :  { %2076 = vmatpush1.bf16.msra.mxu0 %v3182_v14  ;;  %v3268_v5 = vld [vmem:[#allocation8 + $0x104] ss:$16 sps:$4 sm:$0xff]   ;;  %v3266_v7 = vld [vmem:[#allocation8 + $0x100] ss:$16 sps:$4 sm:$0xff]   ;;  %v126_v12 = vsub.s32 0, %v3812_v0  ;;  %v134_v13 = vsub.s32 2, %v3812_v0 }
  0x6b   :  { %2117 = vmatpush1.bf16.msra.mxu1 %v3185_v15  ;;  %2077 = vmatprep.subr.bf16.mxu0 %v3190_v16  ;;  %v3271_v6 = vld [vmem:[#allocation8 + $0x304] ss:$16 sps:$4 sm:$0xff]   ;;  %v3269_v8 = vld [vmem:[#allocation8 + $0x300] ss:$16 sps:$4 sm:$0xff]   ;;  %v3816_v14 = vld [vmem:[#allocation7] sm:$0xff]  ;;  %v130_v15 = vsub.s32 1, %v3812_v0 }
  0x6c   :  { %2118 = vmatprep.subr.bf16.mxu1 %v3193_v17  ;;  %v3274_v9 = vld [vmem:[#allocation8 + $0x4e4] ss:$16 sps:$4 sm:$0xff]   ;;  %v138_v16 = vsub.s32 3, %v3812_v0  ;;  %v127_v17 = vrot.slane %v3816_v14, %v126_v12 }
  0x6d   :  { %v3277_v10 = vld [vmem:[#allocation8 + $0x6e4] ss:$16 sps:$4 sm:$0xff]  }
  0x6e   :  { %2078 = vmatpush1.bf16.msra.mxu0 %v3188_v18  ;;  %v135_v18 = vrot.slane %v3816_v14, %v134_v13 }
  0x6f   :  { %2119 = vmatpush1.bf16.msra.mxu1 %v3191_v19  ;;  %2079 = vmatprep.subr.bf16.mxu0 %v3196_v20  ;;  %v131_v19 = vrot.slane %v3816_v14, %v130_v15  ;;  %v139_v20 = vrot.slane %v3816_v14, %v138_v16 }
  0x70   :  { %2120 = vmatprep.subr.bf16.mxu1 %v3199_v21 }
  0x72   :  { %2080 = vmatpush1.bf16.msra.mxu0 %v3194_v22 }
  0x73   :  { %2121 = vmatpush1.bf16.msra.mxu1 %v3197_v23  ;;  %2081 = vmatprep.subr.bf16.mxu0 %v3202_v24 }
  0x74   :  { %2122 = vmatprep.subr.bf16.mxu1 %v3205_v25 }
  0x76   :  { %2082 = vmatpush1.bf16.msra.mxu0 %v3200_v26 }
  0x77   :  { %2123 = vmatpush1.bf16.msra.mxu1 %v3203_v27  ;;  %2083 = vmatprep.subr.bf16.mxu0 %v3208_v28 }
  0x78   :  { %2124 = vmatprep.subr.bf16.mxu1 %v3211_v29 }
  0x7a   :  { %2084 = vmatpush1.bf16.msra.mxu0 %v3206_v30 }
  0x7b   :  { %2125 = vmatpush1.bf16.msra.mxu1 %v3209_v31  ;;  %2085 = vmatprep.subr.bf16.mxu0 %v3214_v32 }
  0x7c   :  { %2126 = vmatprep.subr.bf16.mxu1 %v3217_v33 }
  0x7e   :  { %2086 = vmatpush1.bf16.msra.mxu0 %v3212_v34 }
  0x7f   :  { %2127 = vmatpush1.bf16.msra.mxu1 %v3215_v35  ;;  %2087 = vmatprep.subr.bf16.mxu0 %v3220_v36 }
  0x80   :  { %2128 = vmatprep.subr.bf16.mxu1 %v3223_v37 }
  0x82   :  { %2088 = vmatpush1.bf16.msra.mxu0 %v3218_v38 }
  0x83   :  { %2129 = vmatpush1.bf16.msra.mxu1 %v3221_v39  ;;  %2089 = vmatprep.subr.bf16.mxu0 %v3226_v40  ;;  %v3272_v40 = vld [vmem:[#allocation8 + $0x4e0] ss:$16 sps:$4 sm:$0xff]  }
  0x84   :  { %2130 = vmatprep.subr.bf16.mxu1 %v3229_v41  ;;  %v3275_v41 = vld [vmem:[#allocation8 + $0x6e0] ss:$16 sps:$4 sm:$0xff]  }
  0x86   :  { %2090 = vmatpush2.bf16.msra.mxu0 %v3224_v42 }
  0x87   :  { %2131 = vmatpush2.bf16.msra.mxu1 %v3227_v43  ;;  %2091 = vmatprep.subr.bf16.mxu0 %v3232_v44  ;;  %v3280_v43 = vld [vmem:[#allocation8 + $0x4c4] ss:$16 sps:$4 sm:$0xff]  }
  0x88   :  { %2132 = vmatprep.subr.bf16.mxu1 %v3235_v45  ;;  %v3283_v44 = vld [vmem:[#allocation8 + $0x6c4] ss:$16 sps:$4 sm:$0xff]   ;;  %v3278_v45 = vld [vmem:[#allocation8 + $0x4c0] ss:$16 sps:$4 sm:$0xff]  }
  0x8a   :  { %2092 = vmatpush2.bf16.msra.mxu0 %v3230_v46  ;;  %v3281_v46 = vld [vmem:[#allocation8 + $0x6c0] ss:$16 sps:$4 sm:$0xff]  }
  0x8b   :  { %2133 = vmatpush2.bf16.msra.mxu1 %v3233_v47  ;;  %2093 = vmatprep.subr.bf16.mxu0 %v3238_v48  ;;  %v146_v47 = vsub.s32 5, %v3812_v0  ;;  %v154_v48 = vsub.s32 7, %v3812_v0 }
  0x8c   :  { %2134 = vmatprep.subr.bf16.mxu1 %v3241_v49  ;;  %v3286_v49 = vld [vmem:[#allocation8 + $0x4a4] ss:$16 sps:$4 sm:$0xff]  }
  0x8e   :  { %2094 = vmatpush2.bf16.msra.mxu0 %v3236_v50  ;;  %v3289_v50 = vld [vmem:[#allocation8 + $0x6a4] ss:$16 sps:$4 sm:$0xff]  }
  0x8f   :  { %2135 = vmatpush2.bf16.msra.mxu1 %v3239_v51  ;;  %2095 = vmatprep.subr.bf16.mxu0 %v3244_v52  ;;  %v3284_v51 = vld [vmem:[#allocation8 + $0x4a0] ss:$16 sps:$4 sm:$0xff]  }
  0x90   :  { %2136 = vmatprep.subr.bf16.mxu1 %v3247_v53  ;;  %v3287_v52 = vld [vmem:[#allocation8 + $0x6a0] ss:$16 sps:$4 sm:$0xff]   ;;  %v147_v53 = vrot.slane %v3816_v14, %v146_v47 }
  0x91   :  { %v3335_v47 = vld [vmem:[#allocation8 + $0x7a0] ss:$16 sps:$4 sm:$0xff]  }
  0x92   :  { %2096 = vmatpush2.bf16.msra.mxu0 %v3242_v54  ;;  %v155_v54 = vrot.slane %v3816_v14, %v154_v48  ;;  %v3340_v48 = vld [vmem:[#allocation8 + $0x584] ss:$16 sps:$4 sm:$0xff]  }
  0x93   :  { %2137 = vmatpush2.bf16.msra.mxu1 %v3245_v55  ;;  %2097 = vmatprep.subr.bf16.mxu0 %v3250_v56  ;;  %v3292_v55 = vld [vmem:[#allocation8 + $0x484] ss:$16 sps:$4 sm:$0xff]  }
  0x94   :  { %2138 = vmatprep.subr.bf16.mxu1 %v3253_v57  ;;  %v3295_v56 = vld [vmem:[#allocation8 + $0x684] ss:$16 sps:$4 sm:$0xff]  }
  0x96   :  { %2098 = vmatpush2.bf16.msra.mxu0 %v3248_v58 }
  0x97   :  { %2139 = vmatpush2.bf16.msra.mxu1 %v3251_v59  ;;  %2099 = vmatprep.subr.bf16.mxu0 %v3256_v60 }
  0x98   :  { %2140 = vmatprep.subr.bf16.mxu1 %v3259_v61  ;;  %v3290_v61 = vld [vmem:[#allocation8 + $0x480] ss:$16 sps:$4 sm:$0xff]  }
  0x9a   :  { %2100 = vmatpush2.bf16.msra.mxu0 %v3254_v62  ;;  %v3293_v62 = vld [vmem:[#allocation8 + $0x680] ss:$16 sps:$4 sm:$0xff]  }
  0x9b   :  { %2141 = vmatpush2.bf16.msra.mxu1 %v3257_v63  ;;  %2101 = vmatprep.subr.bf16.mxu0 %v3262_v1 }
  0x9c   :  { %2142 = vmatprep.subr.bf16.mxu1 %v3265_v2  ;;  %v3298_v2 = vld [vmem:[#allocation8 + $0x464] ss:$16 sps:$4 sm:$0xff]  }
  0x9e   :  { %2102 = vmatpush2.bf16.msra.mxu0 %v3260_v3  ;;  %v3301_v3 = vld [vmem:[#allocation8 + $0x664] ss:$16 sps:$4 sm:$0xff]  }
  0x9f   :  { %2143 = vmatpush2.bf16.msra.mxu1 %v3263_v4  ;;  %2103 = vmatprep.subr.bf16.mxu0 %v3268_v5 }
  0xa0   :  { %2144 = vmatprep.subr.bf16.mxu1 %v3271_v6 }
  0xa2   :  { %2104 = vmatpush2.bf16.msra.mxu0 %v3266_v7 }
  0xa3   :  { %2145 = vmatpush2.bf16.msra.mxu1 %v3269_v8  ;;  %2155 = vmatprep.subr.bf16.mxu0 %v3274_v9 }
  0xa4   :  { %2196 = vmatprep.subr.bf16.mxu1 %v3277_v10  ;;  %v3296_v10 = vld [vmem:[#allocation8 + $0x460] ss:$16 sps:$4 sm:$0xff]  }
 0x115   :  { %v369_v21 = vpop.f32.mrf.mxu0 }
 0x116   :  { %v410_v22 = vpop.f32.mrf.mxu1  ;;  %v370_v23 = vadd.f32 %v369_v21, %v127_v17  ;;  %v3299_v17 = vld [vmem:[#allocation8 + $0x660] ss:$16 sps:$4 sm:$0xff]   ;;  %v3307_v21 = vld [vmem:[#allocation8 + $0x644] ss:$16 sps:$4 sm:$0xff]  }
 0x117   :  { %v411_v24 = vadd.f32 %v410_v22, %v135_v18  ;;  %v371_v25 = vpop.f32.mrf.mxu0  ;;  %v3302_v22 = vld [vmem:[#allocation8 + $0x440] ss:$16 sps:$4 sm:$0xff]  }
 0x118   :  { %v412_v26 = vpop.f32.mrf.mxu1  ;;  %v372_v28 = vadd.f32 %v371_v25, %v131_v19  ;;  %v499_v30 = vmax.f32 %v370_v23, 0.0  ;;  %v3305_v23 = vld [vmem:[#allocation8 + $0x640] ss:$16 sps:$4 sm:$0xff]   ;;  %v3313_v25 = vld [vmem:[#allocation8 + $0x624] ss:$16 sps:$4 sm:$0xff]  }
 0x119   :  { %v501_v27 = vmax.f32 %v411_v24, 0.0  ;;  %v413_v29 = vadd.f32 %v412_v26, %v139_v20  ;;  %v373_v31 = vpop.f32.mrf.mxu0  ;;  %v3304_v20 = vld [vmem:[#allocation8 + $0x444] ss:$16 sps:$4 sm:$0xff]   ;;  %v3308_v26 = vld [vmem:[#allocation8 + $0x420] ss:$16 sps:$4 sm:$0xff]  }
 0x11a   :  { %v414_v32 = vpop.f32.mrf.mxu1  ;;  %v500_v33 = vmax.f32 %v372_v28, 0.0  ;;  %v3838_v42 = vpack.c.bf16 %v499_v30, %v499_v30  ;;  %v3310_v24 = vld [vmem:[#allocation8 + $0x424] ss:$16 sps:$4 sm:$0xff]   ;;  %v3314_v30 = vld [vmem:[#allocation8 + $0x400] ss:$16 sps:$4 sm:$0xff]  }
 0x11b   :  { %v502_v34 = vmax.f32 %v413_v29, 0.0  ;;  %v3832_v35 = vpack.c.bf16 %v501_v27, %v501_v27  ;;  %v374_v36 = vpop.f32.mrf.mxu0  ;;  %v3311_v27 = vld [vmem:[#allocation8 + $0x620] ss:$16 sps:$4 sm:$0xff]   ;;  %v3316_v28 = vld [vmem:[#allocation8 + $0x404] ss:$16 sps:$4 sm:$0xff]  }
 0x11c   :  { %v415_v37 = vpop.f32.mrf.mxu1  ;;  %v3834_v38 = vpack.c.bf16 %v500_v33, %v500_v33  ;;  %v3319_v29 = vld [vmem:[#allocation8 + $0x604] ss:$16 sps:$4 sm:$0xff]   ;;  %v3317_v31 = vld [vmem:[#allocation8 + $0x600] ss:$16 sps:$4 sm:$0xff]  }
 0x11d   :  { %v3836_v39 = vpack.c.bf16 %v502_v34, %v502_v34  ;;  %v3322_v32 = vld [vmem:[#allocation8 + $0x5e4] ss:$16 sps:$4 sm:$0xff]   ;;  %v3320_v34 = vld [vmem:[#allocation8 + $0x5e0] ss:$16 sps:$4 sm:$0xff]  }
 0x11e   :  { %2105 = vmatprep.mubr.bf16.mxu0 %v3834_v38  ;;  %v3325_v33 = vld [vmem:[#allocation8 + $0x7e4] ss:$16 sps:$4 sm:$0xff]   ;;  %v3323_v36 = vld [vmem:[#allocation8 + $0x7e0] ss:$16 sps:$4 sm:$0xff]  }
 0x11f   :  { %2146 = vmatprep.mubr.bf16.mxu1 %v3836_v39  ;;  %2106 = vmatmul.mubr.bf16.vlgmr.msra.gmra.mxu0 %v3838_v42  ;;  %v3328_v37 = vld [vmem:[#allocation8 + $0x5c4] ss:$16 sps:$4 sm:$0xff]  }
 0x120   :  { %2147 = vmatmul.mubr.bf16.vlgmr.msra.gmra.mxu1 %v3832_v35  ;;  %2156 = vmatpush1.bf16.msra.mxu0 %v3272_v40  ;;  %v3331_v40 = vld [vmem:[#allocation8 + $0x7c4] ss:$16 sps:$4 sm:$0xff]  }
 0x121   :  { %2197 = vmatpush1.bf16.msra.mxu1 %v3275_v41  ;;  %2157 = vmatprep.subr.bf16.mxu0 %v3280_v43  ;;  %v3326_v41 = vld [vmem:[#allocation8 + $0x5c0] ss:$16 sps:$4 sm:$0xff]  }
 0x122   :  { %2198 = vmatprep.subr.bf16.mxu1 %v3283_v44  ;;  %v3329_v43 = vld [vmem:[#allocation8 + $0x7c0] ss:$16 sps:$4 sm:$0xff]   ;;  %v3334_v44 = vld [vmem:[#allocation8 + $0x5a4] ss:$16 sps:$4 sm:$0xff]  }
 0x124   :  { %2158 = vmatpush1.bf16.msra.mxu0 %v3278_v45  ;;  %v3337_v45 = vld [vmem:[#allocation8 + $0x7a4] ss:$16 sps:$4 sm:$0xff]  }
 0x125   :  { %2199 = vmatpush1.bf16.msra.mxu1 %v3281_v46  ;;  %2159 = vmatprep.subr.bf16.mxu0 %v3286_v49  ;;  %v3848_v57 = vpop.f32.mrf.mxu0  ;;  %v3332_v46 = vld [vmem:[#allocation8 + $0x5a0] ss:$16 sps:$4 sm:$0xff]   ;;  %v3343_v49 = vld [vmem:[#allocation8 + $0x784] ss:$16 sps:$4 sm:$0xff]  }
 0x126   :  { %2200 = vmatprep.subr.bf16.mxu1 %v3289_v50  ;;  %v3850_v58 = vpop.f32.mrf.mxu1  ;;  %v3338_v50 = vld [vmem:[#allocation8 + $0x580] ss:$16 sps:$4 sm:$0xff]  }
 0x127   :  { %v453_v59 = vpop.f32.mrf.mxu0 }
 0x128   :  { %v494_v60 = vpop.f32.mrf.mxu1  ;;  %2160 = vmatpush1.bf16.msra.mxu0 %v3284_v51  ;;  %v454_v63 = vadd.f32 %v453_v59, %v147_v53  ;;  %v3341_v51 = vld [vmem:[#allocation8 + $0x780] ss:$16 sps:$4 sm:$0xff]   ;;  %v3349_v53 = vld [vmem:[#allocation8 + $0x764] ss:$16 sps:$4 sm:$0xff]   ;;  %v142_v59 = vsub.s32 4, %v3812_v0 }
 0x129   :  { %2201 = vmatpush1.bf16.msra.mxu1 %v3287_v52  ;;  %v495_v1 = vadd.f32 %v494_v60, %v155_v54  ;;  %2161 = vmatprep.subr.bf16.mxu0 %v3292_v55  ;;  %v455_v4 = vpop.f32.mrf.mxu0  ;;  %v3346_v52 = vld [vmem:[#allocation8 + $0x564] ss:$16 sps:$4 sm:$0xff]   ;;  %v150_v54 = vsub.s32 6, %v3812_v0  ;;  %v3344_v55 = vld [vmem:[#allocation8 + $0x560] ss:$16 sps:$4 sm:$0xff]  }
 0x12a   :  { %2202 = vmatprep.subr.bf16.mxu1 %v3295_v56  ;;  %v496_v5 = vpop.f32.mrf.mxu1  ;;  %v504_v6 = vmax.f32 %v454_v63, 0.0  ;;  %v3347_v56 = vld [vmem:[#allocation8 + $0x760] ss:$16 sps:$4 sm:$0xff]   ;;  %v3352_v60 = vld [vmem:[#allocation8 + $0x544] ss:$16 sps:$4 sm:$0xff]  }
 0x12b   :  { %v506_v7 = vmax.f32 %v495_v1, 0.0  ;;  %v456_v8 = vpop.f32.mrf.mxu0  ;;  %v3350_v63 = vld [vmem:[#allocation8 + $0x540] ss:$16 sps:$4 sm:$0xff]   ;;  %v3361_v4 = vld [vmem:[#allocation8 + $0x724] ss:$16 sps:$4 sm:$0xff]  }
 0x12c   :  { %v497_v9 = vpop.f32.mrf.mxu1  ;;  %2162 = vmatpush1.bf16.msra.mxu0 %v3290_v61  ;;  %v3852_v18 = vpack.c.bf16 %v504_v6, %v504_v6  ;;  %v3355_v61 = vld [vmem:[#allocation8 + $0x744] ss:$16 sps:$4 sm:$0xff]   ;;  %v3353_v1 = vld [vmem:[#allocation8 + $0x740] ss:$16 sps:$4 sm:$0xff]  }
 0x12d   :  { %2203 = vmatpush1.bf16.msra.mxu1 %v3293_v62  ;;  %v3854_v19 = vpack.c.bf16 %v506_v7, %v506_v7  ;;  %2163 = vmatprep.subr.bf16.mxu0 %v3298_v2  ;;  %v151_v62 = vrot.slane %v3816_v14, %v150_v54  ;;  %v143_v2 = vrot.slane %v3816_v14, %v142_v59  ;;  %v3356_v6 = vld [vmem:[#allocation8 + $0x520] ss:$16 sps:$4 sm:$0xff]   ;;  %v3364_v9 = vld [vmem:[#allocation8 + $0x504] ss:$16 sps:$4 sm:$0xff]   ;;  %v3410_v54 = vld [vmem:[#allocation8 + $0x8] ss:$16 sps:$4 sm:$0xff]  }
 0x12e   :  { %2204 = vmatprep.subr.bf16.mxu1 %v3301_v3  ;;  %2187 = vmatprep.mubr.bf16.mxu0 %v3852_v18  ;;  %v3358_v3 = vld [vmem:[#allocation8 + $0x524] ss:$16 sps:$4 sm:$0xff]   ;;  %v3359_v7 = vld [vmem:[#allocation8 + $0x720] ss:$16 sps:$4 sm:$0xff]   ;;  %v3421_v59 = vld [vmem:[#allocation8 + $0x3ec] ss:$16 sps:$4 sm:$0xff]  }
 0x12f   :  { %2228 = vmatprep.mubr.bf16.mxu1 %v3854_v19  ;;  %v493_v5 = vadd.f32 %v3850_v58, %v151_v62  ;;  %v452_v8 = vadd.f32 %v3848_v57, %v143_v2  ;;  %v3362_v14 = vld [vmem:[#allocation8 + $0x500] ss:$16 sps:$4 sm:$0xff]   ;;  %v3373_v58 = vld [vmem:[#allocation8 + $0x2ec] ss:$16 sps:$4 sm:$0xff]   ;;  %v3425_v2 = vld [vmem:[#allocation8 + $0x3c8] ss:$16 sps:$4 sm:$0xff]  }
 0x130   :  { %2164 = vmatpush1.bf16.msra.mxu0 %v3296_v10  ;;  %v3367_v10 = vld [vmem:[#allocation8 + $0x704] ss:$16 sps:$4 sm:$0xff]   ;;  %v3424_v62 = vld [vmem:[#allocation8 + $0x1cc] ss:$16 sps:$4 sm:$0xff]  }
 0x131   :  { %2205 = vmatpush1.bf16.msra.mxu1 %v3299_v17  ;;  %2165 = vmatprep.subr.bf16.mxu0 %v3304_v20  ;;  %v505_v17 = vmax.f32 %v493_v5, 0.0  ;;  %v3365_v20 = vld [vmem:[#allocation8 + $0x700] ss:$16 sps:$4 sm:$0xff]   ;;  %v3428_v5 = vld [vmem:[#allocation8 + $0x1a8] ss:$16 sps:$4 sm:$0xff]  }
 0x132   :  { %2206 = vmatprep.subr.bf16.mxu1 %v3307_v21  ;;  %v503_v21 = vmax.f32 %v452_v8, 0.0  ;;  %v3439_v8 = vld [vmem:[#allocation8 + $0x38c] ss:$16 sps:$4 sm:$0xff]  }
 0x134   :  { %2166 = vmatpush1.bf16.msra.mxu0 %v3302_v22  ;;  %v3370_v22 = vld [vmem:[#allocation8 + $0xec] ss:$16 sps:$4 sm:$0xff]   ;;  %v3866_v57 = vpack.c.bf16 %v503_v21, %v503_v21  ;;  %v3443_v21 = vld [vmem:[#allocation8 + $0x368] ss:$16 sps:$4 sm:$0xff]  }
 0x135   :  { %2207 = vmatpush1.bf16.msra.mxu1 %v3305_v23  ;;  %2167 = vmatprep.subr.bf16.mxu0 %v3310_v24  ;;  %v3864_v23 = vpack.c.bf16 %v505_v17, %v505_v17  ;;  %v3368_v24 = vld [vmem:[#allocation8 + $0xe8] ss:$16 sps:$4 sm:$0xff]   ;;  %v3442_v17 = vld [vmem:[#allocation8 + $0x16c] ss:$16 sps:$4 sm:$0xff]  }
 0x136   :  { %2208 = vmatprep.subr.bf16.mxu1 %v3313_v25  ;;  %v3371_v25 = vld [vmem:[#allocation8 + $0x2e8] ss:$16 sps:$4 sm:$0xff]  }
 0x138   :  { %2168 = vmatpush1.bf16.msra.mxu0 %v3308_v26  ;;  %v3376_v26 = vld [vmem:[#allocation8 + $0xcc] ss:$16 sps:$4 sm:$0xff]  }
 0x139   :  { %2209 = vmatpush1.bf16.msra.mxu1 %v3311_v27  ;;  %2169 = vmatprep.subr.bf16.mxu0 %v3316_v28  ;;  %v3379_v27 = vld [vmem:[#allocation8 + $0x2cc] ss:$16 sps:$4 sm:$0xff]   ;;  %v3374_v28 = vld [vmem:[#allocation8 + $0xc8] ss:$16 sps:$4 sm:$0xff]  }
 0x13a   :  { %2210 = vmatprep.subr.bf16.mxu1 %v3319_v29  ;;  %v3377_v29 = vld [vmem:[#allocation8 + $0x2c8] ss:$16 sps:$4 sm:$0xff]  }
 0x13c   :  { %2170 = vmatpush1.bf16.msra.mxu0 %v3314_v30  ;;  %v3382_v30 = vld [vmem:[#allocation8 + $0xac] ss:$16 sps:$4 sm:$0xff]  }
 0x13d   :  { %2211 = vmatpush1.bf16.msra.mxu1 %v3317_v31  ;;  %2171 = vmatprep.subr.bf16.mxu0 %v3322_v32  ;;  %v3385_v31 = vld [vmem:[#allocation8 + $0x2ac] ss:$16 sps:$4 sm:$0xff]   ;;  %v3380_v32 = vld [vmem:[#allocation8 + $0xa8] ss:$16 sps:$4 sm:$0xff]  }
 0x13e   :  { %2212 = vmatprep.subr.bf16.mxu1 %v3325_v33  ;;  %v3383_v33 = vld [vmem:[#allocation8 + $0x2a8] ss:$16 sps:$4 sm:$0xff]  }
 0x140   :  { %2172 = vmatpush2.bf16.msra.mxu0 %v3320_v34  ;;  %v3388_v34 = vld [vmem:[#allocation8 + $0x8c] ss:$16 sps:$4 sm:$0xff]  }
 0x141   :  { %2213 = vmatpush2.bf16.msra.mxu1 %v3323_v36  ;;  %2173 = vmatprep.subr.bf16.mxu0 %v3328_v37  ;;  %v3391_v36 = vld [vmem:[#allocation8 + $0x28c] ss:$16 sps:$4 sm:$0xff]   ;;  %v3386_v37 = vld [vmem:[#allocation8 + $0x88] ss:$16 sps:$4 sm:$0xff]  }
 0x142   :  { %2214 = vmatprep.subr.bf16.mxu1 %v3331_v40  ;;  %v3394_v40 = vld [vmem:[#allocation8 + $0x6c] ss:$16 sps:$4 sm:$0xff]  }
 0x144   :  { %2174 = vmatpush2.bf16.msra.mxu0 %v3326_v41  ;;  %v3392_v41 = vld [vmem:[#allocation8 + $0x68] ss:$16 sps:$4 sm:$0xff]  }
 0x145   :  { %2215 = vmatpush2.bf16.msra.mxu1 %v3329_v43  ;;  %2175 = vmatprep.subr.bf16.mxu0 %v3334_v44  ;;  %v3395_v43 = vld [vmem:[#allocation8 + $0x268] ss:$16 sps:$4 sm:$0xff]   ;;  %v3400_v44 = vld [vmem:[#allocation8 + $0x4c] ss:$16 sps:$4 sm:$0xff]  }
 0x146   :  { %2216 = vmatprep.subr.bf16.mxu1 %v3337_v45  ;;  %v3403_v45 = vld [vmem:[#allocation8 + $0x24c] ss:$16 sps:$4 sm:$0xff]  }
 0x148   :  { %2176 = vmatpush2.bf16.msra.mxu0 %v3332_v46  ;;  %v3398_v46 = vld [vmem:[#allocation8 + $0x48] ss:$16 sps:$4 sm:$0xff]  }
 0x149   :  { %2217 = vmatpush2.bf16.msra.mxu1 %v3335_v47  ;;  %2177 = vmatprep.subr.bf16.mxu0 %v3340_v48  ;;  %v3401_v47 = vld [vmem:[#allocation8 + $0x248] ss:$16 sps:$4 sm:$0xff]   ;;  %v3406_v48 = vld [vmem:[#allocation8 + $0x2c] ss:$16 sps:$4 sm:$0xff]  }
 0x14a   :  { %2218 = vmatprep.subr.bf16.mxu1 %v3343_v49  ;;  %v3409_v49 = vld [vmem:[#allocation8 + $0x22c] ss:$16 sps:$4 sm:$0xff]  }
 0x14c   :  { %2178 = vmatpush2.bf16.msra.mxu0 %v3338_v50  ;;  %v3404_v50 = vld [vmem:[#allocation8 + $0x28] ss:$16 sps:$4 sm:$0xff]  }
 0x14d   :  { %2219 = vmatpush2.bf16.msra.mxu1 %v3341_v51  ;;  %2179 = vmatprep.subr.bf16.mxu0 %v3346_v52  ;;  %v3407_v51 = vld [vmem:[#allocation8 + $0x228] ss:$16 sps:$4 sm:$0xff]   ;;  %v3412_v52 = vld [vmem:[#allocation8 + $0xc] ss:$16 sps:$4 sm:$0xff]  }
 0x14e   :  { %2220 = vmatprep.subr.bf16.mxu1 %v3349_v53  ;;  %v3415_v53 = vld [vmem:[#allocation8 + $0x20c] ss:$16 sps:$4 sm:$0xff]  }
 0x150   :  { %2180 = vmatpush2.bf16.msra.mxu0 %v3344_v55  ;;  %v3413_v55 = vld [vmem:[#allocation8 + $0x208] ss:$16 sps:$4 sm:$0xff]  }
 0x151   :  { %2221 = vmatpush2.bf16.msra.mxu1 %v3347_v56  ;;  %2181 = vmatprep.subr.bf16.mxu0 %v3352_v60  ;;  %v3418_v56 = vld [vmem:[#allocation8 + $0x1ec] ss:$16 sps:$4 sm:$0xff]   ;;  %v3416_v60 = vld [vmem:[#allocation8 + $0x1e8] ss:$16 sps:$4 sm:$0xff]  }
 0x152   :  { %2222 = vmatprep.subr.bf16.mxu1 %v3355_v61  ;;  %v3419_v61 = vld [vmem:[#allocation8 + $0x3e8] ss:$16 sps:$4 sm:$0xff]  }
 0x154   :  { %2182 = vmatpush2.bf16.msra.mxu0 %v3350_v63  ;;  %v3427_v63 = vld [vmem:[#allocation8 + $0x3cc] ss:$16 sps:$4 sm:$0xff]  }
 0x155   :  { %2223 = vmatpush2.bf16.msra.mxu1 %v3353_v1  ;;  %2183 = vmatprep.subr.bf16.mxu0 %v3358_v3  ;;  %v3422_v1 = vld [vmem:[#allocation8 + $0x1c8] ss:$16 sps:$4 sm:$0xff]   ;;  %v3430_v3 = vld [vmem:[#allocation8 + $0x1ac] ss:$16 sps:$4 sm:$0xff]  }
 0x156   :  { %2224 = vmatprep.subr.bf16.mxu1 %v3361_v4  ;;  %v3433_v4 = vld [vmem:[#allocation8 + $0x3ac] ss:$16 sps:$4 sm:$0xff]  }
 0x158   :  { %2184 = vmatpush2.bf16.msra.mxu0 %v3356_v6  ;;  %v3431_v6 = vld [vmem:[#allocation8 + $0x3a8] ss:$16 sps:$4 sm:$0xff]  }
 0x159   :  { %2225 = vmatpush2.bf16.msra.mxu1 %v3359_v7  ;;  %2185 = vmatprep.subr.bf16.mxu0 %v3364_v9  ;;  %v3436_v7 = vld [vmem:[#allocation8 + $0x18c] ss:$16 sps:$4 sm:$0xff]   ;;  %v3434_v9 = vld [vmem:[#allocation8 + $0x188] ss:$16 sps:$4 sm:$0xff]  }
 0x15a   :  { %2226 = vmatprep.subr.bf16.mxu1 %v3367_v10  ;;  %v3437_v10 = vld [vmem:[#allocation8 + $0x388] ss:$16 sps:$4 sm:$0xff]  }
 0x15c   :  { %2186 = vmatpush2.bf16.msra.mxu0 %v3362_v14  ;;  %v3445_v14 = vld [vmem:[#allocation8 + $0x36c] ss:$16 sps:$4 sm:$0xff]  }
 0x15d   :  { %2227 = vmatpush2.bf16.msra.mxu1 %v3365_v20  ;;  %2237 = vmatprep.subr.bf16.mxu0 %v3370_v22  ;;  %v3440_v20 = vld [vmem:[#allocation8 + $0x168] ss:$16 sps:$4 sm:$0xff]   ;;  %v3448_v22 = vld [vmem:[#allocation8 + $0x14c] ss:$16 sps:$4 sm:$0xff]  }
 0x15e   :  { %2278 = vmatprep.subr.bf16.mxu1 %v3373_v58  ;;  %v3451_v58 = vld [vmem:[#allocation8 + $0x34c] ss:$16 sps:$4 sm:$0xff]  }
 0x15f   :  { %2188 = vmatmul.mubr.bf16.vlgmr.msra.gmra.mxu0 %v3866_v57 }
 0x160   :  { %2229 = vmatmul.mubr.bf16.vlgmr.msra.gmra.mxu1 %v3864_v23  ;;  %2238 = vmatpush1.bf16.msra.mxu0 %v3368_v24  ;;  %v3446_v24 = vld [vmem:[#allocation8 + $0x148] ss:$16 sps:$4 sm:$0xff]  }
 0x161   :  { %2269 = vmatprep.mubr.bf16.mxu0 %v3834_v38  ;;  %2279 = vmatpush1.bf16.msra.mxu1 %v3371_v25  ;;  %v3389_v38 = vld [vmem:[#allocation8 + $0x288] ss:$16 sps:$4 sm:$0xff]  }
 0x162   :  { %2310 = vmatprep.mubr.bf16.mxu1 %v3836_v39  ;;  %2239 = vmatprep.subr.bf16.mxu0 %v3376_v26  ;;  %v3397_v39 = vld [vmem:[#allocation8 + $0x26c] ss:$16 sps:$4 sm:$0xff]   ;;  %v3449_v25 = vld [vmem:[#allocation8 + $0x348] ss:$16 sps:$4 sm:$0xff]  }
 0x163   :  { %2280 = vmatprep.subr.bf16.mxu1 %v3379_v27  ;;  %v3454_v26 = vld [vmem:[#allocation8 + $0x12c] ss:$16 sps:$4 sm:$0xff]  }
 0x164   :  { %2240 = vmatpush1.bf16.msra.mxu0 %v3374_v28  ;;  %v3457_v27 = vld [vmem:[#allocation8 + $0x32c] ss:$16 sps:$4 sm:$0xff]   ;;  %v3452_v28 = vld [vmem:[#allocation8 + $0x128] ss:$16 sps:$4 sm:$0xff]  }
 0x165   :  { %2281 = vmatpush1.bf16.msra.mxu1 %v3377_v29  ;;  %2241 = vmatprep.subr.bf16.mxu0 %v3382_v30  ;;  %v3455_v29 = vld [vmem:[#allocation8 + $0x328] ss:$16 sps:$4 sm:$0xff]   ;;  %v3460_v30 = vld [vmem:[#allocation8 + $0x10c] ss:$16 sps:$4 sm:$0xff]  }
 0x166   :  { %2282 = vmatprep.subr.bf16.mxu1 %v3385_v31  ;;  %v3463_v31 = vld [vmem:[#allocation8 + $0x30c] ss:$16 sps:$4 sm:$0xff]  }
 0x168   :  { %2242 = vmatpush1.bf16.msra.mxu0 %v3380_v32  ;;  %v3458_v32 = vld [vmem:[#allocation8 + $0x108] ss:$16 sps:$4 sm:$0xff]  }
 0x169   :  { %2283 = vmatpush1.bf16.msra.mxu1 %v3383_v33  ;;  %2243 = vmatprep.subr.bf16.mxu0 %v3388_v34  ;;  %v3461_v33 = vld [vmem:[#allocation8 + $0x308] ss:$16 sps:$4 sm:$0xff]   ;;  %v3466_v34 = vld [vmem:[#allocation8 + $0x4ec] ss:$16 sps:$4 sm:$0xff]  }
 0x16a   :  { %2284 = vmatprep.subr.bf16.mxu1 %v3391_v36  ;;  %v3469_v36 = vld [vmem:[#allocation8 + $0x6ec] ss:$16 sps:$4 sm:$0xff]  }
 0x16c   :  { %2244 = vmatpush1.bf16.msra.mxu0 %v3386_v37  ;;  %v3464_v37 = vld [vmem:[#allocation8 + $0x4e8] ss:$16 sps:$4 sm:$0xff]  }
 0x16d   :  { %2285 = vmatpush1.bf16.msra.mxu1 %v3389_v38  ;;  %2245 = vmatprep.subr.bf16.mxu0 %v3394_v40  ;;  %v3467_v38 = vld [vmem:[#allocation8 + $0x6e8] ss:$16 sps:$4 sm:$0xff]   ;;  %v3472_v40 = vld [vmem:[#allocation8 + $0x4cc] ss:$16 sps:$4 sm:$0xff]  }
 0x16e   :  { %2286 = vmatprep.subr.bf16.mxu1 %v3397_v39  ;;  %v3475_v39 = vld [vmem:[#allocation8 + $0x6cc] ss:$16 sps:$4 sm:$0xff]  }
 0x170   :  { %2246 = vmatpush1.bf16.msra.mxu0 %v3392_v41  ;;  %v3470_v41 = vld [vmem:[#allocation8 + $0x4c8] ss:$16 sps:$4 sm:$0xff]  }
 0x171   :  { %2287 = vmatpush1.bf16.msra.mxu1 %v3395_v43  ;;  %2247 = vmatprep.subr.bf16.mxu0 %v3400_v44  ;;  %v3473_v43 = vld [vmem:[#allocation8 + $0x6c8] ss:$16 sps:$4 sm:$0xff]   ;;  %v3478_v44 = vld [vmem:[#allocation8 + $0x4ac] ss:$16 sps:$4 sm:$0xff]  }
 0x172   :  { %2288 = vmatprep.subr.bf16.mxu1 %v3403_v45  ;;  %v3481_v45 = vld [vmem:[#allocation8 + $0x6ac] ss:$16 sps:$4 sm:$0xff]  }
 0x174   :  { %2248 = vmatpush1.bf16.msra.mxu0 %v3398_v46  ;;  %v3476_v46 = vld [vmem:[#allocation8 + $0x4a8] ss:$16 sps:$4 sm:$0xff]  }
 0x175   :  { %2289 = vmatpush1.bf16.msra.mxu1 %v3401_v47  ;;  %2249 = vmatprep.subr.bf16.mxu0 %v3406_v48  ;;  %v3484_v47 = vld [vmem:[#allocation8 + $0x48c] ss:$16 sps:$4 sm:$0xff]   ;;  %v3482_v48 = vld [vmem:[#allocation8 + $0x488] ss:$16 sps:$4 sm:$0xff]  }
 0x176   :  { %2290 = vmatprep.subr.bf16.mxu1 %v3409_v49  ;;  %v3490_v49 = vld [vmem:[#allocation8 + $0x46c] ss:$16 sps:$4 sm:$0xff]  }
 0x178   :  { %2250 = vmatpush1.bf16.msra.mxu0 %v3404_v50  ;;  %v3493_v50 = vld [vmem:[#allocation8 + $0x66c] ss:$16 sps:$4 sm:$0xff]  }
 0x179   :  { %2291 = vmatpush1.bf16.msra.mxu1 %v3407_v51  ;;  %2251 = vmatprep.subr.bf16.mxu0 %v3412_v52  ;;  %v3491_v51 = vld [vmem:[#allocation8 + $0x668] ss:$16 sps:$4 sm:$0xff]   ;;  %v3496_v52 = vld [vmem:[#allocation8 + $0x44c] ss:$16 sps:$4 sm:$0xff]  }
 0x17a   :  { %2292 = vmatprep.subr.bf16.mxu1 %v3415_v53  ;;  %v3499_v53 = vld [vmem:[#allocation8 + $0x64c] ss:$16 sps:$4 sm:$0xff]  }
 0x17c   :  { %2252 = vmatpush1.bf16.msra.mxu0 %v3410_v54  ;;  %v3494_v54 = vld [vmem:[#allocation8 + $0x448] ss:$16 sps:$4 sm:$0xff]  }
 0x17d   :  { %2293 = vmatpush1.bf16.msra.mxu1 %v3413_v55  ;;  %2253 = vmatprep.subr.bf16.mxu0 %v3418_v56  ;;  %v3497_v55 = vld [vmem:[#allocation8 + $0x648] ss:$16 sps:$4 sm:$0xff]   ;;  %v3502_v56 = vld [vmem:[#allocation8 + $0x42c] ss:$16 sps:$4 sm:$0xff]  }
 0x17e   :  { %2294 = vmatprep.subr.bf16.mxu1 %v3421_v59  ;;  %v3505_v59 = vld [vmem:[#allocation8 + $0x62c] ss:$16 sps:$4 sm:$0xff]  }
 0x180   :  { %2254 = vmatpush2.bf16.msra.mxu0 %v3416_v60  ;;  %v3500_v60 = vld [vmem:[#allocation8 + $0x428] ss:$16 sps:$4 sm:$0xff]  }
 0x181   :  { %2295 = vmatpush2.bf16.msra.mxu1 %v3419_v61  ;;  %2255 = vmatprep.subr.bf16.mxu0 %v3424_v62  ;;  %v3503_v61 = vld [vmem:[#allocation8 + $0x628] ss:$16 sps:$4 sm:$0xff]   ;;  %v3508_v62 = vld [vmem:[#allocation8 + $0x40c] ss:$16 sps:$4 sm:$0xff]  }
 0x182   :  { %2296 = vmatprep.subr.bf16.mxu1 %v3427_v63  ;;  %v3511_v63 = vld [vmem:[#allocation8 + $0x60c] ss:$16 sps:$4 sm:$0xff]  }
 0x184   :  { %2256 = vmatpush2.bf16.msra.mxu0 %v3422_v1  ;;  %v3506_v1 = vld [vmem:[#allocation8 + $0x408] ss:$16 sps:$4 sm:$0xff]  }
 0x185   :  { %2297 = vmatpush2.bf16.msra.mxu1 %v3425_v2  ;;  %2257 = vmatprep.subr.bf16.mxu0 %v3430_v3  ;;  %v3509_v2 = vld [vmem:[#allocation8 + $0x608] ss:$16 sps:$4 sm:$0xff]   ;;  %v3514_v3 = vld [vmem:[#allocation8 + $0x5ec] ss:$16 sps:$4 sm:$0xff]  }
 0x186   :  { %2298 = vmatprep.subr.bf16.mxu1 %v3433_v4  ;;  %v3517_v4 = vld [vmem:[#allocation8 + $0x7ec] ss:$16 sps:$4 sm:$0xff]  }
 0x188   :  { %2258 = vmatpush2.bf16.msra.mxu0 %v3428_v5  ;;  %v3512_v5 = vld [vmem:[#allocation8 + $0x5e8] ss:$16 sps:$4 sm:$0xff]  }
 0x189   :  { %2299 = vmatpush2.bf16.msra.mxu1 %v3431_v6  ;;  %2259 = vmatprep.subr.bf16.mxu0 %v3436_v7  ;;  %v3515_v6 = vld [vmem:[#allocation8 + $0x7e8] ss:$16 sps:$4 sm:$0xff]   ;;  %v3520_v7 = vld [vmem:[#allocation8 + $0x5cc] ss:$16 sps:$4 sm:$0xff]  }
 0x18a   :  { %2300 = vmatprep.subr.bf16.mxu1 %v3439_v8  ;;  %v3523_v8 = vld [vmem:[#allocation8 + $0x7cc] ss:$16 sps:$4 sm:$0xff]  }
 0x18c   :  { %2260 = vmatpush2.bf16.msra.mxu0 %v3434_v9  ;;  %v3518_v9 = vld [vmem:[#allocation8 + $0x5c8] ss:$16 sps:$4 sm:$0xff]  }
 0x18d   :  { %2301 = vmatpush2.bf16.msra.mxu1 %v3437_v10  ;;  %2261 = vmatprep.subr.bf16.mxu0 %v3442_v17  ;;  %v3521_v10 = vld [vmem:[#allocation8 + $0x7c8] ss:$16 sps:$4 sm:$0xff]   ;;  %v3526_v17 = vld [vmem:[#allocation8 + $0x5ac] ss:$16 sps:$4 sm:$0xff]  }
 0x18e   :  { %2302 = vmatprep.subr.bf16.mxu1 %v3445_v14  ;;  %v3529_v14 = vld [vmem:[#allocation8 + $0x7ac] ss:$16 sps:$4 sm:$0xff]  }
 0x190   :  { %2262 = vmatpush2.bf16.msra.mxu0 %v3440_v20  ;;  %v3524_v20 = vld [vmem:[#allocation8 + $0x5a8] ss:$16 sps:$4 sm:$0xff]  }
 0x191   :  { %2303 = vmatpush2.bf16.msra.mxu1 %v3443_v21  ;;  %2263 = vmatprep.subr.bf16.mxu0 %v3448_v22  ;;  %v3527_v21 = vld [vmem:[#allocation8 + $0x7a8] ss:$16 sps:$4 sm:$0xff]   ;;  %v3532_v22 = vld [vmem:[#allocation8 + $0x58c] ss:$16 sps:$4 sm:$0xff]  }
 0x192   :  { %2304 = vmatprep.subr.bf16.mxu1 %v3451_v58  ;;  %v3535_v58 = vld [vmem:[#allocation8 + $0x78c] ss:$16 sps:$4 sm:$0xff]  }
 0x194   :  { %2264 = vmatpush2.bf16.msra.mxu0 %v3446_v24  ;;  %v3530_v24 = vld [vmem:[#allocation8 + $0x588] ss:$16 sps:$4 sm:$0xff]  }
 0x195   :  { %2305 = vmatpush2.bf16.msra.mxu1 %v3449_v25  ;;  %2265 = vmatprep.subr.bf16.mxu0 %v3454_v26  ;;  %v3533_v25 = vld [vmem:[#allocation8 + $0x788] ss:$16 sps:$4 sm:$0xff]   ;;  %v3538_v26 = vld [vmem:[#allocation8 + $0x56c] ss:$16 sps:$4 sm:$0xff]  }
 0x196   :  { %2306 = vmatprep.subr.bf16.mxu1 %v3457_v27  ;;  %v3541_v27 = vld [vmem:[#allocation8 + $0x76c] ss:$16 sps:$4 sm:$0xff]  }
 0x198   :  { %2266 = vmatpush2.bf16.msra.mxu0 %v3452_v28  ;;  %v3536_v28 = vld [vmem:[#allocation8 + $0x568] ss:$16 sps:$4 sm:$0xff]  }
 0x199   :  { %2307 = vmatpush2.bf16.msra.mxu1 %v3455_v29  ;;  %2267 = vmatprep.subr.bf16.mxu0 %v3460_v30  ;;  %v3539_v29 = vld [vmem:[#allocation8 + $0x768] ss:$16 sps:$4 sm:$0xff]   ;;  %v3544_v30 = vld [vmem:[#allocation8 + $0x54c] ss:$16 sps:$4 sm:$0xff]  }
 0x19a   :  { %2308 = vmatprep.subr.bf16.mxu1 %v3463_v31  ;;  %v3547_v31 = vld [vmem:[#allocation8 + $0x74c] ss:$16 sps:$4 sm:$0xff]  }
 0x19c   :  { %2268 = vmatpush2.bf16.msra.mxu0 %v3458_v32  ;;  %v3542_v32 = vld [vmem:[#allocation8 + $0x548] ss:$16 sps:$4 sm:$0xff]  }
 0x19d   :  { %2309 = vmatpush2.bf16.msra.mxu1 %v3461_v33  ;;  %2319 = vmatprep.subr.bf16.mxu0 %v3466_v34  ;;  %v3545_v33 = vld [vmem:[#allocation8 + $0x748] ss:$16 sps:$4 sm:$0xff]   ;;  %v3550_v34 = vld [vmem:[#allocation8 + $0x52c] ss:$16 sps:$4 sm:$0xff]  }
 0x19e   :  { %2360 = vmatprep.subr.bf16.mxu1 %v3469_v36  ;;  %v3553_v36 = vld [vmem:[#allocation8 + $0x72c] ss:$16 sps:$4 sm:$0xff]  }
 0x19f   :  { %2270 = vmatmul.mubr.bf16.vlgmr.msra.gmra.mxu0 %v3838_v42  ;;  %v3479_v42 = vld [vmem:[#allocation8 + $0x6a8] ss:$16 sps:$4 sm:$0xff]  }
 0x1a0   :  { %2311 = vmatmul.mubr.bf16.vlgmr.msra.gmra.mxu1 %v3832_v35  ;;  %2320 = vmatpush1.bf16.msra.mxu0 %v3464_v37  ;;  %v3487_v35 = vld [vmem:[#allocation8 + $0x68c] ss:$16 sps:$4 sm:$0xff]   ;;  %v3548_v37 = vld [vmem:[#allocation8 + $0x528] ss:$16 sps:$4 sm:$0xff]  }
 0x1a1   :  { %2351 = vmatprep.mubr.bf16.mxu0 %v3852_v18  ;;  %2361 = vmatpush1.bf16.msra.mxu1 %v3467_v38  ;;  %v3485_v18 = vld [vmem:[#allocation8 + $0x688] ss:$16 sps:$4 sm:$0xff]  }
 0x1a2   :  { %2392 = vmatprep.mubr.bf16.mxu1 %v3854_v19  ;;  %2321 = vmatprep.subr.bf16.mxu0 %v3472_v40  ;;  %v3488_v19 = vld [vmem:[#allocation8 + $0x468] ss:$16 sps:$4 sm:$0xff]   ;;  %v3556_v40 = vld [vmem:[#allocation8 + $0x50c] ss:$16 sps:$4 sm:$0xff]  }
 0x1a3   :  { %2362 = vmatprep.subr.bf16.mxu1 %v3475_v39  ;;  %v3551_v38 = vld [vmem:[#allocation8 + $0x728] ss:$16 sps:$4 sm:$0xff]   ;;  %v3559_v39 = vld [vmem:[#allocation8 + $0x70c] ss:$16 sps:$4 sm:$0xff]  }
 0x1a4   :  { %2322 = vmatpush1.bf16.msra.mxu0 %v3470_v41  ;;  %v3554_v41 = vld [vmem:[#allocation8 + $0x508] ss:$16 sps:$4 sm:$0xff]  }
 0x1a5   :  { %2363 = vmatpush1.bf16.msra.mxu1 %v3473_v43  ;;  %2323 = vmatprep.subr.bf16.mxu0 %v3478_v44  ;;  %v3557_v43 = vld [vmem:[#allocation8 + $0x708] ss:$16 sps:$4 sm:$0xff]  }
 0x1a6   :  { %2364 = vmatprep.subr.bf16.mxu1 %v3481_v45  ;;  %v3560_v44 = vld [vmem:[#allocation10 + $0x78] sm:$0xff]  }
 0x1a7   :  { %v3561_v45 = vld [vmem:[#allocation10 + $0x38] sm:$0xff]  }
 0x1a8   :  { %2324 = vmatpush1.bf16.msra.mxu0 %v3476_v46  ;;  %v3562_v46 = vld [vmem:[#allocation10 + $0x70] sm:$0xff]  }
 0x1a9   :  { %2365 = vmatpush1.bf16.msra.mxu1 %v3479_v42  ;;  %2325 = vmatprep.subr.bf16.mxu0 %v3484_v47 }
 0x1aa   :  { %2366 = vmatprep.subr.bf16.mxu1 %v3487_v35  ;;  %v3563_v35 = vld [vmem:[#allocation10 + $0x30] sm:$0xff]  }
 0x1ac   :  { %2326 = vmatpush1.bf16.msra.mxu0 %v3482_v48 }
 0x1ad   :  { %2367 = vmatpush1.bf16.msra.mxu1 %v3485_v18  ;;  %2327 = vmatprep.subr.bf16.mxu0 %v3490_v49  ;;  %v3564_v49 = vld [vmem:[#allocation10 + $0x68] sm:$0xff]  }
 0x1ae   :  { %2368 = vmatprep.subr.bf16.mxu1 %v3493_v50 }
 0x1b0   :  { %2328 = vmatpush1.bf16.msra.mxu0 %v3488_v19 }
 0x1b1   :  { %2369 = vmatpush1.bf16.msra.mxu1 %v3491_v51  ;;  %2329 = vmatprep.subr.bf16.mxu0 %v3496_v52  ;;  %v3565_v51 = vld [vmem:[#allocation10 + $0x28] sm:$0xff]  }
 0x1b2   :  { %2370 = vmatprep.subr.bf16.mxu1 %v3499_v53 }
 0x1b4   :  { %2330 = vmatpush1.bf16.msra.mxu0 %v3494_v54  ;;  %v3566_v54 = vld [vmem:[#allocation10 + $0x60] sm:$0xff]  }
 0x1b5   :  { %2371 = vmatpush1.bf16.msra.mxu1 %v3497_v55  ;;  %2331 = vmatprep.subr.bf16.mxu0 %v3502_v56  ;;  %v3576_v55 = vld [vmem:[#allocation10 + $0xf8] sm:$0xff]   ;;  %v3578_v56 = vld [vmem:[#allocation10 + $0xf0] sm:$0xff]  }
 0x1b6   :  { %2372 = vmatprep.subr.bf16.mxu1 %v3505_v59  ;;  %v3567_v59 = vld [vmem:[#allocation10 + $0x20] sm:$0xff]  }
 0x1b8   :  { %2332 = vmatpush1.bf16.msra.mxu0 %v3500_v60  ;;  %v3579_v60 = vld [vmem:[#allocation10 + $0xb0] sm:$0xff]  }
 0x1b9   :  { %2373 = vmatpush1.bf16.msra.mxu1 %v3503_v61  ;;  %2333 = vmatprep.subr.bf16.mxu0 %v3508_v62  ;;  %v3580_v61 = vld [vmem:[#allocation10 + $0xe8] sm:$0xff]   ;;  %v3569_v62 = vld [vmem:[#allocation10 + $0x18] sm:$0xff]  }
 0x1ba   :  { %2374 = vmatprep.subr.bf16.mxu1 %v3511_v63  ;;  %v3570_v63 = vld [vmem:[#allocation10 + $0x50] sm:$0xff]  }
 0x1bc   :  { %2334 = vmatpush1.bf16.msra.mxu0 %v3506_v1  ;;  %v3581_v1 = vld [vmem:[#allocation10 + $0xa8] sm:$0xff]  }
 0x1bd   :  { %2375 = vmatpush1.bf16.msra.mxu1 %v3509_v2  ;;  %2335 = vmatprep.subr.bf16.mxu0 %v3514_v3  ;;  %v3582_v2 = vld [vmem:[#allocation10 + $0xe0] sm:$0xff]   ;;  %v3571_v3 = vld [vmem:[#allocation10 + $0x10] sm:$0xff]  }
 0x1be   :  { %2376 = vmatprep.subr.bf16.mxu1 %v3517_v4  ;;  %v3572_v4 = vld [vmem:[#allocation10 + $0x48] sm:$0xff]  }
 0x1c0   :  { %2336 = vmatpush2.bf16.msra.mxu0 %v3512_v5  ;;  %v3583_v5 = vld [vmem:[#allocation10 + $0xa0] sm:$0xff]  }
 0x1c1   :  { %2377 = vmatpush2.bf16.msra.mxu1 %v3515_v6  ;;  %2337 = vmatprep.subr.bf16.mxu0 %v3520_v7  ;;  %v3584_v6 = vld [vmem:[#allocation10 + $0xd8] sm:$0xff]   ;;  %v3573_v7 = vld [vmem:[#allocation10 + $0x8] sm:$0xff]  }
 0x1c2   :  { %2378 = vmatprep.subr.bf16.mxu1 %v3523_v8  ;;  %v3574_v8 = vld [vmem:[#allocation10 + $0x40] sm:$0xff]  }
 0x1c4   :  { %2338 = vmatpush2.bf16.msra.mxu0 %v3518_v9  ;;  %v3585_v9 = vld [vmem:[#allocation10 + $0x98] sm:$0xff]  }
 0x1c5   :  { %2379 = vmatpush2.bf16.msra.mxu1 %v3521_v10  ;;  %2339 = vmatprep.subr.bf16.mxu0 %v3526_v17  ;;  %v3575_v10 = vld [vmem:[#allocation10] sm:$0xff]   ;;  %v771_v17 = vld [vmem:[%s3902_s4] sm:$0xf] }
 0x1c6   :  { %2380 = vmatprep.subr.bf16.mxu1 %v3529_v14  ;;  %v776_v14 = vrot.slane %v771_v17, %v126_v12 }
 0x1c8   :  { %2340 = vmatpush2.bf16.msra.mxu0 %v3524_v20  ;;  %v780_v20 = vrot.slane %v771_v17, %v130_v15  ;;  %v3589_v15 = vld [vmem:[#allocation10 + $0x88] sm:$0xff]  }
 0x1c9   :  { %2381 = vmatpush2.bf16.msra.mxu1 %v3527_v21  ;;  %2341 = vmatprep.subr.bf16.mxu0 %v3532_v22 }
 0x1ca   :  { %2382 = vmatprep.subr.bf16.mxu1 %v3535_v58 }
 0x1cc   :  { %2342 = vmatpush2.bf16.msra.mxu0 %v3530_v24 }
 0x1cd   :  { %2383 = vmatpush2.bf16.msra.mxu1 %v3533_v25  ;;  %2343 = vmatprep.subr.bf16.mxu0 %v3538_v26  ;;  %v3586_v26 = vld [vmem:[#allocation10 + $0xd0] sm:$0xff]  }
 0x1ce   :  { %2384 = vmatprep.subr.bf16.mxu1 %v3541_v27 }
 0x1d0   :  { %2344 = vmatpush2.bf16.msra.mxu0 %v3536_v28 }
 0x1d1   :  { %2385 = vmatpush2.bf16.msra.mxu1 %v3539_v29  ;;  %2345 = vmatprep.subr.bf16.mxu0 %v3544_v30  ;;  %v3587_v29 = vld [vmem:[#allocation10 + $0x90] sm:$0xff]  }
 0x1d2   :  { %2386 = vmatprep.subr.bf16.mxu1 %v3547_v31 }
 0x1d4   :  { %2346 = vmatpush2.bf16.msra.mxu0 %v3542_v32 }
 0x1d5   :  { %2387 = vmatpush2.bf16.msra.mxu1 %v3545_v33  ;;  %2347 = vmatprep.subr.bf16.mxu0 %v3550_v34 }
 0x1d6   :  { %2388 = vmatprep.subr.bf16.mxu1 %v3553_v36  ;;  %v3588_v36 = vld [vmem:[#allocation10 + $0xc8] sm:$0xff]  }
 0x1d8   :  { %2348 = vmatpush2.bf16.msra.mxu0 %v3548_v37 }
 0x1d9   :  { %2389 = vmatpush2.bf16.msra.mxu1 %v3551_v38  ;;  %2349 = vmatprep.subr.bf16.mxu0 %v3556_v40 }
 0x1da   :  { %2390 = vmatprep.subr.bf16.mxu1 %v3559_v39 }
 0x1dc   :  { %2350 = vmatpush2.bf16.msra.mxu0 %v3554_v41 }
 0x1dd   :  { %2391 = vmatpush2.bf16.msra.mxu1 %v3557_v43  ;;  %3111 = vmatprep.subr.bf16.mxu0 %v3560_v44  ;;  %v3590_v43 = vld [vmem:[#allocation10 + $0xc0] sm:$0xff]  }
 0x1de   :  { %3133 = vmatprep.subr.bf16.mxu1 %v3576_v55 }
 0x1df   :  { %2352 = vmatmul.mubr.bf16.vlgmr.msra.gmra.mxu0 %v3866_v57  ;;  %v2107_v42 = vpop.f32.mrf.mxu0  ;;  %v3577_v57 = vld [vmem:[#allocation10 + $0xb8] sm:$0xff]  }
 0x1e0   :  { %v2148_v47 = vpop.f32.mrf.mxu1  ;;  %2393 = vmatmul.mubr.bf16.vlgmr.msra.gmra.mxu1 %v3864_v23  ;;  %3112 = vmatpush3.bf16.msra.mxu0 %v3561_v45  ;;  %v3568_v23 = vld [vmem:[#allocation10 + $0x58] sm:$0xff]   ;;  %v2108_v21 = vadd.f32 %v2107_v42, %v776_v14  ;;  %v3591_v45 = vld [vmem:[#allocation10 + $0x80] sm:$0xff]   ;;  %v3078_v14 = vld [vmem:[%s3904_s6] ss:$0 sm:$0xff]  ;;  %s3736_s6 = smov [#allocation11]  }
 0x1e1   :  { %v2109_v48 = vpop.f32.mrf.mxu0  ;;  %3113 = vmatprep.subr.bf16.mxu0 %v3562_v46  ;;  %3134 = vmatpush3.bf16.msra.mxu1 %v3577_v57  ;;  %s2775_s30 = sshll.u32 %s3736_s6, 4  ;;  %s2776_s30 = int_to_ptr.vmem [resolvable:$true] %s2775_s30 }
 0x1e2   :  { %v2150_v18 = vpop.f32.mrf.mxu1  ;;  %3135 = vmatprep.subr.bf16.mxu1 %v3578_v56  ;;  %v2110_v22 = vadd.f32 %v2109_v48, %v780_v20  ;;  %v2149_v58 = vadd.f32 %v2148_v47, %v2108_v21  ;;  %v2753_v21 = vand.u32 127, %v124_v11  ;;  %s3696_s8 = scalar_lea.vmem %s2776_s30, 128  ;;  %p3701_p12 = scmp.lt.s32.totalorder %s2776_s30, %s2776_s30 }
 0x1e3   :  { %v2111_v50 = vpop.f32.mrf.mxu0  ;;  %p3697_p11 = scmp.ne.s32.totalorder %s2776_s30, %s3696_s8  ;;  %p3702_p13 = scmp.lt.s32.totalorder %s3696_s8, %s3696_s8 }
 0x1e4   :  { %v2152_v19 = vpop.f32.mrf.mxu1  ;;  %3114 = vmatpush3.bf16.msra.mxu0 %v3563_v35  ;;  %v2151_v27 = vadd.f32 %v2150_v18, %v2110_v22  ;;  %vm2754_vm2 = vcmp.lt.s32.totalorder %v2753_v21, 64 }
 0x1e5   :  { %v2112_v52 = vpop.f32.mrf.mxu0  ;;  %3115 = vmatprep.subr.bf16.mxu0 %v3564_v49  ;;  %3136 = vmatpush3.bf16.msra.mxu1 %v3579_v60  ;;  %p3703_p0 = por %p3702_p13, %p3701_p12 }
 0x1e6   :  { %v2153_v53 = vpop.f32.mrf.mxu1  ;;  %3137 = vmatprep.subr.bf16.mxu1 %v3580_v61  ;;  %v788_v52 = vrot.slane %v771_v17, %v138_v16 }
 0x1e7   :  { %p3704_p1 = pnand %p3703_p0, %p3697_p11 }
 0x1e8   :  { %3116 = vmatpush3.bf16.msra.mxu0 %v3565_v51  ;;  %v784_v51 = vrot.slane %v771_v17, %v134_v13 }
 0x1e9   :  { %3117 = vmatprep.subr.bf16.mxu0 %v3566_v54  ;;  %3138 = vmatpush3.bf16.msra.mxu1 %v3581_v1 }
 0x1ea   :  { %3139 = vmatprep.subr.bf16.mxu1 %v3582_v2 }
 0x1ec   :  { %3118 = vmatpush3.bf16.msra.mxu0 %v3567_v59 }
 0x1ed   :  { %3119 = vmatprep.subr.bf16.mxu0 %v3568_v23  ;;  %3140 = vmatpush3.bf16.msra.mxu1 %v3583_v5 }
 0x1ee   :  { %3141 = vmatprep.subr.bf16.mxu1 %v3584_v6 }
 0x1f0   :  { %3120 = vmatpush3.bf16.msra.mxu0 %v3569_v62 }
 0x1f1   :  { %3121 = vmatprep.subr.bf16.mxu0 %v3570_v63  ;;  %3142 = vmatpush3.bf16.msra.mxu1 %v3585_v9 }
 0x1f2   :  { %3143 = vmatprep.subr.bf16.mxu1 %v3586_v26 }
 0x1f4   :  { %3122 = vmatpush3.bf16.msra.mxu0 %v3571_v3 }
 0x1f5   :  { %3123 = vmatprep.subr.bf16.mxu0 %v3572_v4  ;;  %3144 = vmatpush3.bf16.msra.mxu1 %v3587_v29 }
 0x1f6   :  { %3145 = vmatprep.subr.bf16.mxu1 %v3588_v36 }
 0x1f8   :  { %3124 = vmatpush3.bf16.msra.mxu0 %v3573_v7 }
 0x1f9   :  { %3125 = vmatprep.subr.bf16.mxu0 %v3574_v8  ;;  %3146 = vmatpush3.bf16.msra.mxu1 %v3589_v15 }
 0x1fa   :  { %3147 = vmatprep.subr.bf16.mxu1 %v3590_v43 }
 0x1fc   :  { %3126 = vmatpush3.bf16.msra.mxu0 %v3575_v10 }
 0x1fd   :  { %3148 = vmatpush3.bf16.msra.mxu1 %v3591_v45 }
 0x21f   :  { %v2189_v24 = vpop.f32.mrf.mxu0 }
 0x220   :  { %v2230_v25 = vpop.f32.mrf.mxu1  ;;  %v2190_v28 = vadd.f32 %v2189_v24, %v2149_v58 }
 0x221   :  { %v2191_v30 = vpop.f32.mrf.mxu0 }
 0x222   :  { %v2232_v31 = vpop.f32.mrf.mxu1  ;;  %v2231_v32 = vadd.f32 %v2230_v25, %v2190_v28  ;;  %v2192_v33 = vadd.f32 %v2191_v30, %v2151_v27 }
 0x223   :  { %v2193_v34 = vpop.f32.mrf.mxu0 }
 0x224   :  { %v2234_v12 = vpop.f32.mrf.mxu1  ;;  %v2233_v37 = vadd.f32 %v2232_v31, %v2192_v33  ;;  %v2401_v38 = vmax.f32 %v2231_v32, 0.0 }
 0x225   :  { %v2194_v40 = vpop.f32.mrf.mxu0 }
 0x226   :  { %v2235_v39 = vpop.f32.mrf.mxu1  ;;  %v2402_v41 = vmax.f32 %v2233_v37, 0.0  ;;  %v2405_v46 = vpack.c.bf16 %v2401_v38, %v2401_v38 }
 0x228   :  { %v2406_v44 = vpack.c.bf16 %v2402_v41, %v2402_v41 }
 0x22a   :  { %2704 = vmatprep.mubr.bf16.mxu0 %v2406_v44 }
 0x22b   :  { %2705 = vmatmul.mubr.bf16.vlgmr.msra.gmra.mxu0 %v2405_v46 }
 0x25f   :  { %v2271_v42 = vpop.f32.mrf.mxu0 }
 0x260   :  { %v2312_v47 = vpop.f32.mrf.mxu1  ;;  %v2272_v53 = vadd.f32 %v2271_v42, %v784_v51 }
 0x261   :  { %v2273_v35 = vpop.f32.mrf.mxu0 }
 0x262   :  { %v2314_v48 = vpop.f32.mrf.mxu1  ;;  %v2274_v54 = vadd.f32 %v2273_v35, %v788_v52  ;;  %v2313_v55 = vadd.f32 %v2312_v47, %v2272_v53 }
 0x263   :  { %v2275_v18 = vpop.f32.mrf.mxu0 }
 0x264   :  { %v2316_v49 = vpop.f32.mrf.mxu1  ;;  %v2315_v56 = vadd.f32 %v2314_v48, %v2274_v54 }
 0x265   :  { %v2276_v50 = vpop.f32.mrf.mxu0 }
 0x266   :  { %v2317_v19 = vpop.f32.mrf.mxu1 }
 0x29f   :  { %v2353_v57 = vpop.f32.mrf.mxu0 }
 0x2a0   :  { %v2354_v59 = vadd.f32 %v2353_v57, %v2313_v55  ;;  %v2394_v23 = vpop.f32.mrf.mxu1 }
 0x2a1   :  { %v2355_v60 = vpop.f32.mrf.mxu0 }
 0x2a2   :  { %v2395_v61 = vadd.f32 %v2394_v23, %v2354_v59  ;;  %v2356_v62 = vadd.f32 %v2355_v60, %v2315_v56  ;;  %v2396_v63 = vpop.f32.mrf.mxu1 }
 0x2a3   :  { %v2357_v1 = vpop.f32.mrf.mxu0 }
 0x2a4   :  { %v2397_v2 = vadd.f32 %v2396_v63, %v2356_v62  ;;  %v2398_v3 = vpop.f32.mrf.mxu1  ;;  %v2403_v4 = vmax.f32 %v2395_v61, 0.0 }
 0x2a5   :  { %v2358_v5 = vpop.f32.mrf.mxu0 }
 0x2a6   :  { %v2404_v13 = vmax.f32 %v2397_v2, 0.0  ;;  %v2399_v6 = vpop.f32.mrf.mxu1  ;;  %v2407_v16 = vpack.c.bf16 %v2403_v4, %v2403_v4 }
 0x2a8   :  { %v2408_v0 = vpack.c.bf16 %v2404_v13, %v2404_v13 }
 0x2aa   :  { %2744 = vmatprep.mubr.bf16.mxu1 %v2408_v0 }
 0x2ab   :  { %2745 = vmatmul.mubr.bf16.vlgmr.msra.gmra.mxu1 %v2407_v16 }
 0x2eb   :  { %v3127_v7 = vpop.f32.mrf.mxu0 }
 0x2ed   :  { %v3128_v8 = vpop.f32.mrf.mxu0 }
 0x2ee   :  { %v3129_v9 = vadd.f32 %v3128_v8, %v3127_v7 }
 0x2ef   :  { %v3130_v10 = vpop.f32.mrf.mxu0 }
 0x2f0   :  { %v2707_v58 = vadd.f32 %v3129_v9, %v3078_v14 }
 0x2f1   :  { %v3131_v17 = vpop.f32.mrf.mxu0 }
 0x36b   :  { %v3149_v20 = vpop.f32.mrf.mxu1 }
 0x36d   :  { %v3150_v22 = vpop.f32.mrf.mxu1 }
 0x36e   :  { %v3151_v24 = vadd.f32 %v3150_v22, %v3149_v20 }
 0x36f   :  { %v3152_v25 = vpop.f32.mrf.mxu1 }
 0x370   :  { %v2747_v26 = vadd.f32 %v3151_v24, %v2707_v58 }
 0x371   :  { %v3153_v27 = vpop.f32.mrf.mxu1 }
 0x372   :  { %v2755_v28 = vsel %vm2754_vm2, %v2747_v26, -inf }
 0x373   :  { %2756 = vmax.xlane.f32.xlu0 %v2755_v28 }
 0x3fc   :  { %v2757_v29 = vpop.xlane.xlu0 %2756 }
 0x3fd   :  { %v2758_v30 = vsub.f32 %v2755_v28, %v2757_v29 }
 0x3ff   :  { %v2759_v31 = vmul.f32 1.442695, %v2758_v30 }
 0x401   :  { %3592 = vpow2.f32 %v2759_v31 }
 0x40e   :  { %v3593_v32 = vpop.eup %3592 }
 0x40f   :  { %2761 = vadd.xlane.f32.xlu0 %v3593_v32 }
 0x498   :  { %v2762_v33 = vpop.xlane.xlu0 %2761 }
 0x499   :  { %3594 = vlog2.f32 %v2762_v33 }
 0x4a6   :  { %v3595_v34 = vpop.eup %3594 }
 0x4a7   :  { %v2764_v11 = vmul.f32 0.6931472, %v3595_v34 }
 0x4a9   :  { %v2765_v12 = vadd.f32 %v2764_v11, %v2757_v29 }
 0x4ab   :  { %v2766_v36 = vsub.f32 %v2747_v26, %v2765_v12 }
 0x4ad   :  { %v2767_v37 = vsel %vm2754_vm2, %v2766_v36, %v2747_v26 }
 0x4ae   :  { %2768 = vst [vmem:[#allocation11] sm:$0xff] %v2767_v37 }
 0x4af   :  { %3707 = shalt.err (!%p3704_p1)
}
 0x4b0   :  { %2778 = dma.vmem_to_hbm [thread:$0]  %s2776_s30, 128, %s3905_s7, [#allocation4]  }
 0x4b1   :  { %3722 = dma.done.wait [#allocation4], 128  }
 0x4b2   :  { %3723 = vsyncadd [#allocation4], 4294967168 }
 0x4b3   :  { %2782 = vsyncpa [#allocation3], 1 }
 0x4b4   :  { %2783 = vsyncpa [#allocation6], 1 }
 0x4b5   :  { %2784 = vsyncpa [#allocation9], 1 }
 0x4b6   :  { %2785 = vsyncpa [#allocation4], 1 }

</bundles_post_ra>
